<compile_context>
chip_gen: v7x
topology: tpu7x:2x2x1
jax: 0.10.0
libtpu: 0.0.40
codegen_flags: <defaults>
</compile_context>

<pallas_src>
import functools

import jax
import jax.numpy as jnp
from jax.experimental import pallas as pl
from jax.experimental.pallas import tpu as pltpu


D_IN, D_H1, D_H2, D_H3, D_OUT = 784, 1024, 512, 256, 1


def _disc_kernel(x_ref,
                 w1_ref, b1_ref,
                 w2_ref, b2_ref,
                 w3_ref, b3_ref,
                 w4_ref, b4_ref,
                 out_ref):
    # x tile: (TB, 784) f32 -> bf16 for the MXU; accumulate in f32.
    x = x_ref[...].astype(jnp.bfloat16)

    # Layer 1: 784 -> 1024, ReLU   (bias add + ReLU stay in f32)
    h = jnp.dot(x, w1_ref[...], preferred_element_type=jnp.float32) + b1_ref[...]
    h = jnp.maximum(h, 0.0)

    # Layer 2: 1024 -> 512, ReLU
    h = jnp.dot(h.astype(jnp.bfloat16), w2_ref[...],
                preferred_element_type=jnp.float32) + b2_ref[...]
    h = jnp.maximum(h, 0.0)

    # Layer 3: 512 -> 256, ReLU
    h = jnp.dot(h.astype(jnp.bfloat16), w3_ref[...],
                preferred_element_type=jnp.float32) + b3_ref[...]
    h = jnp.maximum(h, 0.0)

    # Layer 4: 256 -> 1 as a VPU multiply + lane reduction (avoids N=1 MXU matmul).
    w4_row = w4_ref[...].astype(jnp.float32)                # (1, 256)
    z = jnp.sum(h * w4_row, axis=-1, keepdims=True) + b4_ref[...]   # (TB, 1)

    out_ref[...] = (1.0 / (1.0 + jnp.exp(-z))).astype(out_ref.dtype)


def _round_up(n, m):
    return ((n + m - 1) // m) * m


@functools.partial(jax.jit, static_argnames=())
def _run(x2d, w1, b1, w2, b2, w3, b3, w4, b4):
    B = x2d.shape[0]

    # Batch tile: up to 256 rows per grid step (fills the MXU on v6e/v7x),
    # rounded to the sublane granule of 8.
    TB = min(256, _round_up(B, 8))
    padded_B = _round_up(B, TB)
    if padded_B != B:
        x2d = jnp.pad(x2d, ((0, padded_B - B), (0, 0)))
    num_tiles = padded_B // TB

    const_spec = lambda shape: pl.BlockSpec(shape, lambda i: tuple(0 for _ in shape))

    flops = 2 * padded_B * (D_IN * D_H1 + D_H1 * D_H2 + D_H2 * D_H3 + D_H3)
    weight_bytes = 2 * (D_IN * D_H1 + D_H1 * D_H2 + D_H2 * D_H3 + D_H3)  # bf16
    bytes_accessed = weight_bytes + padded_B * D_IN * 4 + padded_B * 4
    cost = pl.CostEstimate(flops=flops,
                           transcendentals=padded_B,
                           bytes_accessed=bytes_accessed)

    out = pl.pallas_call(
        _disc_kernel,
        out_shape=jax.ShapeDtypeStruct((padded_B, 1), jnp.float32),
        grid_spec=pltpu.PrefetchScalarGridSpec(
            num_scalar_prefetch=0,
            grid=(num_tiles,),
            in_specs=[
                pl.BlockSpec((TB, D_IN), lambda i: (i, 0)),     # x: batch-tiled
                const_spec(w1.shape), const_spec(b1.shape),     # weights: VMEM-resident
                const_spec(w2.shape), const_spec(b2.shape),
                const_spec(w3.shape), const_spec(b3.shape),
                const_spec(w4.shape), const_spec(b4.shape),
            ],
            out_specs=pl.BlockSpec((TB, 1), lambda i: (i, 0)),
        ),
        compiler_params=pltpu.CompilerParams(
            dimension_semantics=("parallel",),
            vmem_limit_bytes=24 << 20,
        ),
        cost_estimate=cost,
    )(x2d, w1, b1, w2, b2, w3, b3, w4, b4)

    return out[:B]


def discriminator_forward(x_nchw, params):
    """x_nchw: (B, 1, 28, 28) float32. Returns (B, 1) float32 in (0, 1)."""
    B = x_nchw.shape[0]
    x2d = x_nchw.reshape(B, D_IN)                              # x.view(B, 784)

    (w1, b1), (w2, b2), (w3, b3), (w4, b4) = params

    # Cast matmul weights to bf16 once (outside the kernel). Biases stay f32.
    w1b = w1.astype(jnp.bfloat16)
    w2b = w2.astype(jnp.bfloat16)
    w3b = w3.astype(jnp.bfloat16)
    w4b = w4.reshape(1, D_H3).astype(jnp.bfloat16)             # (1, 256) row for VPU reduce
    b4r = b4.reshape(1, 1)

    return _run(x2d, w1b, b1, w2b, b2, w3b, b3, w4b, b4r)


def init_params(key):
    """Deterministic init matching nn.Linear's U(-1/sqrt(fan_in), 1/sqrt(fan_in)).
    Weights kept as (in, out); biases as (1, out) for lane-major broadcast."""
    dims = [(D_IN, D_H1), (D_H1, D_H2), (D_H2, D_H3), (D_H3, D_OUT)]
    params = []
    for (fan_in, fan_out) in dims:
        key, kw, kb = jax.random.split(key, 3)
        bound = 1.0 / (fan_in ** 0.5)
        w = jax.random.uniform(kw, (fan_in, fan_out), jnp.float32, -bound, bound)
        b = jax.random.uniform(kb, (1, fan_out), jnp.float32, -bound, bound)
        params.append((w, b))
    return params


def _reference(x_nchw, params):
    """Plain-JAX reference mimicking the kernel's bf16-input / f32-accumulate path."""
    B = x_nchw.shape[0]
    h = x_nchw.reshape(B, D_IN)
    (w1, b1), (w2, b2), (w3, b3), (w4, b4) = params
    for (w, b) in [(w1, b1), (w2, b2), (w3, b3)]:
        h = jnp.dot(h.astype(jnp.bfloat16), w.astype(jnp.bfloat16),
                    preferred_element_type=jnp.float32) + b
        h = jnp.maximum(h, 0.0)
    w4_row = w4.reshape(1, D_H3).astype(jnp.bfloat16).astype(jnp.float32)
    z = jnp.sum(h * w4_row, axis=-1, keepdims=True) + b4.reshape(1, 1)
    return jax.nn.sigmoid(z)


if __name__ == "__main__":
    key = jax.random.PRNGKey(0)
    key, kx = jax.random.split(key)

    B = 8
    x = jax.random.normal(kx, (B, 1, 28, 28), jnp.float32)     # NCHW MNIST-like input
    params = init_params(key)

    out = discriminator_forward(x, params)
    out = jax.block_until_ready(out)

    # Sanity: correct shape, finite, sigmoid range.
    assert out.shape == (B, 1), out.shape
    assert bool(jnp.all(jnp.isfinite(out)))
    assert bool(jnp.all((out > 0.0) & (out < 1.0)))

    # Cross-check against a plain-JAX reference using the same bf16/f32 recipe.
    ref = _reference(x, params)
    assert bool(jnp.allclose(out, ref, atol=5e-3, rtol=0.0)), (
        float(jnp.max(jnp.abs(out - ref))))

    # Loose check against a pure-f32 reference (bf16 quantization error budget).
    h = x.reshape(B, D_IN)
    for i, (w, b) in enumerate(params):
        h = h @ w + b
        if i < 3:
            h = jnp.maximum(h, 0.0)
    ref_f32 = jax.nn.sigmoid(h)
    assert bool(jnp.allclose(out, ref_f32, atol=3e-2, rtol=0.0)), (
        float(jnp.max(jnp.abs(out - ref_f32))))

    print("KERNEL_OK")
</pallas_src>

<mosaic_0001>
module attributes {stable_mosaic.version = 11 : i64} {
  func.func @_disc_kernel(%arg0: i32, %arg1: memref<8x784xf32, #tpu.memory_space<vmem>>, %arg2: memref<784x1024xbf16, #tpu.memory_space<vmem>>, %arg3: memref<1x1024xf32, #tpu.memory_space<vmem>>, %arg4: memref<1024x512xbf16, #tpu.memory_space<vmem>>, %arg5: memref<1x512xf32, #tpu.memory_space<vmem>>, %arg6: memref<512x256xbf16, #tpu.memory_space<vmem>>, %arg7: memref<1x256xf32, #tpu.memory_space<vmem>>, %arg8: memref<1x256xbf16, #tpu.memory_space<vmem>>, %arg9: memref<1x1xf32, #tpu.memory_space<vmem>>, %arg10: memref<8x1xf32, #tpu.memory_space<vmem>>) attributes {dimension_semantics = [#tpu.dimension_semantics<parallel>], iteration_bounds = array<i64: 1>, scalar_prefetch = 0 : i64, scratch_operands = 0 : i64, tpu.core_type = #tpu.core_type<tc>, window_params = [{transform_indices = @transform_0, window_bounds = array<i64: 8, 784>}, {pipeline_mode = #tpu.pipeline_mode<synchronous>, transform_indices = @transform_1, window_bounds = array<i64: 784, 1024>}, {pipeline_mode = #tpu.pipeline_mode<synchronous>, transform_indices = @transform_2, window_bounds = array<i64: 1, 1024>}, {pipeline_mode = #tpu.pipeline_mode<synchronous>, transform_indices = @transform_3, window_bounds = array<i64: 1024, 512>}, {pipeline_mode = #tpu.pipeline_mode<synchronous>, transform_indices = @transform_4, window_bounds = array<i64: 1, 512>}, {pipeline_mode = #tpu.pipeline_mode<synchronous>, transform_indices = @transform_5, window_bounds = array<i64: 512, 256>}, {pipeline_mode = #tpu.pipeline_mode<synchronous>, transform_indices = @transform_6, window_bounds = array<i64: 1, 256>}, {pipeline_mode = #tpu.pipeline_mode<synchronous>, transform_indices = @transform_7, window_bounds = array<i64: 1, 256>}, {pipeline_mode = #tpu.pipeline_mode<synchronous>, transform_indices = @transform_8, window_bounds = array<i64: 1, 1>}, {transform_indices = @transform_9, window_bounds = array<i64: 8, 1>}]} {
    %c0 = arith.constant 0 : index
    %c0_0 = arith.constant 0 : index
    %0 = vector.load %arg1[%c0, %c0_0] : memref<8x784xf32, #tpu.memory_space<vmem>>, vector<8x784xf32>
    %1 = arith.truncf %0 : vector<8x784xf32> to vector<8x784xbf16>
    %c0_1 = arith.constant 0 : index
    %c0_2 = arith.constant 0 : index
    %2 = vector.load %arg2[%c0_1, %c0_2] : memref<784x1024xbf16, #tpu.memory_space<vmem>>, vector<784x1024xbf16>
    %cst = arith.constant dense<0.000000e+00> : vector<8x1024xf32>
    %3 = tpu.matmul %1, %2, %cst {dimension_numbers = #tpu.dot_dimension_numbers<[1], [0], [0], [1], [0, 0, 1, 1], [], []>} : vector<8x784xbf16>, vector<784x1024xbf16>, vector<8x1024xf32> -> vector<8x1024xf32>
    %c0_3 = arith.constant 0 : index
    %c0_4 = arith.constant 0 : index
    %4 = vector.load %arg3[%c0_3, %c0_4] : memref<1x1024xf32, #tpu.memory_space<vmem>>, vector<1x1024xf32>
    %5 = vector.broadcast %4 : vector<1x1024xf32> to vector<8x1024xf32>
    %6 = arith.addf %3, %5 : vector<8x1024xf32>
    %cst_5 = arith.constant 0.000000e+00 : f32
    %7 = vector.broadcast %cst_5 : f32 to vector<8x1024xf32>
    %8 = arith.maximumf %6, %7 : vector<8x1024xf32>
    %9 = arith.truncf %8 : vector<8x1024xf32> to vector<8x1024xbf16>
    %c0_6 = arith.constant 0 : index
    %c0_7 = arith.constant 0 : index
    %10 = vector.load %arg4[%c0_6, %c0_7] : memref<1024x512xbf16, #tpu.memory_space<vmem>>, vector<1024x512xbf16>
    %cst_8 = arith.constant dense<0.000000e+00> : vector<8x512xf32>
    %11 = tpu.matmul %9, %10, %cst_8 {dimension_numbers = #tpu.dot_dimension_numbers<[1], [0], [0], [1], [0, 0, 1, 1], [], []>} : vector<8x1024xbf16>, vector<1024x512xbf16>, vector<8x512xf32> -> vector<8x512xf32>
    %c0_9 = arith.constant 0 : index
    %c0_10 = arith.constant 0 : index
    %12 = vector.load %arg5[%c0_9, %c0_10] : memref<1x512xf32, #tpu.memory_space<vmem>>, vector<1x512xf32>
    %13 = vector.broadcast %12 : vector<1x512xf32> to vector<8x512xf32>
    %14 = arith.addf %11, %13 : vector<8x512xf32>
    %cst_11 = arith.constant 0.000000e+00 : f32
    %15 = vector.broadcast %cst_11 : f32 to vector<8x512xf32>
    %16 = arith.maximumf %14, %15 : vector<8x512xf32>
    %17 = arith.truncf %16 : vector<8x512xf32> to vector<8x512xbf16>
    %c0_12 = arith.constant 0 : index
    %c0_13 = arith.constant 0 : index
    %18 = vector.load %arg6[%c0_12, %c0_13] : memref<512x256xbf16, #tpu.memory_space<vmem>>, vector<512x256xbf16>
    %cst_14 = arith.constant dense<0.000000e+00> : vector<8x256xf32>
    %19 = tpu.matmul %17, %18, %cst_14 {dimension_numbers = #tpu.dot_dimension_numbers<[1], [0], [0], [1], [0, 0, 1, 1], [], []>} : vector<8x512xbf16>, vector<512x256xbf16>, vector<8x256xf32> -> vector<8x256xf32>
    %c0_15 = arith.constant 0 : index
    %c0_16 = arith.constant 0 : index
    %20 = vector.load %arg7[%c0_15, %c0_16] : memref<1x256xf32, #tpu.memory_space<vmem>>, vector<1x256xf32>
    %21 = vector.broadcast %20 : vector<1x256xf32> to vector<8x256xf32>
    %22 = arith.addf %19, %21 : vector<8x256xf32>
    %cst_17 = arith.constant 0.000000e+00 : f32
    %23 = vector.broadcast %cst_17 : f32 to vector<8x256xf32>
    %24 = arith.maximumf %22, %23 : vector<8x256xf32>
    %c0_18 = arith.constant 0 : index
    %c0_19 = arith.constant 0 : index
    %25 = vector.load %arg8[%c0_18, %c0_19] : memref<1x256xbf16, #tpu.memory_space<vmem>>, vector<1x256xbf16>
    %26 = arith.extf %25 : vector<1x256xbf16> to vector<1x256xf32>
    %27 = vector.broadcast %26 : vector<1x256xf32> to vector<8x256xf32>
    %28 = arith.mulf %24, %27 : vector<8x256xf32>
    %cst_20 = arith.constant dense<0.000000e+00> : vector<8xf32>
    %29 = vector.multi_reduction <add>, %28, %cst_20 [1] : vector<8x256xf32> to vector<8xf32>
    %30 = vector.shape_cast %29 : vector<8xf32> to vector<8x1xf32>
    %c0_21 = arith.constant 0 : index
    %c0_22 = arith.constant 0 : index
    %31 = vector.load %arg9[%c0_21, %c0_22] : memref<1x1xf32, #tpu.memory_space<vmem>>, vector<1x1xf32>
    %32 = vector.broadcast %31 : vector<1x1xf32> to vector<8x1xf32>
    %33 = arith.addf %30, %32 : vector<8x1xf32>
    %cst_23 = arith.constant 0.000000e+00 : f32
    %34 = vector.broadcast %cst_23 : f32 to vector<8x1xf32>
    %35 = arith.subf %34, %33 : vector<8x1xf32>
    %36 = math.exp %35 : vector<8x1xf32>
    %cst_24 = arith.constant 1.000000e+00 : f32
    %37 = vector.broadcast %cst_24 : f32 to vector<8x1xf32>
    %38 = arith.addf %37, %36 : vector<8x1xf32>
    %cst_25 = arith.constant 1.000000e+00 : f32
    %39 = vector.broadcast %cst_25 : f32 to vector<8x1xf32>
    %40 = arith.divf %39, %38 : vector<8x1xf32>
    %c0_26 = arith.constant 0 : index
    %c0_27 = arith.constant 0 : index
    %41 = vector.load %arg10[%c0_26, %c0_27] : memref<8x1xf32, #tpu.memory_space<vmem>>, vector<8x1xf32>
    tpu.vector_store %arg10[%c0_26, %c0_27], %40 {strides = array<i32>} : memref<8x1xf32, #tpu.memory_space<vmem>>, vector<8x1xf32>,
    return
  }
  func.func @transform_0(%arg0: i32) -> (i32, i32) {
    %c0_i32 = arith.constant 0 : i32
    %c0_i32_0 = arith.constant 0 : i32
    return %arg0, %c0_i32 : i32, i32
  }
  func.func @transform_1(%arg0: i32) -> (i32, i32) {
    %c0_i32 = arith.constant 0 : i32
    %c0_i32_0 = arith.constant 0 : i32
    %c0_i32_1 = arith.constant 0 : i32
    return %c0_i32, %c0_i32_0 : i32, i32
  }
  func.func @transform_2(%arg0: i32) -> (i32, i32) {
    %c0_i32 = arith.constant 0 : i32
    %c0_i32_0 = arith.constant 0 : i32
    %c0_i32_1 = arith.constant 0 : i32
    return %c0_i32, %c0_i32_0 : i32, i32
  }
  func.func @transform_3(%arg0: i32) -> (i32, i32) {
    %c0_i32 = arith.constant 0 : i32
    %c0_i32_0 = arith.constant 0 : i32
    %c0_i32_1 = arith.constant 0 : i32
    return %c0_i32, %c0_i32_0 : i32, i32
  }
  func.func @transform_4(%arg0: i32) -> (i32, i32) {
    %c0_i32 = arith.constant 0 : i32
    %c0_i32_0 = arith.constant 0 : i32
    %c0_i32_1 = arith.constant 0 : i32
    return %c0_i32, %c0_i32_0 : i32, i32
  }
  func.func @transform_5(%arg0: i32) -> (i32, i32) {
    %c0_i32 = arith.constant 0 : i32
    %c0_i32_0 = arith.constant 0 : i32
    %c0_i32_1 = arith.constant 0 : i32
    return %c0_i32, %c0_i32_0 : i32, i32
  }
  func.func @transform_6(%arg0: i32) -> (i32, i32) {
    %c0_i32 = arith.constant 0 : i32
    %c0_i32_0 = arith.constant 0 : i32
    %c0_i32_1 = arith.constant 0 : i32
    return %c0_i32, %c0_i32_0 : i32, i32
  }
  func.func @transform_7(%arg0: i32) -> (i32, i32) {
    %c0_i32 = arith.constant 0 : i32
    %c0_i32_0 = arith.constant 0 : i32
    %c0_i32_1 = arith.constant 0 : i32
    return %c0_i32, %c0_i32_0 : i32, i32
  }
  func.func @transform_8(%arg0: i32) -> (i32, i32) {
    %c0_i32 = arith.constant 0 : i32
    %c0_i32_0 = arith.constant 0 : i32
    %c0_i32_1 = arith.constant 0 : i32
    return %c0_i32, %c0_i32_0 : i32, i32
  }
  func.func @transform_9(%arg0: i32) -> (i32, i32) {
    %c0_i32 = arith.constant 0 : i32
    %c0_i32_0 = arith.constant 0 : i32
    return %arg0, %c0_i32 : i32, i32
  }
}

</mosaic_0001>

<bundles_post_ra>
// kernel: _run.1
= control target key start
LH: loop header
LB: loop body
LE: loop exit
PB: predicated region body
PF: predicated region fallthrough
CT: control target
= control target key end

     0   :  { %s7434_s0 = inlined_call_operand.hbm [shape: f32[8,784], index: 0, kind: input, shape index: {}]   ;;  %s7435_s1 = inlined_call_operand.hbm [shape: bf16[784,1024], index: 1, kind: input, shape index: {}]   ;;  %s7436_s2 = inlined_call_operand.hbm [shape: f32[1,1024], index: 2, kind: input, shape index: {}]   ;;  %s7437_s3 = inlined_call_operand.hbm [shape: bf16[1024,512], index: 3, kind: input, shape index: {}]   ;;  %s7438_s4 = inlined_call_operand.hbm [shape: f32[1,512], index: 4, kind: input, shape index: {}]   ;;  %s7439_s5 = inlined_call_operand.hbm [shape: bf16[512,256], index: 5, kind: input, shape index: {}]   ;;  %s7440_s6 = inlined_call_operand.hbm [shape: f32[1,256], index: 6, kind: input, shape index: {}]   ;;  %s7441_s7 = inlined_call_operand.hbm [shape: bf16[1,256], index: 7, kind: input, shape index: {}]   ;;  %s7442_s8 = inlined_call_operand.<no memory space> [shape: f32[1,1], index: 8, kind: input, shape index: {}]   ;;  %s7443_s9 = inlined_call_operand.vmem [shape: f32[8,1], index: 9, kind: output, shape index: {}]  }
   0x1   :  { %v14_v0 = vstv %s7442_s8 }
   0x2   :  { %15 = vst [vmem:[#allocation2] sm:$0x1] %v14_v0 }
   0x3   :  { %16 = vsyncpa [#allocation4], 0 }
   0x4   :  { %17 = vsyncpa [#allocation6], 0 }
   0x5   :  { %18 = vsyncpa [#allocation9], 0 }
   0x6   :  { %19 = vsyncpa [#allocation12], 0 }
   0x7   :  { %20 = vsyncpa [#allocation15], 0  ;;  %s7134_s11 = smov [#allocation5]   ;;  %s6948_s15 = scalar_lea.hbm %s7435_s1, 50176 }
   0x8   :  { %s36_s12 = sshll.u32 %s7134_s11, 4  ;;  %p6949_p0 = scmp.ne.s32.totalorder %s7435_s1, %s6948_s15  ;;  %s37_s12 = int_to_ptr.vmem [resolvable:$true] %s36_s12 }
   0x9   :  { %p6952_p1 = scmp.lt.u32.totalorder %s6948_s15, %s7435_s1 }
   0xb   :  { %p6954_p2 = pnand %p6952_p1, %p6949_p0 }
   0xd   :  { %6957 = shalt.err (!%p6954_p2)
}
   0xe   :  { %s6958_s8 = scalar_lea.vmem %s37_s12, 50176  ;;  %p6963_p4 = scmp.lt.s32.totalorder %s37_s12, %s37_s12 }
   0xf   :  { %p6959_p3 = scmp.ne.s32.totalorder %s37_s12, %s6958_s8  ;;  %p6964_p5 = scmp.lt.s32.totalorder %s6958_s8, %s6958_s8 }
  0x11   :  { %p6965_p6 = por %p6964_p5, %p6963_p4 }
  0x13   :  { %p6966_p7 = pnand %p6965_p6, %p6959_p3 }
  0x15   :  { %6969 = shalt.err (!%p6966_p7)
}
  0x16   :  { %s7135_s20 = smov 512   ;;  %s7136_s21 = smov 32  }
  0x17   :  { %42 = dma.hbm_to_vmem [thread:$0]  %s7435_s1, 50176, %s37_s12, [#allocation6], %s7135_s20, %s7135_s20, %s7136_s21  }
  0x18   :  { %s7137_s24 = smov [#allocation8]   ;;  %s6970_s28 = scalar_lea.hbm %s7437_s3, 32768 }
  0x19   :  { %s58_s25 = sshll.u32 %s7137_s24, 4  ;;  %p6971_p8 = scmp.ne.s32.totalorder %s7437_s3, %s6970_s28  ;;  %s59_s25 = int_to_ptr.vmem [resolvable:$true] %s58_s25 }
  0x1a   :  { %p6974_p9 = scmp.lt.u32.totalorder %s6970_s28, %s7437_s3 }
  0x1c   :  { %p6976_p10 = pnand %p6974_p9, %p6971_p8 }
  0x1e   :  { %6979 = shalt.err (!%p6976_p10)
}
  0x1f   :  { %s6980_s13 = scalar_lea.vmem %s59_s25, 32768  ;;  %p6985_p12 = scmp.lt.s32.totalorder %s59_s25, %s59_s25 }
  0x20   :  { %p6981_p11 = scmp.ne.s32.totalorder %s59_s25, %s6980_s13  ;;  %p6986_p13 = scmp.lt.s32.totalorder %s6980_s13, %s6980_s13 }
  0x22   :  { %p6987_p0 = por %p6986_p13, %p6985_p12 }
  0x24   :  { %p6988_p1 = pnand %p6987_p0, %p6981_p11 }
  0x26   :  { %6991 = shalt.err (!%p6988_p1)
}
  0x27   :  { %s7138_s1 = smov 256   ;;  %s7139_s12 = smov 16  }
  0x28   :  { %64 = dma.hbm_to_vmem [thread:$0]  %s7437_s3, 32768, %s59_s25, [#allocation9], %s7138_s1, %s7138_s1, %s7139_s12  }
  0x29   :  { %s7140_s16 = smov [#allocation11]   ;;  %s6992_s8 = scalar_lea.hbm %s7439_s5, 8192 }
  0x2a   :  { %s80_s17 = sshll.u32 %s7140_s16, 4  ;;  %p6993_p2 = scmp.ne.s32.totalorder %s7439_s5, %s6992_s8  ;;  %s81_s17 = int_to_ptr.vmem [resolvable:$true] %s80_s17 }
  0x2b   :  { %p6996_p3 = scmp.lt.u32.totalorder %s6992_s8, %s7439_s5 }
  0x2d   :  { %p6998_p4 = pnand %p6996_p3, %p6993_p2 }
  0x2f   :  { %7001 = shalt.err (!%p6998_p4)
}
  0x30   :  { %s7002_s24 = scalar_lea.vmem %s81_s17, 8192  ;;  %p7007_p6 = scmp.lt.s32.totalorder %s81_s17, %s81_s17 }
  0x31   :  { %p7003_p5 = scmp.ne.s32.totalorder %s81_s17, %s7002_s24  ;;  %p7008_p7 = scmp.lt.s32.totalorder %s7002_s24, %s7002_s24 }
  0x33   :  { %p7009_p8 = por %p7008_p7, %p7007_p6 }
  0x35   :  { %p7010_p9 = pnand %p7009_p8, %p7003_p5 }
  0x37   :  { %7013 = shalt.err (!%p7010_p9)
}
  0x38   :  { %s7141_s3 = smov 128   ;;  %s7142_s25 = smov 8  }
  0x39   :  { %86 = dma.hbm_to_vmem [thread:$0]  %s7439_s5, 8192, %s81_s17, [#allocation12], %s7141_s3, %s7141_s3, %s7142_s25  }
  0x3a   :  { %s7143_s28 = smov [#allocation3]   ;;  %s7144_s30 = smov [#allocation7]  }
  0x3b   :  { %s27_s29 = sshll.u32 %s7143_s28, 4  ;;  %s49_s10 = sshll.u32 %s7144_s30, 4  ;;  %s28_s29 = int_to_ptr.vmem [resolvable:$true] %s27_s29  ;;  %s50_s10 = int_to_ptr.vmem [resolvable:$true] %s49_s10 }
  0x3c   :  { %s7014_s1 = scalar_lea.hbm %s7434_s0, 896 }
  0x3d   :  { %p7015_p10 = scmp.ne.s32.totalorder %s7434_s0, %s7014_s1  ;;  %p7018_p11 = scmp.lt.u32.totalorder %s7014_s1, %s7434_s0 }
  0x3f   :  { %p7020_p12 = pnand %p7018_p11, %p7015_p10 }
  0x41   :  { %7023 = shalt.err (!%p7020_p12)
}
  0x42   :  { %s7024_s5 = scalar_lea.vmem %s28_s29, 896  ;;  %p7029_p0 = scmp.lt.s32.totalorder %s28_s29, %s28_s29 }
  0x43   :  { %p7025_p13 = scmp.ne.s32.totalorder %s28_s29, %s7024_s5  ;;  %p7030_p1 = scmp.lt.s32.totalorder %s7024_s5, %s7024_s5 }
  0x45   :  { %p7031_p2 = por %p7030_p1, %p7029_p0 }
  0x47   :  { %p7032_p3 = pnand %p7031_p2, %p7025_p13 }
  0x49   :  { %7035 = shalt.err (!%p7032_p3)
}
  0x4a   :  { %30 = dma.hbm_to_vmem [thread:$0]  %s7434_s0, 896, %s28_s29, [#allocation4]  }
  0x4b   :  { %s7036_s20 = scalar_lea.hbm %s7436_s2, 128 }
  0x4c   :  { %p7037_p4 = scmp.ne.s32.totalorder %s7436_s2, %s7036_s20  ;;  %p7040_p5 = scmp.lt.u32.totalorder %s7036_s20, %s7436_s2 }
  0x4e   :  { %p7042_p6 = pnand %p7040_p5, %p7037_p4 }
  0x50   :  { %7045 = shalt.err (!%p7042_p6)
}
  0x51   :  { %s7046_s3 = scalar_lea.vmem %s50_s10, 128  ;;  %p7051_p8 = scmp.lt.s32.totalorder %s50_s10, %s50_s10 }
  0x52   :  { %p7047_p7 = scmp.ne.s32.totalorder %s50_s10, %s7046_s3  ;;  %p7052_p9 = scmp.lt.s32.totalorder %s7046_s3, %s7046_s3 }
  0x54   :  { %p7053_p10 = por %p7052_p9, %p7051_p8 }
  0x56   :  { %p7054_p11 = pnand %p7053_p10, %p7047_p7 }
  0x58   :  { %7057 = shalt.err (!%p7054_p11)
}
  0x59   :  { %52 = dma.hbm_to_vmem [thread:$0]  %s7436_s2, 128, %s50_s10, [#allocation6]  }
  0x5a   :  { %s7145_s26 = smov [#allocation10]   ;;  %s7146_s28 = smov [#allocation13]  }
  0x5b   :  { %s71_s27 = sshll.u32 %s7145_s26, 4  ;;  %s93_s29 = sshll.u32 %s7146_s28, 4  ;;  %s72_s27 = int_to_ptr.vmem [resolvable:$true] %s71_s27  ;;  %s94_s29 = int_to_ptr.vmem [resolvable:$true] %s93_s29 }
  0x5c   :  { %s7058_s13 = scalar_lea.hbm %s7438_s4, 64 }
  0x5d   :  { %p7059_p12 = scmp.ne.s32.totalorder %s7438_s4, %s7058_s13  ;;  %p7062_p13 = scmp.lt.u32.totalorder %s7058_s13, %s7438_s4 }
  0x5f   :  { %p7064_p0 = pnand %p7062_p13, %p7059_p12 }
  0x61   :  { %7067 = shalt.err (!%p7064_p0)
}
  0x62   :  { %s7068_s2 = scalar_lea.vmem %s72_s27, 64  ;;  %p7073_p2 = scmp.lt.s32.totalorder %s72_s27, %s72_s27 }
  0x63   :  { %p7069_p1 = scmp.ne.s32.totalorder %s72_s27, %s7068_s2  ;;  %p7074_p3 = scmp.lt.s32.totalorder %s7068_s2, %s7068_s2 }
  0x65   :  { %p7075_p4 = por %p7074_p3, %p7073_p2 }
  0x67   :  { %p7076_p5 = pnand %p7075_p4, %p7069_p1 }
  0x69   :  { %7079 = shalt.err (!%p7076_p5)
}
  0x6a   :  { %74 = dma.hbm_to_vmem [thread:$0]  %s7438_s4, 64, %s72_s27, [#allocation9]  }
  0x6b   :  { %s7080_s18 = scalar_lea.hbm %s7440_s6, 32 }
  0x6c   :  { %p7081_p6 = scmp.ne.s32.totalorder %s7440_s6, %s7080_s18  ;;  %p7084_p7 = scmp.lt.u32.totalorder %s7080_s18, %s7440_s6 }
  0x6e   :  { %p7086_p8 = pnand %p7084_p7, %p7081_p6 }
  0x70   :  { %7089 = shalt.err (!%p7086_p8)
}
  0x71   :  { %s7090_s22 = scalar_lea.vmem %s94_s29, 32  ;;  %p7095_p10 = scmp.lt.s32.totalorder %s94_s29, %s94_s29 }
  0x72   :  { %p7091_p9 = scmp.ne.s32.totalorder %s94_s29, %s7090_s22  ;;  %p7096_p11 = scmp.lt.s32.totalorder %s7090_s22, %s7090_s22 }
  0x74   :  { %p7097_p12 = por %p7096_p11, %p7095_p10 }
  0x76   :  { %p7098_p13 = pnand %p7097_p12, %p7091_p9 }
  0x78   :  { %7101 = shalt.err (!%p7098_p13)
}
  0x79   :  { %96 = dma.hbm_to_vmem [thread:$0]  %s7440_s6, 32, %s94_s29, [#allocation12]  }
  0x7a   :  { %s7147_s24 = smov [#allocation14]   ;;  %s7102_s26 = scalar_lea.hbm %s7441_s7, 32 }
  0x7b   :  { %s103_s3 = sshll.u32 %s7147_s24, 4  ;;  %p7103_p0 = scmp.ne.s32.totalorder %s7441_s7, %s7102_s26  ;;  %s104_s3 = int_to_ptr.vmem [resolvable:$true] %s103_s3 }
  0x7c   :  { %p7106_p1 = scmp.lt.u32.totalorder %s7102_s26, %s7441_s7 }
  0x7e   :  { %p7108_p2 = pnand %p7106_p1, %p7103_p0 }
  0x80   :  { %7111 = shalt.err (!%p7108_p2)
}
  0x81   :  { %s7112_s13 = scalar_lea.vmem %s104_s3, 32  ;;  %p7117_p4 = scmp.lt.s32.totalorder %s104_s3, %s104_s3 }
  0x82   :  { %p7113_p3 = scmp.ne.s32.totalorder %s104_s3, %s7112_s13  ;;  %p7118_p5 = scmp.lt.s32.totalorder %s7112_s13, %s7112_s13 }
  0x84   :  { %p7119_p6 = por %p7118_p5, %p7117_p4 }
  0x86   :  { %p7120_p7 = pnand %p7119_p6, %p7113_p3 }
  0x88   :  { %7123 = shalt.err (!%p7120_p7)
}
  0x89   :  { %106 = dma.hbm_to_vmem [thread:$0]  %s7441_s7, 32, %s104_s3, [#allocation15]  }
  0x8a   :  { %7124 = dma.done.wait [#allocation4], 896  }
  0x8b   :  { %7125 = vsyncadd [#allocation4], 4294966400 }
  0x8c   :  { %7126 = dma.done.wait [#allocation6], 50304  }
  0x8d   :  { %7127 = vsyncadd [#allocation6], 4294916992 }
  0x8e   :  { %7128 = dma.done.wait [#allocation9], 32832  }
  0x8f   :  { %7129 = vsyncadd [#allocation9], 4294934464 }
  0x90   :  { %7130 = dma.done.wait [#allocation12], 8224  }
  0x91   :  { %7131 = vsyncadd [#allocation12], 4294959072 }
  0x92   :  { %7132 = dma.done.wait [#allocation15], 32  }
  0x93   :  { %7133 = vsyncadd [#allocation15], 4294967264  ;;  %v148_v1 = vld [vmem:[#allocation5] sm:$0xff]  ;;  %v135_v54 = vld [vmem:[#allocation3 + $0x8] sm:$0xff]  ;;  %vm2542_vm0 = vcmask 130048   ;;  %vm5632_vm1 = vcmask 7168  }
  0x94   :  { %v152_v2 = vld [vmem:[#allocation5 + $0x20] sm:$0xff]  ;;  %v7298_v58 = vpack.c.bf16 %v135_v54, %v135_v54 }
  0x95   :  { %v276_v3 = vld [vmem:[#allocation5 + $0x400] sm:$0xff]  ;;  %v5644_v4 = vcombine.high %v148_v1, %v152_v2  ;;  %v5643_v6 = vcombine.low %v148_v1, %v152_v2 }
  0x96   :  { %v280_v5 = vld [vmem:[#allocation5 + $0x420] sm:$0xff]  ;;  %2578 = vmatprep.mubr.bf16.mxu1 %v7298_v58 }
  0x97   :  { %v156_v7 = vld [vmem:[#allocation5 + $0x40] sm:$0xff]  ;;  %v5772_v9 = vcombine.high %v276_v3, %v280_v5  ;;  %v5771_v10 = vcombine.low %v276_v3, %v280_v5  ;;  %2546 = vmatprep.subr.bf16.mxu1 %v5644_v4 }
  0x98   :  { %v160_v8 = vld [vmem:[#allocation5 + $0x60] sm:$0xff]  ;;  %2547 = vmatpush1.bf16.msra.mxu1 %v5643_v6 }
  0x99   :  { %v5652_v11 = vcombine.high %v156_v7, %v160_v8  ;;  %v284_v12 = vld [vmem:[#allocation5 + $0x440] sm:$0xff]  ;;  %2587 = vmatprep.subr.bf16.mxu0 %v5772_v9  ;;  %v5651_v19 = vcombine.low %v156_v7, %v160_v8 }
  0x9a   :  { %v288_v13 = vld [vmem:[#allocation5 + $0x460] sm:$0xff]  ;;  %2588 = vmatpush1.bf16.msra.mxu0 %v5771_v10 }
  0x9b   :  { %v164_v14 = vld [vmem:[#allocation5 + $0x80] sm:$0xff]  ;;  %v5780_v15 = vcombine.high %v284_v12, %v288_v13  ;;  %2548 = vmatprep.subr.bf16.mxu1 %v5652_v11  ;;  %v5779_v20 = vcombine.low %v284_v12, %v288_v13 }
  0x9c   :  { %v168_v16 = vld [vmem:[#allocation5 + $0xa0] sm:$0xff]  ;;  %2549 = vmatpush1.bf16.msra.mxu1 %v5651_v19 }
  0x9d   :  { %v292_v17 = vld [vmem:[#allocation5 + $0x480] sm:$0xff]  ;;  %v5660_v21 = vcombine.high %v164_v14, %v168_v16  ;;  %2589 = vmatprep.subr.bf16.mxu0 %v5780_v15  ;;  %v5659_v27 = vcombine.low %v164_v14, %v168_v16 }
  0x9e   :  { %v296_v18 = vld [vmem:[#allocation5 + $0x4a0] sm:$0xff]  ;;  %2590 = vmatpush1.bf16.msra.mxu0 %v5779_v20 }
  0x9f   :  { %v5788_v22 = vcombine.high %v292_v17, %v296_v18  ;;  %v172_v23 = vld [vmem:[#allocation5 + $0xc0] sm:$0xff]  ;;  %2550 = vmatprep.subr.bf16.mxu1 %v5660_v21  ;;  %v5787_v28 = vcombine.low %v292_v17, %v296_v18 }
  0xa0   :  { %v176_v24 = vld [vmem:[#allocation5 + $0xe0] sm:$0xff]  ;;  %2551 = vmatpush1.bf16.msra.mxu1 %v5659_v27 }
  0xa1   :  { %v300_v25 = vld [vmem:[#allocation5 + $0x4c0] sm:$0xff]  ;;  %v5668_v29 = vcombine.high %v172_v23, %v176_v24  ;;  %2591 = vmatprep.subr.bf16.mxu0 %v5788_v22  ;;  %v5667_v35 = vcombine.low %v172_v23, %v176_v24 }
  0xa2   :  { %v304_v26 = vld [vmem:[#allocation5 + $0x4e0] sm:$0xff]  ;;  %2592 = vmatpush1.bf16.msra.mxu0 %v5787_v28 }
  0xa3   :  { %v5796_v30 = vcombine.high %v300_v25, %v304_v26  ;;  %v180_v31 = vld [vmem:[#allocation5 + $0x100] sm:$0xff]  ;;  %2552 = vmatprep.subr.bf16.mxu1 %v5668_v29  ;;  %v5795_v36 = vcombine.low %v300_v25, %v304_v26 }
  0xa4   :  { %v184_v32 = vld [vmem:[#allocation5 + $0x120] sm:$0xff]  ;;  %2553 = vmatpush1.bf16.msra.mxu1 %v5667_v35 }
  0xa5   :  { %v308_v33 = vld [vmem:[#allocation5 + $0x500] sm:$0xff]  ;;  %v5676_v37 = vcombine.high %v180_v31, %v184_v32  ;;  %2593 = vmatprep.subr.bf16.mxu0 %v5796_v30  ;;  %v5675_v43 = vcombine.low %v180_v31, %v184_v32 }
  0xa6   :  { %v312_v34 = vld [vmem:[#allocation5 + $0x520] sm:$0xff]  ;;  %2594 = vmatpush1.bf16.msra.mxu0 %v5795_v36 }
  0xa7   :  { %v5804_v38 = vcombine.high %v308_v33, %v312_v34  ;;  %v188_v39 = vld [vmem:[#allocation5 + $0x140] sm:$0xff]  ;;  %2554 = vmatprep.subr.bf16.mxu1 %v5676_v37  ;;  %v5803_v44 = vcombine.low %v308_v33, %v312_v34 }
  0xa8   :  { %v192_v40 = vld [vmem:[#allocation5 + $0x160] sm:$0xff]  ;;  %2555 = vmatpush1.bf16.msra.mxu1 %v5675_v43 }
  0xa9   :  { %v316_v41 = vld [vmem:[#allocation5 + $0x540] sm:$0xff]  ;;  %v5684_v45 = vcombine.high %v188_v39, %v192_v40  ;;  %2595 = vmatprep.subr.bf16.mxu0 %v5804_v38  ;;  %v5683_v51 = vcombine.low %v188_v39, %v192_v40 }
  0xaa   :  { %v320_v42 = vld [vmem:[#allocation5 + $0x560] sm:$0xff]  ;;  %2596 = vmatpush1.bf16.msra.mxu0 %v5803_v44 }
  0xab   :  { %v5812_v46 = vcombine.high %v316_v41, %v320_v42  ;;  %v196_v47 = vld [vmem:[#allocation5 + $0x180] sm:$0xff]  ;;  %2556 = vmatprep.subr.bf16.mxu1 %v5684_v45  ;;  %v5811_v52 = vcombine.low %v316_v41, %v320_v42 }
  0xac   :  { %v200_v48 = vld [vmem:[#allocation5 + $0x1a0] sm:$0xff]  ;;  %2557 = vmatpush1.bf16.msra.mxu1 %v5683_v51 }
  0xad   :  { %v324_v49 = vld [vmem:[#allocation5 + $0x580] sm:$0xff]  ;;  %v5692_v53 = vcombine.high %v196_v47, %v200_v48  ;;  %2597 = vmatprep.subr.bf16.mxu0 %v5812_v46  ;;  %v5691_v63 = vcombine.low %v196_v47, %v200_v48 }
  0xae   :  { %v328_v50 = vld [vmem:[#allocation5 + $0x5a0] sm:$0xff]  ;;  %2598 = vmatpush1.bf16.msra.mxu0 %v5811_v52 }
  0xaf   :  { %v5820_v55 = vcombine.high %v324_v49, %v328_v50  ;;  %v204_v56 = vld [vmem:[#allocation5 + $0x1c0] sm:$0xff]  ;;  %2558 = vmatprep.subr.bf16.mxu1 %v5692_v53  ;;  %v5819_v0 = vcombine.low %v324_v49, %v328_v50 }
  0xb0   :  { %v208_v57 = vld [vmem:[#allocation5 + $0x1e0] sm:$0xff]  ;;  %2559 = vmatpush1.bf16.msra.mxu1 %v5691_v63 }
  0xb1   :  { %v137_v59 = vld [vmem:[#allocation3 + $0x18] sm:$0xff]  ;;  %v5700_v1 = vcombine.high %v204_v56, %v208_v57  ;;  %2599 = vmatprep.subr.bf16.mxu0 %v5820_v55  ;;  %v5699_v7 = vcombine.low %v204_v56, %v208_v57 }
  0xb2   :  { %v332_v60 = vld [vmem:[#allocation5 + $0x5c0] sm:$0xff]  ;;  %v7300_v62 = vpack.c.bf16 %v137_v59, %v137_v59  ;;  %2600 = vmatpush1.bf16.msra.mxu0 %v5819_v0 }
  0xb3   :  { %v336_v61 = vld [vmem:[#allocation5 + $0x5e0] sm:$0xff]  ;;  %2560 = vmatprep.subr.bf16.mxu1 %v5700_v1 }
  0xb4   :  { %v5828_v2 = vcombine.high %v332_v60, %v336_v61  ;;  %v212_v3 = vld [vmem:[#allocation5 + $0x200] sm:$0xff]  ;;  %2619 = vmatprep.mubr.bf16.mxu0 %v7300_v62  ;;  %v5827_v8 = vcombine.low %v332_v60, %v336_v61  ;;  %2561 = vmatpush1.bf16.msra.mxu1 %v5699_v7 }
  0xb5   :  { %v216_v4 = vld [vmem:[#allocation5 + $0x220] sm:$0xff] }
  0xb6   :  { %v340_v5 = vld [vmem:[#allocation5 + $0x600] sm:$0xff]  ;;  %v5708_v9 = vcombine.high %v212_v3, %v216_v4  ;;  %2601 = vmatprep.subr.bf16.mxu0 %v5828_v2  ;;  %v5707_v15 = vcombine.low %v212_v3, %v216_v4 }
  0xb7   :  { %v344_v6 = vld [vmem:[#allocation5 + $0x620] sm:$0xff]  ;;  %2602 = vmatpush1.bf16.msra.mxu0 %v5827_v8 }
  0xb8   :  { %v5836_v10 = vcombine.high %v340_v5, %v344_v6  ;;  %v220_v11 = vld [vmem:[#allocation5 + $0x240] sm:$0xff]  ;;  %2562 = vmatprep.subr.bf16.mxu1 %v5708_v9  ;;  %v5835_v16 = vcombine.low %v340_v5, %v344_v6  ;;  %v149_v5 = vld [vmem:[#allocation5 + $0x8] sm:$0xff] }
  0xb9   :  { %v224_v12 = vld [vmem:[#allocation5 + $0x260] sm:$0xff]  ;;  %2563 = vmatpush1.bf16.msra.mxu1 %v5707_v15  ;;  %v153_v6 = vld [vmem:[#allocation5 + $0x28] sm:$0xff] }
  0xba   :  { %v348_v13 = vld [vmem:[#allocation5 + $0x640] sm:$0xff]  ;;  %v5716_v17 = vcombine.high %v220_v11, %v224_v12  ;;  %2603 = vmatprep.subr.bf16.mxu0 %v5836_v10  ;;  %v5715_v23 = vcombine.low %v220_v11, %v224_v12  ;;  %v134_v10 = vld [vmem:[#allocation3] sm:$0xff]  ;;  %v5646_v12 = vcombine.high %v149_v5, %v153_v6 }
  0xbb   :  { %v352_v14 = vld [vmem:[#allocation5 + $0x660] sm:$0xff]  ;;  %2604 = vmatpush1.bf16.msra.mxu0 %v5835_v16  ;;  %v157_v15 = vld [vmem:[#allocation5 + $0x48] sm:$0xff] }
  0xbc   :  { %v5844_v18 = vcombine.high %v348_v13, %v352_v14  ;;  %v228_v19 = vld [vmem:[#allocation5 + $0x280] sm:$0xff]  ;;  %2564 = vmatprep.subr.bf16.mxu1 %v5716_v17  ;;  %v5843_v24 = vcombine.low %v348_v13, %v352_v14  ;;  %v136_v13 = vld [vmem:[#allocation3 + $0x10] sm:$0xff]  ;;  %v161_v16 = vld [vmem:[#allocation5 + $0x68] sm:$0xff]  ;;  %v7304_v17 = vpack.c.bf16 %v134_v10, %v134_v10 }
  0xbd   :  { %v232_v20 = vld [vmem:[#allocation5 + $0x2a0] sm:$0xff]  ;;  %2565 = vmatpush1.bf16.msra.mxu1 %v5715_v23 }
  0xbe   :  { %v356_v21 = vld [vmem:[#allocation5 + $0x680] sm:$0xff]  ;;  %v5724_v25 = vcombine.high %v228_v19, %v232_v20  ;;  %2605 = vmatprep.subr.bf16.mxu0 %v5844_v18  ;;  %v5723_v31 = vcombine.low %v228_v19, %v232_v20  ;;  %v139_v20 = vld [vmem:[#allocation3 + $0x28] sm:$0xff] }
  0xbf   :  { %v360_v22 = vld [vmem:[#allocation5 + $0x6a0] sm:$0xff]  ;;  %2606 = vmatpush1.bf16.msra.mxu0 %v5843_v24  ;;  %v5654_v24 = vcombine.high %v157_v15, %v161_v16 }
  0xc0   :  { %v5852_v26 = vcombine.high %v356_v21, %v360_v22  ;;  %v236_v27 = vld [vmem:[#allocation5 + $0x2c0] sm:$0xff]  ;;  %2566 = vmatprep.subr.bf16.mxu1 %v5724_v25  ;;  %v5851_v32 = vcombine.low %v356_v21, %v360_v22  ;;  %v5645_v21 = vcombine.low %v149_v5, %v153_v6  ;;  %v7306_v22 = vpack.c.bf16 %v136_v13, %v136_v13 }
  0xc1   :  { %v240_v28 = vld [vmem:[#allocation5 + $0x2e0] sm:$0xff]  ;;  %2567 = vmatpush1.bf16.msra.mxu1 %v5723_v31  ;;  %v5653_v31 = vcombine.low %v157_v15, %v161_v16  ;;  %v213_v15 = vld [vmem:[#allocation5 + $0x208] sm:$0xff] }
  0xc2   :  { %v364_v29 = vld [vmem:[#allocation5 + $0x6c0] sm:$0xff]  ;;  %v5732_v33 = vcombine.high %v236_v27, %v240_v28  ;;  %2607 = vmatprep.subr.bf16.mxu0 %v5852_v26  ;;  %v5731_v39 = vcombine.low %v236_v27, %v240_v28  ;;  %v165_v28 = vld [vmem:[#allocation5 + $0x88] sm:$0xff] }
  0xc3   :  { %v368_v30 = vld [vmem:[#allocation5 + $0x6e0] sm:$0xff]  ;;  %2608 = vmatpush1.bf16.msra.mxu0 %v5851_v32  ;;  %v217_v16 = vld [vmem:[#allocation5 + $0x228] sm:$0xff] }
  0xc4   :  { %v5860_v34 = vcombine.high %v364_v29, %v368_v30  ;;  %v244_v35 = vld [vmem:[#allocation5 + $0x300] sm:$0xff]  ;;  %2568 = vmatprep.subr.bf16.mxu1 %v5732_v33  ;;  %v5859_v40 = vcombine.low %v364_v29, %v368_v30  ;;  %v169_v29 = vld [vmem:[#allocation5 + $0xa8] sm:$0xff]  ;;  %v7308_v30 = vpack.c.bf16 %v139_v20, %v139_v20  ;;  %v5710_v20 = vcombine.high %v213_v15, %v217_v16 }
  0xc5   :  { %v248_v36 = vld [vmem:[#allocation5 + $0x320] sm:$0xff]  ;;  %2569 = vmatpush1.bf16.msra.mxu1 %v5731_v39  ;;  %v5662_v33 = vcombine.high %v165_v28, %v169_v29  ;;  %v5661_v39 = vcombine.low %v165_v28, %v169_v29 }
  0xc6   :  { %v372_v37 = vld [vmem:[#allocation5 + $0x700] sm:$0xff]  ;;  %v5740_v41 = vcombine.high %v244_v35, %v248_v36  ;;  %2609 = vmatprep.subr.bf16.mxu0 %v5860_v34  ;;  %v5739_v47 = vcombine.low %v244_v35, %v248_v36 }
  0xc7   :  { %v376_v38 = vld [vmem:[#allocation5 + $0x720] sm:$0xff]  ;;  %2610 = vmatpush1.bf16.msra.mxu0 %v5859_v40 }
  0xc8   :  { %v5868_v42 = vcombine.high %v372_v37, %v376_v38  ;;  %v252_v43 = vld [vmem:[#allocation5 + $0x340] sm:$0xff]  ;;  %2570 = vmatprep.subr.bf16.mxu1 %v5740_v41  ;;  %v5867_v48 = vcombine.low %v372_v37, %v376_v38  ;;  %v173_v37 = vld [vmem:[#allocation5 + $0xc8] sm:$0xff] }
  0xc9   :  { %v256_v44 = vld [vmem:[#allocation5 + $0x360] sm:$0xff]  ;;  %2571 = vmatpush1.bf16.msra.mxu1 %v5739_v47  ;;  %v177_v38 = vld [vmem:[#allocation5 + $0xe8] sm:$0xff] }
  0xca   :  { %v380_v45 = vld [vmem:[#allocation5 + $0x740] sm:$0xff]  ;;  %v5748_v49 = vcombine.high %v252_v43, %v256_v44  ;;  %2611 = vmatprep.subr.bf16.mxu0 %v5868_v42  ;;  %v5747_v55 = vcombine.low %v252_v43, %v256_v44  ;;  %v5670_v41 = vcombine.high %v173_v37, %v177_v38  ;;  %v5669_v47 = vcombine.low %v173_v37, %v177_v38 }
  0xcb   :  { %v384_v46 = vld [vmem:[#allocation5 + $0x760] sm:$0xff]  ;;  %2612 = vmatpush1.bf16.msra.mxu0 %v5867_v48 }
  0xcc   :  { %v5876_v50 = vcombine.high %v380_v45, %v384_v46  ;;  %v260_v51 = vld [vmem:[#allocation5 + $0x380] sm:$0xff]  ;;  %2572 = vmatprep.subr.bf16.mxu1 %v5748_v49  ;;  %v5875_v56 = vcombine.low %v380_v45, %v384_v46  ;;  %v181_v45 = vld [vmem:[#allocation5 + $0x108] sm:$0xff] }
  0xcd   :  { %v264_v52 = vld [vmem:[#allocation5 + $0x3a0] sm:$0xff]  ;;  %2573 = vmatpush1.bf16.msra.mxu1 %v5747_v55  ;;  %v185_v46 = vld [vmem:[#allocation5 + $0x128] sm:$0xff] }
  0xce   :  { %v388_v53 = vld [vmem:[#allocation5 + $0x780] sm:$0xff]  ;;  %v5756_v57 = vcombine.high %v260_v51, %v264_v52  ;;  %2613 = vmatprep.subr.bf16.mxu0 %v5876_v50  ;;  %v5755_v1 = vcombine.low %v260_v51, %v264_v52  ;;  %v5678_v49 = vcombine.high %v181_v45, %v185_v46  ;;  %v5677_v55 = vcombine.low %v181_v45, %v185_v46 }
  0xcf   :  { %v392_v54 = vld [vmem:[#allocation5 + $0x7a0] sm:$0xff]  ;;  %2614 = vmatpush1.bf16.msra.mxu0 %v5875_v56 }
  0xd0   :  { %v5884_v59 = vcombine.high %v388_v53, %v392_v54  ;;  %v268_v60 = vld [vmem:[#allocation5 + $0x3c0] sm:$0xff]  ;;  %2574 = vmatprep.subr.bf16.mxu1 %v5756_v57  ;;  %v5883_v2 = vcombine.low %v388_v53, %v392_v54  ;;  %v189_v53 = vld [vmem:[#allocation5 + $0x148] sm:$0xff] }
  0xd1   :  { %v272_v61 = vld [vmem:[#allocation5 + $0x3e0] sm:$0xff]  ;;  %2575 = vmatpush1.bf16.msra.mxu1 %v5755_v1  ;;  %v193_v54 = vld [vmem:[#allocation5 + $0x168] sm:$0xff] }
  0xd2   :  { %v396_v63 = vld [vmem:[#allocation5 + $0x7c0] sm:$0xff]  ;;  %v5764_v3 = vcombine.high %v268_v60, %v272_v61  ;;  %2615 = vmatprep.subr.bf16.mxu0 %v5884_v59  ;;  %v5763_v9 = vcombine.low %v268_v60, %v272_v61  ;;  %v5686_v57 = vcombine.high %v189_v53, %v193_v54  ;;  %v5685_v1 = vcombine.low %v189_v53, %v193_v54 }
  0xd3   :  { %v400_v0 = vld [vmem:[#allocation5 + $0x7e0] sm:$0xff]  ;;  %2616 = vmatpush1.bf16.msra.mxu0 %v5883_v2 }
  0xd4   :  { %v5892_v4 = vcombine.high %v396_v63, %v400_v0  ;;  %v404_v7 = vld [vmem:[#allocation5 + $0x800] sm:$0xff]  ;;  %2576 = vmatprep.subr.bf16.mxu1 %v5764_v3  ;;  %v5891_v11 = vcombine.low %v396_v63, %v400_v0  ;;  %v197_v63 = vld [vmem:[#allocation5 + $0x188] sm:$0xff] }
  0xd5   :  { %v408_v8 = vld [vmem:[#allocation5 + $0x820] sm:$0xff]  ;;  %2577 = vmatpush1.bf16.msra.mxu1 %v5763_v9  ;;  %v201_v0 = vld [vmem:[#allocation5 + $0x1a8] sm:$0xff] }
  0xd6   :  { %2617 = vmatprep.subr.bf16.mxu0 %v5892_v4  ;;  %v5900_v14 = vcombine.high %v404_v7, %v408_v8  ;;  %v412_v18 = vld [vmem:[#allocation5 + $0x840] sm:$0xff]  ;;  %v5899_v23 = vcombine.low %v404_v7, %v408_v8  ;;  %2710 = vmatprep.subr.bf16.mxu1 %v5646_v12  ;;  %v5694_v3 = vcombine.high %v197_v63, %v201_v0  ;;  %v205_v7 = vld [vmem:[#allocation5 + $0x1c8] sm:$0xff] }
  0xd7   :  { %v416_v19 = vld [vmem:[#allocation5 + $0x860] sm:$0xff]  ;;  %2618 = vmatpush1.bf16.msra.mxu0 %v5891_v11  ;;  %v209_v8 = vld [vmem:[#allocation5 + $0x1e8] sm:$0xff]  ;;  %v5693_v9 = vcombine.low %v197_v63, %v201_v0 }
  0xd8   :  { %v420_v25 = vld [vmem:[#allocation5 + $0x880] sm:$0xff]  ;;  %2628 = vmatprep.subr.bf16.mxu0 %v5900_v14  ;;  %v5908_v27 = vcombine.high %v412_v18, %v416_v19  ;;  %2579 = vmatmul.mubr.bf16.vlgmr.msra.gmra.mrb[0].mxu1 %v7304_v17  ;;  %v5907_v32 = vcombine.low %v412_v18, %v416_v19  ;;  %v5702_v11 = vcombine.high %v205_v7, %v209_v8 }
  0xd9   :  { %v424_v26 = vld [vmem:[#allocation5 + $0x8a0] sm:$0xff]  ;;  %2711 = vmatpush1.bf16.msra.mxu1 %v5645_v21  ;;  %2742 = vmatprep.mubr.bf16.mxu1 %v7298_v58  ;;  %v5701_v18 = vcombine.low %v205_v7, %v209_v8 }
  0xda   :  { %2620 = vmatmul.mubr.bf16.vlgmr.msra.gmra.mrb[0].mxu0 %v7306_v22  ;;  %2712 = vmatprep.subr.bf16.mxu1 %v5654_v24  ;;  %v428_v34 = vld [vmem:[#allocation5 + $0x8c0] sm:$0xff]  ;;  %v5916_v36 = vcombine.high %v420_v25, %v424_v26  ;;  %v5915_v40 = vcombine.low %v420_v25, %v424_v26  ;;  %v221_v25 = vld [vmem:[#allocation5 + $0x248] sm:$0xff] }
  0xdb   :  { %2629 = vmatpush1.bf16.msra.mxu0 %v5899_v23  ;;  %v432_v35 = vld [vmem:[#allocation5 + $0x8e0] sm:$0xff]  ;;  %2660 = vmatprep.mubr.bf16.mxu0 %v7308_v30  ;;  %v225_v26 = vld [vmem:[#allocation5 + $0x268] sm:$0xff] }
  0xdc   :  { %2630 = vmatprep.subr.bf16.mxu0 %v5908_v27  ;;  %v436_v42 = vld [vmem:[#allocation5 + $0x900] sm:$0xff]  ;;  %v5924_v44 = vcombine.high %v428_v34, %v432_v35  ;;  %v5923_v48 = vcombine.low %v428_v34, %v432_v35  ;;  %v5709_v27 = vcombine.low %v213_v15, %v217_v16  ;;  %v5718_v29 = vcombine.high %v221_v25, %v225_v26  ;;  %v229_v34 = vld [vmem:[#allocation5 + $0x288] sm:$0xff] }
  0xdd   :  { %2713 = vmatpush1.bf16.msra.mxu1 %v5653_v31  ;;  %v440_v43 = vld [vmem:[#allocation5 + $0x920] sm:$0xff]  ;;  %v233_v35 = vld [vmem:[#allocation5 + $0x2a8] sm:$0xff] }
  0xde   :  { %2714 = vmatprep.subr.bf16.mxu1 %v5662_v33  ;;  %v444_v50 = vld [vmem:[#allocation5 + $0x940] sm:$0xff]  ;;  %v5932_v52 = vcombine.high %v436_v42, %v440_v43  ;;  %v5931_v56 = vcombine.low %v436_v42, %v440_v43  ;;  %v5726_v38 = vcombine.high %v229_v34, %v233_v35  ;;  %v237_v42 = vld [vmem:[#allocation5 + $0x2c8] sm:$0xff] }
  0xdf   :  { %2631 = vmatpush1.bf16.msra.mxu0 %v5907_v32  ;;  %v448_v51 = vld [vmem:[#allocation5 + $0x960] sm:$0xff]  ;;  %v241_v43 = vld [vmem:[#allocation5 + $0x2e8] sm:$0xff] }
  0xe0   :  { %2632 = vmatprep.subr.bf16.mxu0 %v5916_v36  ;;  %v452_v59 = vld [vmem:[#allocation5 + $0x980] sm:$0xff]  ;;  %v5940_v61 = vcombine.high %v444_v50, %v448_v51  ;;  %v5939_v2 = vcombine.low %v444_v50, %v448_v51  ;;  %v5717_v36 = vcombine.low %v221_v25, %v225_v26  ;;  %v5734_v46 = vcombine.high %v237_v42, %v241_v43  ;;  %v245_v50 = vld [vmem:[#allocation5 + $0x308] sm:$0xff] }
  0xe1   :  { %2715 = vmatpush1.bf16.msra.mxu1 %v5661_v39  ;;  %v456_v60 = vld [vmem:[#allocation5 + $0x9a0] sm:$0xff]  ;;  %v249_v51 = vld [vmem:[#allocation5 + $0x328] sm:$0xff] }
  0xe2   :  { %2716 = vmatprep.subr.bf16.mxu1 %v5670_v41  ;;  %v460_v4 = vld [vmem:[#allocation5 + $0x9c0] sm:$0xff]  ;;  %v5948_v6 = vcombine.high %v452_v59, %v456_v60  ;;  %v5947_v10 = vcombine.low %v452_v59, %v456_v60  ;;  %v5742_v54 = vcombine.high %v245_v50, %v249_v51  ;;  %v253_v59 = vld [vmem:[#allocation5 + $0x348] sm:$0xff] }
  0xe3   :  { %2633 = vmatpush1.bf16.msra.mxu0 %v5915_v40  ;;  %v464_v5 = vld [vmem:[#allocation5 + $0x9e0] sm:$0xff]  ;;  %v257_v60 = vld [vmem:[#allocation5 + $0x368] sm:$0xff] }
  0xe4   :  { %2634 = vmatprep.subr.bf16.mxu0 %v5924_v44  ;;  %v468_v12 = vld [vmem:[#allocation5 + $0xa00] sm:$0xff]  ;;  %v5956_v14 = vcombine.high %v460_v4, %v464_v5  ;;  %v5955_v19 = vcombine.low %v460_v4, %v464_v5  ;;  %v5725_v44 = vcombine.low %v229_v34, %v233_v35  ;;  %v5750_v0 = vcombine.high %v253_v59, %v257_v60  ;;  %v261_v4 = vld [vmem:[#allocation5 + $0x388] sm:$0xff] }
  0xe5   :  { %2717 = vmatpush1.bf16.msra.mxu1 %v5669_v47  ;;  %v472_v13 = vld [vmem:[#allocation5 + $0xa20] sm:$0xff]  ;;  %v265_v5 = vld [vmem:[#allocation5 + $0x3a8] sm:$0xff] }
  0xe6   :  { %2718 = vmatprep.subr.bf16.mxu1 %v5678_v49  ;;  %v476_v21 = vld [vmem:[#allocation5 + $0xa40] sm:$0xff]  ;;  %v5964_v24 = vcombine.high %v468_v12, %v472_v13  ;;  %v5963_v28 = vcombine.low %v468_v12, %v472_v13  ;;  %v5758_v8 = vcombine.high %v261_v4, %v265_v5  ;;  %v269_v12 = vld [vmem:[#allocation5 + $0x3c8] sm:$0xff] }
  0xe7   :  { %2635 = vmatpush1.bf16.msra.mxu0 %v5923_v48  ;;  %v480_v23 = vld [vmem:[#allocation5 + $0xa60] sm:$0xff]  ;;  %v273_v13 = vld [vmem:[#allocation5 + $0x3e8] sm:$0xff] }
  0xe8   :  { %2636 = vmatprep.subr.bf16.mxu0 %v5932_v52  ;;  %v484_v31 = vld [vmem:[#allocation5 + $0xa80] sm:$0xff]  ;;  %v5972_v33 = vcombine.high %v476_v21, %v480_v23  ;;  %v5971_v37 = vcombine.low %v476_v21, %v480_v23  ;;  %v5733_v52 = vcombine.low %v237_v42, %v241_v43  ;;  %v5766_v16 = vcombine.high %v269_v12, %v273_v13  ;;  %v301_v43 = vld [vmem:[#allocation5 + $0x4c8] sm:$0xff] }
  0xe9   :  { %2719 = vmatpush1.bf16.msra.mxu1 %v5677_v55  ;;  %v488_v32 = vld [vmem:[#allocation5 + $0xaa0] sm:$0xff]  ;;  %v5765_v25 = vcombine.low %v269_v12, %v273_v13  ;;  %v186_v12 = vld [vmem:[#allocation5 + $0x130] sm:$0xff] }
  0xea   :  { %2720 = vmatprep.subr.bf16.mxu1 %v5686_v57  ;;  %v492_v39 = vld [vmem:[#allocation5 + $0xac0] sm:$0xff]  ;;  %v5980_v41 = vcombine.high %v484_v31, %v488_v32  ;;  %v5979_v45 = vcombine.low %v484_v31, %v488_v32  ;;  %v150_v32 = vld [vmem:[#allocation5 + $0x10] sm:$0xff] }
  0xeb   :  { %2637 = vmatpush1.bf16.msra.mxu0 %v5931_v56  ;;  %v496_v40 = vld [vmem:[#allocation5 + $0xae0] sm:$0xff] }
  0xec   :  { %2638 = vmatprep.subr.bf16.mxu0 %v5940_v61  ;;  %v500_v47 = vld [vmem:[#allocation5 + $0xb00] sm:$0xff]  ;;  %v5988_v49 = vcombine.high %v492_v39, %v496_v40  ;;  %v5987_v53 = vcombine.low %v492_v39, %v496_v40  ;;  %v5741_v61 = vcombine.low %v245_v50, %v249_v51  ;;  %v297_v39 = vld [vmem:[#allocation5 + $0x4a8] sm:$0xff]  ;;  %v162_v50 = vld [vmem:[#allocation5 + $0x70] sm:$0xff] }
  0xed   :  { %2721 = vmatpush1.bf16.msra.mxu1 %v5685_v1  ;;  %v504_v48 = vld [vmem:[#allocation5 + $0xb20] sm:$0xff]  ;;  %v309_v51 = vld [vmem:[#allocation5 + $0x508] sm:$0xff] }
  0xee   :  { %2722 = vmatprep.subr.bf16.mxu1 %v5694_v3  ;;  %v508_v55 = vld [vmem:[#allocation5 + $0xb40] sm:$0xff]  ;;  %v5996_v57 = vcombine.high %v500_v47, %v504_v48  ;;  %v5995_v63 = vcombine.low %v500_v47, %v504_v48 }
  0xef   :  { %2639 = vmatpush1.bf16.msra.mxu0 %v5939_v2  ;;  %v512_v56 = vld [vmem:[#allocation5 + $0xb60] sm:$0xff] }
  0xf0   :  { %2640 = vmatprep.subr.bf16.mxu0 %v5948_v6  ;;  %v516_v1 = vld [vmem:[#allocation5 + $0xb80] sm:$0xff]  ;;  %v6004_v3 = vcombine.high %v508_v55, %v512_v56  ;;  %v5749_v6 = vcombine.low %v253_v59, %v257_v60  ;;  %v6003_v7 = vcombine.low %v508_v55, %v512_v56  ;;  %v170_v59 = vld [vmem:[#allocation5 + $0xb0] sm:$0xff]  ;;  %v317_v60 = vld [vmem:[#allocation5 + $0x548] sm:$0xff] }
  0xf1   :  { %2723 = vmatpush1.bf16.msra.mxu1 %v5693_v9  ;;  %v520_v2 = vld [vmem:[#allocation5 + $0xba0] sm:$0xff] }
  0xf2   :  { %2724 = vmatprep.subr.bf16.mxu1 %v5702_v11  ;;  %v524_v9 = vld [vmem:[#allocation5 + $0xbc0] sm:$0xff]  ;;  %v6012_v11 = vcombine.high %v516_v1, %v520_v2  ;;  %v6011_v15 = vcombine.low %v516_v1, %v520_v2 }
  0xf3   :  { %2641 = vmatpush1.bf16.msra.mxu0 %v5947_v10  ;;  %v528_v10 = vld [vmem:[#allocation5 + $0xbe0] sm:$0xff] }
  0xf4   :  { %2642 = vmatprep.subr.bf16.mxu0 %v5956_v14  ;;  %v5757_v14 = vcombine.low %v261_v4, %v265_v5  ;;  %v532_v21 = vld [vmem:[#allocation5 + $0xc00] sm:$0xff]  ;;  %v6019_v26 = vcombine.low %v524_v9, %v528_v10  ;;  %v178_v4 = vld [vmem:[#allocation5 + $0xf0] sm:$0xff]  ;;  %v325_v5 = vld [vmem:[#allocation5 + $0x588] sm:$0xff] }
  0xf5   :  { %2725 = vmatpush1.bf16.msra.mxu1 %v5701_v18  ;;  %v277_v18 = vld [vmem:[#allocation5 + $0x408] sm:$0xff]  ;;  %v536_v23 = vld [vmem:[#allocation5 + $0xc20] sm:$0xff] }
  0xf6   :  { %2726 = vmatprep.subr.bf16.mxu1 %v5710_v20  ;;  %v6020_v20 = vcombine.high %v524_v9, %v528_v10  ;;  %v6028_v31 = vcombine.high %v532_v21, %v536_v23 }
  0xf7   :  { %2643 = vmatpush1.bf16.msra.mxu0 %v5955_v19  ;;  %v281_v19 = vld [vmem:[#allocation5 + $0x428] sm:$0xff] }
  0xf8   :  { %2644 = vmatprep.subr.bf16.mxu0 %v5964_v24  ;;  %v138_v24 = vld [vmem:[#allocation3 + $0x20] sm:$0xff]  ;;  %v5773_v35 = vcombine.low %v277_v18, %v281_v19 }
  0xf9   :  { %2727 = vmatpush1.bf16.msra.mxu1 %v5709_v27  ;;  %v5774_v27 = vcombine.high %v277_v18, %v281_v19  ;;  %v7314_v34 = vpack.c.bf16 %v138_v24, %v138_v24 }
  0xfa   :  { %2728 = vmatprep.subr.bf16.mxu1 %v5718_v29  ;;  %v289_v29 = vld [vmem:[#allocation5 + $0x468] sm:$0xff] }
  0xfb   :  { %2645 = vmatpush1.bf16.msra.mxu0 %v5963_v28  ;;  %v285_v28 = vld [vmem:[#allocation5 + $0x448] sm:$0xff] }
  0xfc   :  { %2646 = vmatprep.subr.bf16.mxu0 %v5972_v33  ;;  %v154_v33 = vld [vmem:[#allocation5 + $0x30] sm:$0xff] }
  0xfd   :  { %2729 = vmatpush1.bf16.msra.mxu1 %v5717_v36  ;;  %v5782_v36 = vcombine.high %v285_v28, %v289_v29  ;;  %v5648_v40 = vcombine.high %v150_v32, %v154_v33  ;;  %v5647_v55 = vcombine.low %v150_v32, %v154_v33  ;;  %v349_v32 = vld [vmem:[#allocation5 + $0x648] sm:$0xff] }
  0xfe   :  { %2730 = vmatprep.subr.bf16.mxu1 %v5726_v38  ;;  %v293_v38 = vld [vmem:[#allocation5 + $0x488] sm:$0xff] }
  0xff   :  { %2647 = vmatpush1.bf16.msra.mxu0 %v5971_v37  ;;  %v6027_v37 = vcombine.low %v532_v21, %v536_v23  ;;  %v5790_v42 = vcombine.high %v293_v38, %v297_v39  ;;  %v5789_v47 = vcombine.low %v293_v38, %v297_v39  ;;  %v194_v21 = vld [vmem:[#allocation5 + $0x170] sm:$0xff]  ;;  %v341_v23 = vld [vmem:[#allocation5 + $0x608] sm:$0xff] }
 0x100   :  { %2648 = vmatprep.subr.bf16.mxu0 %v5980_v41  ;;  %v5781_v41 = vcombine.low %v285_v28, %v289_v29  ;;  %v198_v29 = vld [vmem:[#allocation5 + $0x190] sm:$0xff] }
 0x101   :  { %2731 = vmatpush1.bf16.msra.mxu1 %v5725_v44  ;;  %v305_v44 = vld [vmem:[#allocation5 + $0x4e8] sm:$0xff]  ;;  %v206_v39 = vld [vmem:[#allocation5 + $0x1d0] sm:$0xff] }
 0x102   :  { %2732 = vmatprep.subr.bf16.mxu1 %v5734_v46  ;;  %v140_v46 = vld [vmem:[#allocation3 + $0x30] sm:$0xff]  ;;  %v5798_v48 = vcombine.high %v301_v43, %v305_v44 }
 0x103   :  { %2649 = vmatpush1.bf16.msra.mxu0 %v5979_v45  ;;  %v7148_v45 = vmov 0  }
 0x104   :  { %2650 = vmatprep.subr.bf16.mxu0 %v5988_v49  ;;  %v158_v49 = vld [vmem:[#allocation5 + $0x50] sm:$0xff] }
 0x105   :  { %2733 = vmatpush1.bf16.msra.mxu1 %v5733_v52  ;;  %v313_v52 = vld [vmem:[#allocation5 + $0x528] sm:$0xff]  ;;  %v5655_v1 = vcombine.low %v158_v49, %v162_v50 }
 0x106   :  { %2734 = vmatprep.subr.bf16.mxu1 %v5742_v54  ;;  %v5797_v54 = vcombine.low %v301_v43, %v305_v44  ;;  %v5806_v56 = vcombine.high %v309_v51, %v313_v52  ;;  %v361_v43 = vld [vmem:[#allocation5 + $0x6a8] sm:$0xff] }
 0x107   :  { %2651 = vmatpush1.bf16.msra.mxu0 %v5987_v53  ;;  %v7320_v53 = vpack.c.bf16 %v140_v46, %v140_v46 }
 0x108   :  { %2652 = vmatprep.subr.bf16.mxu0 %v5996_v57  ;;  %v166_v57 = vld [vmem:[#allocation5 + $0x90] sm:$0xff] }
 0x109   :  { %2735 = vmatpush1.bf16.msra.mxu1 %v5741_v61  ;;  %v5656_v61 = vcombine.high %v158_v49, %v162_v50  ;;  %v5663_v9 = vcombine.low %v166_v57, %v170_v59  ;;  %v218_v49 = vld [vmem:[#allocation5 + $0x230] sm:$0xff]  ;;  %v365_v50 = vld [vmem:[#allocation5 + $0x6c8] sm:$0xff] }
 0x10a   :  { %2736 = vmatprep.subr.bf16.mxu1 %v5750_v0  ;;  %v5805_v0 = vcombine.low %v309_v51, %v313_v52  ;;  %v369_v52 = vld [vmem:[#allocation5 + $0x6e8] sm:$0xff] }
 0x10b   :  { %2653 = vmatpush1.bf16.msra.mxu0 %v5995_v63  ;;  %v321_v63 = vld [vmem:[#allocation5 + $0x568] sm:$0xff] }
 0x10c   :  { %2654 = vmatprep.subr.bf16.mxu0 %v6004_v3  ;;  %v5814_v2 = vcombine.high %v317_v60, %v321_v63  ;;  %v174_v3 = vld [vmem:[#allocation5 + $0xd0] sm:$0xff] }
 0x10d   :  { %2737 = vmatpush1.bf16.msra.mxu1 %v5749_v6  ;;  %v5664_v6 = vcombine.high %v166_v57, %v170_v59  ;;  %v5672_v13 = vcombine.high %v174_v3, %v178_v4  ;;  %v5671_v18 = vcombine.low %v174_v3, %v178_v4  ;;  %v222_v57 = vld [vmem:[#allocation5 + $0x250] sm:$0xff] }
 0x10e   :  { %2738 = vmatprep.subr.bf16.mxu1 %v5758_v8  ;;  %v5813_v8 = vcombine.low %v317_v60, %v321_v63  ;;  %v226_v59 = vld [vmem:[#allocation5 + $0x270] sm:$0xff]  ;;  %v373_v60 = vld [vmem:[#allocation5 + $0x708] sm:$0xff] }
 0x10f   :  { %2655 = vmatpush1.bf16.msra.mxu0 %v6003_v7  ;;  %v329_v7 = vld [vmem:[#allocation5 + $0x5a8] sm:$0xff]  ;;  %v230_v3 = vld [vmem:[#allocation5 + $0x290] sm:$0xff] }
 0x110   :  { %2656 = vmatprep.subr.bf16.mxu0 %v6012_v11  ;;  %v5822_v10 = vcombine.high %v325_v5, %v329_v7  ;;  %v182_v11 = vld [vmem:[#allocation5 + $0x110] sm:$0xff]  ;;  %v377_v63 = vld [vmem:[#allocation5 + $0x728] sm:$0xff] }
 0x111   :  { %2739 = vmatpush1.bf16.msra.mxu1 %v5757_v14  ;;  %v333_v14 = vld [vmem:[#allocation5 + $0x5c8] sm:$0xff]  ;;  %v5680_v24 = vcombine.high %v182_v11, %v186_v12  ;;  %v234_v4 = vld [vmem:[#allocation5 + $0x2b0] sm:$0xff] }
 0x112   :  { %2740 = vmatprep.subr.bf16.mxu1 %v5766_v16  ;;  %v5821_v16 = vcombine.low %v325_v5, %v329_v7  ;;  %v381_v5 = vld [vmem:[#allocation5 + $0x748] sm:$0xff] }
 0x113   :  { %2657 = vmatpush1.bf16.msra.mxu0 %v6011_v15  ;;  %v337_v15 = vld [vmem:[#allocation5 + $0x5e8] sm:$0xff] }
 0x114   :  { %2658 = vmatprep.subr.bf16.mxu0 %v6020_v20  ;;  %v5830_v19 = vcombine.high %v333_v14, %v337_v15  ;;  %v190_v20 = vld [vmem:[#allocation5 + $0x150] sm:$0xff]  ;;  %v385_v7 = vld [vmem:[#allocation5 + $0x768] sm:$0xff] }
 0x115   :  { %2741 = vmatpush1.bf16.msra.mxu1 %v5765_v25  ;;  %v345_v25 = vld [vmem:[#allocation5 + $0x628] sm:$0xff]  ;;  %v5688_v33 = vcombine.high %v190_v20, %v194_v21 }
 0x116   :  { %2751 = vmatprep.subr.bf16.mxu1 %v5774_v27  ;;  %v5679_v27 = vcombine.low %v182_v11, %v186_v12  ;;  %v5838_v28 = vcombine.high %v341_v23, %v345_v25  ;;  %v238_v11 = vld [vmem:[#allocation5 + $0x2d0] sm:$0xff] }
 0x117   :  { %2659 = vmatpush1.bf16.msra.mxu0 %v6019_v26  ;;  %v5829_v26 = vcombine.low %v333_v14, %v337_v15  ;;  %v242_v12 = vld [vmem:[#allocation5 + $0x2f0] sm:$0xff]  ;;  %v5728_v14 = vcombine.high %v230_v3, %v234_v4  ;;  %v393_v15 = vld [vmem:[#allocation5 + $0x7a8] sm:$0xff] }
 0x118   :  { %2669 = vmatprep.subr.bf16.mxu0 %v6028_v31  ;;  %2743 = vmatmul.mubr.bf16.vlgmr.msra.gmra.mrb[4].mxu1 %v7304_v17  ;;  %v202_v31 = vld [vmem:[#allocation5 + $0x1b0] sm:$0xff] }
 0x119   :  { %2752 = vmatpush1.bf16.msra.mxu1 %v5773_v35  ;;  %2783 = vmatprep.mubr.bf16.mxu1 %v7300_v62  ;;  %v353_v35 = vld [vmem:[#allocation5 + $0x668] sm:$0xff]  ;;  %v5695_v46 = vcombine.low %v198_v29, %v202_v31 }
 0x11a   :  { %2661 = vmatmul.mubr.bf16.vlgmr.msra.gmra.mrb[0].mxu0 %v7314_v34  ;;  %2753 = vmatprep.subr.bf16.mxu1 %v5782_v36  ;;  %v5837_v36 = vcombine.low %v341_v23, %v345_v25  ;;  %v5846_v38 = vcombine.high %v349_v32, %v353_v35  ;;  %v5845_v44 = vcombine.low %v349_v32, %v353_v35  ;;  %v397_v23 = vld [vmem:[#allocation5 + $0x7c8] sm:$0xff] }
 0x11b   :  { %2670 = vmatpush1.bf16.msra.mxu0 %v6027_v37  ;;  %2701 = vmatprep.mubr.bf16.mxu0 %v7148_v45  ;;  %v5687_v37 = vcombine.low %v190_v20, %v194_v21  ;;  %v246_v20 = vld [vmem:[#allocation5 + $0x310] sm:$0xff]  ;;  %v401_v25 = vld [vmem:[#allocation5 + $0x7e8] sm:$0xff] }
 0x11c   :  { %2874 = vmatprep.subr.bf16.mxu0 %v5648_v40  ;;  %v210_v40 = vld [vmem:[#allocation5 + $0x1f0] sm:$0xff]  ;;  %v405_v32 = vld [vmem:[#allocation5 + $0x808] sm:$0xff] }
 0x11d   :  { %2754 = vmatpush1.bf16.msra.mxu1 %v5781_v41  ;;  %v357_v41 = vld [vmem:[#allocation5 + $0x688] sm:$0xff]  ;;  %v5704_v51 = vcombine.high %v206_v39, %v210_v40  ;;  %v250_v21 = vld [vmem:[#allocation5 + $0x330] sm:$0xff] }
 0x11e   :  { %2755 = vmatprep.subr.bf16.mxu1 %v5790_v42  ;;  %v5696_v42 = vcombine.high %v198_v29, %v202_v31  ;;  %v254_v29 = vld [vmem:[#allocation5 + $0x350] sm:$0xff]  ;;  %v409_v35 = vld [vmem:[#allocation5 + $0x828] sm:$0xff] }
 0x11f   :  { %v258_v31 = vld [vmem:[#allocation5 + $0x370] sm:$0xff] }
 0x121   :  { %2756 = vmatpush1.bf16.msra.mxu1 %v5789_v47  ;;  %v5854_v47 = vcombine.high %v357_v41, %v361_v43 }
 0x122   :  { %2757 = vmatprep.subr.bf16.mxu1 %v5798_v48  ;;  %v214_v48 = vld [vmem:[#allocation5 + $0x210] sm:$0xff] }
 0x125   :  { %2758 = vmatpush1.bf16.msra.mxu1 %v5797_v54  ;;  %v5853_v54 = vcombine.low %v357_v41, %v361_v43  ;;  %v413_v41 = vld [vmem:[#allocation5 + $0x848] sm:$0xff] }
 0x126   :  { %6035 = vmatmul.mubr.msk.bf16.vlgmr.msra.gmra.mrb[0].mxu0 %vm2542_vm0, %v7320_v53  ;;  %2759 = vmatprep.subr.bf16.mxu1 %v5806_v56  ;;  %v5862_v56 = vcombine.high %v365_v50, %v369_v52  ;;  %v417_v43 = vld [vmem:[#allocation5 + $0x868] sm:$0xff] }
 0x127   :  { %2875 = vmatpush1.bf16.msra.mxu0 %v5647_v55  ;;  %2906 = vmatprep.mubr.bf16.mxu0 %v7298_v58  ;;  %v5703_v55 = vcombine.low %v206_v39, %v210_v40  ;;  %v262_v39 = vld [vmem:[#allocation5 + $0x390] sm:$0xff] }
 0x128   :  { %2876 = vmatprep.subr.bf16.mxu0 %v5656_v61  ;;  %v5712_v61 = vcombine.high %v214_v48, %v218_v49  ;;  %v266_v40 = vld [vmem:[#allocation5 + $0x3b0] sm:$0xff] }
 0x129   :  { %2760 = vmatpush1.bf16.msra.mxu1 %v5805_v0  ;;  %v5861_v0 = vcombine.low %v365_v50, %v369_v52  ;;  %v421_v50 = vld [vmem:[#allocation5 + $0x888] sm:$0xff] }
 0x12a   :  { %2761 = vmatprep.subr.bf16.mxu1 %v5814_v2  ;;  %v5870_v2 = vcombine.high %v373_v60, %v377_v63  ;;  %v425_v52 = vld [vmem:[#allocation5 + $0x8a8] sm:$0xff] }
 0x12b   :  { %2877 = vmatpush1.bf16.msra.mxu0 %v5655_v1  ;;  %v5711_v1 = vcombine.low %v214_v48, %v218_v49  ;;  %v270_v48 = vld [vmem:[#allocation5 + $0x3d0] sm:$0xff] }
 0x12c   :  { %2878 = vmatprep.subr.bf16.mxu0 %v5664_v6  ;;  %v5720_v6 = vcombine.high %v222_v57, %v226_v59  ;;  %v274_v49 = vld [vmem:[#allocation5 + $0x3f0] sm:$0xff] }
 0x12d   :  { %2762 = vmatpush1.bf16.msra.mxu1 %v5813_v8  ;;  %v5869_v8 = vcombine.low %v373_v60, %v377_v63  ;;  %v429_v60 = vld [vmem:[#allocation5 + $0x8c8] sm:$0xff] }
 0x12e   :  { %2763 = vmatprep.subr.bf16.mxu1 %v5822_v10  ;;  %v5878_v10 = vcombine.high %v381_v5, %v385_v7  ;;  %v433_v63 = vld [vmem:[#allocation5 + $0x8e8] sm:$0xff] }
 0x12f   :  { %2879 = vmatpush1.bf16.msra.mxu0 %v5663_v9  ;;  %v5719_v9 = vcombine.low %v222_v57, %v226_v59  ;;  %v278_v57 = vld [vmem:[#allocation5 + $0x410] sm:$0xff] }
 0x130   :  { %2880 = vmatprep.subr.bf16.mxu0 %v5672_v13  ;;  %v389_v13 = vld [vmem:[#allocation5 + $0x788] sm:$0xff]  ;;  %v282_v59 = vld [vmem:[#allocation5 + $0x430] sm:$0xff] }
 0x131   :  { %2764 = vmatpush1.bf16.msra.mxu1 %v5821_v16  ;;  %v5877_v16 = vcombine.low %v381_v5, %v385_v7  ;;  %v437_v5 = vld [vmem:[#allocation5 + $0x908] sm:$0xff] }
 0x132   :  { %2765 = vmatprep.subr.bf16.mxu1 %v5830_v19  ;;  %v5886_v19 = vcombine.high %v389_v13, %v393_v15  ;;  %v441_v7 = vld [vmem:[#allocation5 + $0x928] sm:$0xff] }
 0x133   :  { %2881 = vmatpush1.bf16.msra.mxu0 %v5671_v18  ;;  %v5727_v18 = vcombine.low %v230_v3, %v234_v4  ;;  %v286_v3 = vld [vmem:[#allocation5 + $0x450] sm:$0xff] }
 0x134   :  { %2882 = vmatprep.subr.bf16.mxu0 %v5680_v24  ;;  %v5736_v24 = vcombine.high %v238_v11, %v242_v12  ;;  %v290_v4 = vld [vmem:[#allocation5 + $0x470] sm:$0xff] }
 0x135   :  { %2766 = vmatpush1.bf16.msra.mxu1 %v5829_v26  ;;  %v5885_v26 = vcombine.low %v389_v13, %v393_v15  ;;  %v445_v13 = vld [vmem:[#allocation5 + $0x948] sm:$0xff]  ;;  %v5784_v15 = vcombine.high %v286_v3, %v290_v4 }
 0x136   :  { %2767 = vmatprep.subr.bf16.mxu1 %v5838_v28  ;;  %v5894_v28 = vcombine.high %v397_v23, %v401_v25 }
 0x137   :  { %2883 = vmatpush1.bf16.msra.mxu0 %v5679_v27  ;;  %v5735_v27 = vcombine.low %v238_v11, %v242_v12  ;;  %v294_v11 = vld [vmem:[#allocation5 + $0x490] sm:$0xff] }
 0x138   :  { %2884 = vmatprep.subr.bf16.mxu0 %v5688_v33  ;;  %v5744_v33 = vcombine.high %v246_v20, %v250_v21  ;;  %v298_v12 = vld [vmem:[#allocation5 + $0x4b0] sm:$0xff] }
 0x139   :  { %2768 = vmatpush1.bf16.msra.mxu1 %v5837_v36  ;;  %v5893_v36 = vcombine.low %v397_v23, %v401_v25  ;;  %v302_v23 = vld [vmem:[#allocation5 + $0x4d0] sm:$0xff]  ;;  %v5792_v25 = vcombine.high %v294_v11, %v298_v12 }
 0x13a   :  { %2769 = vmatprep.subr.bf16.mxu1 %v5846_v38  ;;  %v5902_v38 = vcombine.high %v405_v32, %v409_v35 }
 0x13b   :  { %2885 = vmatpush1.bf16.msra.mxu0 %v5687_v37  ;;  %v5743_v37 = vcombine.low %v246_v20, %v250_v21  ;;  %v5783_v20 = vcombine.low %v286_v3, %v290_v4  ;;  %v493_v4 = vld [vmem:[#allocation5 + $0xac8] sm:$0xff] }
 0x13c   :  { %2886 = vmatprep.subr.bf16.mxu0 %v5696_v42  ;;  %v5752_v42 = vcombine.high %v254_v29, %v258_v31 }
 0x13d   :  { %2770 = vmatpush1.bf16.msra.mxu1 %v5845_v44  ;;  %v5901_v44 = vcombine.low %v405_v32, %v409_v35  ;;  %v314_v32 = vld [vmem:[#allocation5 + $0x530] sm:$0xff] }
 0x13e   :  { %2771 = vmatprep.subr.bf16.mxu1 %v5854_v47  ;;  %v5910_v47 = vcombine.high %v413_v41, %v417_v43 }
 0x13f   :  { %2887 = vmatpush1.bf16.msra.mxu0 %v5695_v46  ;;  %v5751_v46 = vcombine.low %v254_v29, %v258_v31  ;;  %v310_v31 = vld [vmem:[#allocation5 + $0x510] sm:$0xff] }
 0x140   :  { %2888 = vmatprep.subr.bf16.mxu0 %v5704_v51  ;;  %v5760_v51 = vcombine.high %v262_v39, %v266_v40 }
 0x141   :  { %2772 = vmatpush1.bf16.msra.mxu1 %v5853_v54  ;;  %v5909_v54 = vcombine.low %v413_v41, %v417_v43  ;;  %v469_v41 = vld [vmem:[#allocation5 + $0xa08] sm:$0xff]  ;;  %v5808_v43 = vcombine.high %v310_v31, %v314_v32 }
 0x142   :  { %2773 = vmatprep.subr.bf16.mxu1 %v5862_v56  ;;  %v5918_v56 = vcombine.high %v421_v50, %v425_v52 }
 0x143   :  { %2889 = vmatpush1.bf16.msra.mxu0 %v5703_v55  ;;  %v5759_v55 = vcombine.low %v262_v39, %v266_v40  ;;  %v318_v39 = vld [vmem:[#allocation5 + $0x550] sm:$0xff] }
 0x144   :  { %2890 = vmatprep.subr.bf16.mxu0 %v5712_v61  ;;  %v5768_v61 = vcombine.high %v270_v48, %v274_v49  ;;  %v322_v40 = vld [vmem:[#allocation5 + $0x570] sm:$0xff] }
 0x145   :  { %2774 = vmatpush1.bf16.msra.mxu1 %v5861_v0  ;;  %v5917_v0 = vcombine.low %v421_v50, %v425_v52  ;;  %v481_v50 = vld [vmem:[#allocation5 + $0xa68] sm:$0xff]  ;;  %v330_v52 = vld [vmem:[#allocation5 + $0x5b0] sm:$0xff] }
 0x146   :  { %2775 = vmatprep.subr.bf16.mxu1 %v5870_v2  ;;  %v5926_v2 = vcombine.high %v429_v60, %v433_v63 }
 0x147   :  { %2891 = vmatpush1.bf16.msra.mxu0 %v5711_v1  ;;  %v5767_v1 = vcombine.low %v270_v48, %v274_v49  ;;  %v5816_v48 = vcombine.high %v318_v39, %v322_v40  ;;  %v477_v49 = vld [vmem:[#allocation5 + $0xa48] sm:$0xff] }
 0x148   :  { %2892 = vmatprep.subr.bf16.mxu0 %v5720_v6  ;;  %v5776_v6 = vcombine.high %v278_v57, %v282_v59 }
 0x149   :  { %2776 = vmatpush1.bf16.msra.mxu1 %v5869_v8  ;;  %v5925_v8 = vcombine.low %v429_v60, %v433_v63  ;;  %v489_v60 = vld [vmem:[#allocation5 + $0xaa8] sm:$0xff]  ;;  %v338_v63 = vld [vmem:[#allocation5 + $0x5f0] sm:$0xff] }
 0x14a   :  { %2777 = vmatprep.subr.bf16.mxu1 %v5878_v10  ;;  %v5934_v10 = vcombine.high %v437_v5, %v441_v7 }
 0x14b   :  { %2893 = vmatpush1.bf16.msra.mxu0 %v5719_v9  ;;  %v5775_v9 = vcombine.low %v278_v57, %v282_v59  ;;  %v485_v59 = vld [vmem:[#allocation5 + $0xa88] sm:$0xff] }
 0x14c   :  { %2894 = vmatprep.subr.bf16.mxu0 %v5728_v14  ;;  %v449_v14 = vld [vmem:[#allocation5 + $0x968] sm:$0xff] }
 0x14d   :  { %2778 = vmatpush1.bf16.msra.mxu1 %v5877_v16  ;;  %v5933_v16 = vcombine.low %v437_v5, %v441_v7  ;;  %v5942_v21 = vcombine.high %v445_v13, %v449_v14  ;;  %v497_v5 = vld [vmem:[#allocation5 + $0xae8] sm:$0xff]  ;;  %v346_v7 = vld [vmem:[#allocation5 + $0x630] sm:$0xff] }
 0x14e   :  { %2779 = vmatprep.subr.bf16.mxu1 %v5886_v19  ;;  %v457_v19 = vld [vmem:[#allocation5 + $0x9a8] sm:$0xff] }
 0x14f   :  { %2895 = vmatpush1.bf16.msra.mxu0 %v5727_v18  ;;  %v453_v18 = vld [vmem:[#allocation5 + $0x988] sm:$0xff] }
 0x150   :  { %2896 = vmatprep.subr.bf16.mxu0 %v5736_v24  ;;  %v306_v24 = vld [vmem:[#allocation5 + $0x4f0] sm:$0xff]  ;;  %v5950_v29 = vcombine.high %v453_v18, %v457_v19 }
 0x151   :  { %2780 = vmatpush1.bf16.msra.mxu1 %v5885_v26  ;;  %v5941_v26 = vcombine.low %v445_v13, %v449_v14  ;;  %v5800_v35 = vcombine.high %v302_v23, %v306_v24  ;;  %v505_v13 = vld [vmem:[#allocation5 + $0xb28] sm:$0xff]  ;;  %v350_v14 = vld [vmem:[#allocation5 + $0x650] sm:$0xff] }
 0x152   :  { %2781 = vmatprep.subr.bf16.mxu1 %v5894_v28  ;;  %v5791_v28 = vcombine.low %v294_v11, %v298_v12  ;;  %v501_v12 = vld [vmem:[#allocation5 + $0xb08] sm:$0xff] }
 0x153   :  { %2897 = vmatpush1.bf16.msra.mxu0 %v5735_v27  ;;  %v461_v27 = vld [vmem:[#allocation5 + $0x9c8] sm:$0xff] }
 0x154   :  { %2898 = vmatprep.subr.bf16.mxu0 %v5744_v33  ;;  %v465_v33 = vld [vmem:[#allocation5 + $0x9e8] sm:$0xff] }
 0x155   :  { %2782 = vmatpush1.bf16.msra.mxu1 %v5893_v36  ;;  %v5949_v36 = vcombine.low %v453_v18, %v457_v19  ;;  %v5998_v19 = vcombine.high %v501_v12, %v505_v13 }
 0x156   :  { %2792 = vmatprep.subr.bf16.mxu1 %v5902_v38  ;;  %v5958_v38 = vcombine.high %v461_v27, %v465_v33 }
 0x157   :  { %2899 = vmatpush1.bf16.msra.mxu0 %v5743_v37  ;;  %v5799_v37 = vcombine.low %v302_v23, %v306_v24  ;;  %v513_v23 = vld [vmem:[#allocation5 + $0xb68] sm:$0xff]  ;;  %v358_v24 = vld [vmem:[#allocation5 + $0x690] sm:$0xff] }
 0x158   :  { %2900 = vmatprep.subr.bf16.mxu0 %v5752_v42  ;;  %2784 = vmatmul.mubr.bf16.vlgmr.msra.gmra.mrb[4].mxu1 %v7306_v22  ;;  %v473_v42 = vld [vmem:[#allocation5 + $0xa28] sm:$0xff] }
 0x159   :  { %2793 = vmatpush1.bf16.msra.mxu1 %v5901_v44  ;;  %2824 = vmatprep.mubr.bf16.mxu1 %v7308_v30  ;;  %v5957_v44 = vcombine.low %v461_v27, %v465_v33  ;;  %v366_v33 = vld [vmem:[#allocation5 + $0x6d0] sm:$0xff] }
 0x15a   :  { %2794 = vmatprep.subr.bf16.mxu1 %v5910_v47  ;;  %v5966_v47 = vcombine.high %v469_v41, %v473_v42 }
 0x15b   :  { %2901 = vmatpush1.bf16.msra.mxu0 %v5751_v46  ;;  %v5807_v46 = vcombine.low %v310_v31, %v314_v32  ;;  %v517_v31 = vld [vmem:[#allocation5 + $0xb88] sm:$0xff] }
 0x15c   :  { %2902 = vmatprep.subr.bf16.mxu0 %v5760_v51  ;;  %v326_v51 = vld [vmem:[#allocation5 + $0x590] sm:$0xff]  ;;  %v521_v32 = vld [vmem:[#allocation5 + $0xba8] sm:$0xff] }
 0x15d   :  { %2795 = vmatpush1.bf16.msra.mxu1 %v5909_v54  ;;  %v5965_v54 = vcombine.low %v469_v41, %v473_v42  ;;  %v5824_v57 = vcombine.high %v326_v51, %v330_v52  ;;  %v529_v41 = vld [vmem:[#allocation5 + $0xbe8] sm:$0xff]  ;;  %v374_v42 = vld [vmem:[#allocation5 + $0x710] sm:$0xff] }
 0x15e   :  { %2796 = vmatprep.subr.bf16.mxu1 %v5918_v56  ;;  %v5974_v56 = vcombine.high %v477_v49, %v481_v50 }
 0x15f   :  { %2903 = vmatpush1.bf16.msra.mxu0 %v5759_v55  ;;  %v5815_v55 = vcombine.low %v318_v39, %v322_v40  ;;  %v525_v40 = vld [vmem:[#allocation5 + $0xbc8] sm:$0xff] }
 0x160   :  { %2904 = vmatprep.subr.bf16.mxu0 %v5768_v61  ;;  %v334_v61 = vld [vmem:[#allocation5 + $0x5d0] sm:$0xff] }
 0x161   :  { %2797 = vmatpush1.bf16.msra.mxu1 %v5917_v0  ;;  %v5973_v0 = vcombine.low %v477_v49, %v481_v50  ;;  %v5832_v3 = vcombine.high %v334_v61, %v338_v63  ;;  %v533_v49 = vld [vmem:[#allocation5 + $0xc08] sm:$0xff] }
 0x162   :  { %2798 = vmatprep.subr.bf16.mxu1 %v5926_v2  ;;  %v5982_v2 = vcombine.high %v485_v59, %v489_v60  ;;  %v537_v50 = vld [vmem:[#allocation5 + $0xc28] sm:$0xff] }
 0x163   :  { %2905 = vmatpush1.bf16.msra.mxu0 %v5767_v1  ;;  %v5823_v1 = vcombine.low %v326_v51, %v330_v52  ;;  %v382_v51 = vld [vmem:[#allocation5 + $0x750] sm:$0xff] }
 0x164   :  { %2915 = vmatprep.subr.bf16.mxu0 %v5776_v6  ;;  %v342_v6 = vld [vmem:[#allocation5 + $0x610] sm:$0xff] }
 0x165   :  { %2799 = vmatpush1.bf16.msra.mxu1 %v5925_v8  ;;  %v5981_v8 = vcombine.low %v485_v59, %v489_v60  ;;  %v5840_v11 = vcombine.high %v342_v6, %v346_v7  ;;  %v5839_v18 = vcombine.low %v342_v6, %v346_v7  ;;  %v386_v52 = vld [vmem:[#allocation5 + $0x770] sm:$0xff]  ;;  %v151_v59 = vld [vmem:[#allocation5 + $0x18] sm:$0xff] }
 0x166   :  { %2907 = vmatmul.mubr.bf16.vlgmr.msra.gmra.mrb[4].mxu0 %v7304_v17  ;;  %2800 = vmatprep.subr.bf16.mxu1 %v5934_v10  ;;  %v5990_v10 = vcombine.high %v493_v4, %v497_v5  ;;  %v155_v60 = vld [vmem:[#allocation5 + $0x38] sm:$0xff] }
 0x167   :  { %2916 = vmatpush1.bf16.msra.mxu0 %v5775_v9  ;;  %2947 = vmatprep.mubr.bf16.mxu0 %v7300_v62  ;;  %v5831_v9 = vcombine.low %v334_v61, %v338_v63  ;;  %v390_v61 = vld [vmem:[#allocation5 + $0x790] sm:$0xff] }
 0x168   :  { %2917 = vmatprep.subr.bf16.mxu0 %v5784_v15  ;;  %v354_v15 = vld [vmem:[#allocation5 + $0x670] sm:$0xff] }
 0x169   :  { %2801 = vmatpush1.bf16.msra.mxu1 %v5933_v16  ;;  %v5989_v16 = vcombine.low %v493_v4, %v497_v5  ;;  %v5847_v27 = vcombine.low %v350_v14, %v354_v15  ;;  %v394_v63 = vld [vmem:[#allocation5 + $0x7b0] sm:$0xff] }
 0x16a   :  { %2802 = vmatprep.subr.bf16.mxu1 %v5942_v21  ;;  %v509_v21 = vld [vmem:[#allocation5 + $0xb48] sm:$0xff]  ;;  %v398_v4 = vld [vmem:[#allocation5 + $0x7d0] sm:$0xff]  ;;  %v5887_v6 = vcombine.low %v390_v61, %v394_v63 }
 0x16b   :  { %2918 = vmatpush1.bf16.msra.mxu0 %v5783_v20  ;;  %v5848_v20 = vcombine.high %v350_v14, %v354_v15  ;;  %v402_v5 = vld [vmem:[#allocation5 + $0x7f0] sm:$0xff] }
 0x16c   :  { %2919 = vmatprep.subr.bf16.mxu0 %v5792_v25  ;;  %v362_v25 = vld [vmem:[#allocation5 + $0x6b0] sm:$0xff]  ;;  %v5896_v7 = vcombine.high %v398_v4, %v402_v5 }
 0x16d   :  { %2803 = vmatpush1.bf16.msra.mxu1 %v5941_v26  ;;  %v5997_v26 = vcombine.low %v501_v12, %v505_v13  ;;  %v159_v12 = vld [vmem:[#allocation5 + $0x58] sm:$0xff]  ;;  %v414_v14 = vld [vmem:[#allocation5 + $0x850] sm:$0xff] }
 0x16e   :  { %2804 = vmatprep.subr.bf16.mxu1 %v5950_v29  ;;  %v5856_v29 = vcombine.high %v358_v24, %v362_v25  ;;  %v163_v13 = vld [vmem:[#allocation5 + $0x78] sm:$0xff]  ;;  %v418_v15 = vld [vmem:[#allocation5 + $0x870] sm:$0xff] }
 0x16f   :  { %2920 = vmatpush1.bf16.msra.mxu0 %v5791_v28  ;;  %v6006_v28 = vcombine.high %v509_v21, %v513_v23 }
 0x170   :  { %2921 = vmatprep.subr.bf16.mxu0 %v5800_v35  ;;  %v370_v35 = vld [vmem:[#allocation5 + $0x6f0] sm:$0xff] }
 0x171   :  { %2805 = vmatpush1.bf16.msra.mxu1 %v5949_v36  ;;  %v6005_v36 = vcombine.low %v509_v21, %v513_v23  ;;  %v5864_v39 = vcombine.high %v366_v33, %v370_v35  ;;  %v167_v21 = vld [vmem:[#allocation5 + $0x98] sm:$0xff] }
 0x172   :  { %2806 = vmatprep.subr.bf16.mxu1 %v5958_v38  ;;  %v6014_v38 = vcombine.high %v517_v31, %v521_v32  ;;  %v171_v23 = vld [vmem:[#allocation5 + $0xb8] sm:$0xff] }
 0x173   :  { %2922 = vmatpush1.bf16.msra.mxu0 %v5799_v37  ;;  %v5855_v37 = vcombine.low %v358_v24, %v362_v25  ;;  %v422_v24 = vld [vmem:[#allocation5 + $0x890] sm:$0xff] }
 0x174   :  { %2923 = vmatprep.subr.bf16.mxu0 %v5808_v43  ;;  %v378_v43 = vld [vmem:[#allocation5 + $0x730] sm:$0xff] }
 0x175   :  { %2807 = vmatpush1.bf16.msra.mxu1 %v5957_v44  ;;  %v6013_v44 = vcombine.low %v517_v31, %v521_v32  ;;  %v426_v25 = vld [vmem:[#allocation5 + $0x8b0] sm:$0xff]  ;;  %v175_v31 = vld [vmem:[#allocation5 + $0xd8] sm:$0xff] }
 0x176   :  { %2808 = vmatprep.subr.bf16.mxu1 %v5966_v47  ;;  %v6022_v47 = vcombine.high %v525_v40, %v529_v41  ;;  %v179_v32 = vld [vmem:[#allocation5 + $0xf8] sm:$0xff] }
 0x177   :  { %2924 = vmatpush1.bf16.msra.mxu0 %v5807_v46  ;;  %v5863_v46 = vcombine.low %v366_v33, %v370_v35  ;;  %v430_v33 = vld [vmem:[#allocation5 + $0x8d0] sm:$0xff] }
 0x178   :  { %2925 = vmatprep.subr.bf16.mxu0 %v5816_v48  ;;  %v5872_v48 = vcombine.high %v374_v42, %v378_v43  ;;  %v434_v35 = vld [vmem:[#allocation5 + $0x8f0] sm:$0xff] }
 0x179   :  { %2809 = vmatpush1.bf16.msra.mxu1 %v5965_v54  ;;  %v6021_v54 = vcombine.low %v525_v40, %v529_v41  ;;  %v5928_v40 = vcombine.high %v430_v33, %v434_v35  ;;  %v183_v41 = vld [vmem:[#allocation5 + $0x118] sm:$0xff] }
 0x17a   :  { %2810 = vmatprep.subr.bf16.mxu1 %v5974_v56  ;;  %v6030_v56 = vcombine.high %v533_v49, %v537_v50 }
 0x17b   :  { %2926 = vmatpush1.bf16.msra.mxu0 %v5815_v55  ;;  %v5871_v55 = vcombine.low %v374_v42, %v378_v43  ;;  %v187_v42 = vld [vmem:[#allocation5 + $0x138] sm:$0xff] }
 0x17c   :  { %2927 = vmatprep.subr.bf16.mxu0 %v5824_v57  ;;  %v5880_v57 = vcombine.high %v382_v51, %v386_v52 }
 0x17d   :  { %2811 = vmatpush1.bf16.msra.mxu1 %v5973_v0  ;;  %v6029_v0 = vcombine.low %v533_v49, %v537_v50  ;;  %v5927_v49 = vcombine.low %v430_v33, %v434_v35  ;;  %v5682_v50 = vcombine.high %v183_v41, %v187_v42  ;;  %v231_v35 = vld [vmem:[#allocation5 + $0x298] sm:$0xff] }
 0x17e   :  { %2812 = vmatprep.subr.bf16.mxu1 %v5982_v2  ;;  %v5650_v2 = vcombine.high %v151_v59, %v155_v60 }
 0x17f   :  { %2928 = vmatpush1.bf16.msra.mxu0 %v5823_v1  ;;  %v5879_v1 = vcombine.low %v382_v51, %v386_v52  ;;  %v191_v52 = vld [vmem:[#allocation5 + $0x158] sm:$0xff] }
 0x180   :  { %2929 = vmatprep.subr.bf16.mxu0 %v5832_v3  ;;  %v5888_v3 = vcombine.high %v390_v61, %v394_v63  ;;  %v199_v63 = vld [vmem:[#allocation5 + $0x198] sm:$0xff] }
 0x181   :  { %2813 = vmatpush1.bf16.msra.mxu1 %v5981_v8  ;;  %v406_v8 = vld [vmem:[#allocation5 + $0x810] sm:$0xff] }
 0x182   :  { %2814 = vmatprep.subr.bf16.mxu1 %v5990_v10  ;;  %v5895_v10 = vcombine.low %v398_v4, %v402_v5 }
 0x183   :  { %2930 = vmatpush1.bf16.msra.mxu0 %v5831_v9  ;;  %v410_v9 = vld [vmem:[#allocation5 + $0x830] sm:$0xff] }
 0x184   :  { %2931 = vmatprep.subr.bf16.mxu0 %v5840_v11  ;;  %v5904_v11 = vcombine.high %v406_v8, %v410_v9 }
 0x185   :  { %2815 = vmatpush1.bf16.msra.mxu1 %v5989_v16  ;;  %v5649_v16 = vcombine.low %v151_v59, %v155_v60 }
 0x186   :  { %2816 = vmatprep.subr.bf16.mxu1 %v5998_v19  ;;  %v5658_v19 = vcombine.high %v159_v12, %v163_v13 }
 0x187   :  { %2932 = vmatpush1.bf16.msra.mxu0 %v5839_v18  ;;  %v5903_v18 = vcombine.low %v406_v8, %v410_v9  ;;  %v211_v8 = vld [vmem:[#allocation5 + $0x1f8] sm:$0xff]  ;;  %v462_v9 = vld [vmem:[#allocation5 + $0x9d0] sm:$0xff] }
 0x188   :  { %2933 = vmatprep.subr.bf16.mxu0 %v5848_v20  ;;  %v5912_v20 = vcombine.high %v414_v14, %v418_v15 }
 0x189   :  { %2817 = vmatpush1.bf16.msra.mxu1 %v5997_v26  ;;  %v5657_v26 = vcombine.low %v159_v12, %v163_v13 }
 0x18a   :  { %2818 = vmatprep.subr.bf16.mxu1 %v6006_v28  ;;  %v5666_v28 = vcombine.high %v167_v21, %v171_v23 }
 0x18b   :  { %2934 = vmatpush1.bf16.msra.mxu0 %v5847_v27  ;;  %v5911_v27 = vcombine.low %v414_v14, %v418_v15  ;;  %v215_v15 = vld [vmem:[#allocation5 + $0x218] sm:$0xff] }
 0x18c   :  { %2935 = vmatprep.subr.bf16.mxu0 %v5856_v29  ;;  %v5920_v29 = vcombine.high %v422_v24, %v426_v25 }
 0x18d   :  { %2819 = vmatpush1.bf16.msra.mxu1 %v6005_v36  ;;  %v5665_v36 = vcombine.low %v167_v21, %v171_v23 }
 0x18e   :  { %2820 = vmatprep.subr.bf16.mxu1 %v6014_v38  ;;  %v5674_v38 = vcombine.high %v175_v31, %v179_v32 }
 0x18f   :  { %2936 = vmatpush1.bf16.msra.mxu0 %v5855_v37  ;;  %v5919_v37 = vcombine.low %v422_v24, %v426_v25  ;;  %v223_v25 = vld [vmem:[#allocation5 + $0x258] sm:$0xff] }
 0x190   :  { %2937 = vmatprep.subr.bf16.mxu0 %v5864_v39 }
 0x191   :  { %2821 = vmatpush1.bf16.msra.mxu1 %v6013_v44  ;;  %v438_v44 = vld [vmem:[#allocation5 + $0x910] sm:$0xff] }
 0x192   :  { %2822 = vmatprep.subr.bf16.mxu1 %v6022_v47 }
 0x193   :  { %2938 = vmatpush1.bf16.msra.mxu0 %v5863_v46  ;;  %v442_v46 = vld [vmem:[#allocation5 + $0x930] sm:$0xff] }
 0x194   :  { %2939 = vmatprep.subr.bf16.mxu0 %v5872_v48  ;;  %v5673_v48 = vcombine.low %v175_v31, %v179_v32  ;;  %v5936_v51 = vcombine.high %v438_v44, %v442_v46  ;;  %v5935_v59 = vcombine.low %v438_v44, %v442_v46  ;;  %v239_v46 = vld [vmem:[#allocation5 + $0x2d8] sm:$0xff] }
 0x195   :  { %2823 = vmatpush1.bf16.msra.mxu1 %v6021_v54  ;;  %v195_v54 = vld [vmem:[#allocation5 + $0x178] sm:$0xff] }
 0x196   :  { %2833 = vmatprep.subr.bf16.mxu1 %v6030_v56  ;;  %v450_v56 = vld [vmem:[#allocation5 + $0x970] sm:$0xff]  ;;  %v5690_v60 = vcombine.high %v191_v52, %v195_v54 }
 0x197   :  { %2940 = vmatpush1.bf16.msra.mxu0 %v5871_v55  ;;  %v446_v55 = vld [vmem:[#allocation5 + $0x950] sm:$0xff] }
 0x198   :  { %2941 = vmatprep.subr.bf16.mxu0 %v5880_v57  ;;  %2825 = vmatmul.mubr.bf16.vlgmr.msra.gmra.mrb[4].mxu1 %v7314_v34  ;;  %v5681_v57 = vcombine.low %v183_v41, %v187_v42  ;;  %v5944_v61 = vcombine.high %v446_v55, %v450_v56  ;;  %v5943_v4 = vcombine.low %v446_v55, %v450_v56  ;;  %v251_v55 = vld [vmem:[#allocation5 + $0x338] sm:$0xff]  ;;  %v502_v56 = vld [vmem:[#allocation5 + $0xb10] sm:$0xff] }
 0x199   :  { %2834 = vmatpush1.bf16.msra.mxu1 %v6029_v0  ;;  %2865 = vmatprep.mubr.bf16.mxu1 %v7148_v45  ;;  %v203_v0 = vld [vmem:[#allocation5 + $0x1b8] sm:$0xff] }
 0x19a   :  { %3038 = vmatprep.subr.bf16.mxu1 %v5650_v2  ;;  %v458_v2 = vld [vmem:[#allocation5 + $0x9b0] sm:$0xff]  ;;  %v5698_v5 = vcombine.high %v199_v63, %v203_v0 }
 0x19b   :  { %2942 = vmatpush1.bf16.msra.mxu0 %v5879_v1  ;;  %v454_v1 = vld [vmem:[#allocation5 + $0x990] sm:$0xff] }
 0x19c   :  { %2943 = vmatprep.subr.bf16.mxu0 %v5888_v3  ;;  %v5689_v3 = vcombine.low %v191_v52, %v195_v54  ;;  %v5951_v12 = vcombine.low %v454_v1, %v458_v2  ;;  %v247_v54 = vld [vmem:[#allocation5 + $0x318] sm:$0xff] }
 0x19f   :  { %2944 = vmatpush1.bf16.msra.mxu0 %v5887_v6  ;;  %v5952_v6 = vcombine.high %v454_v1, %v458_v2  ;;  %v259_v1 = vld [vmem:[#allocation5 + $0x378] sm:$0xff]  ;;  %v510_v2 = vld [vmem:[#allocation5 + $0xb50] sm:$0xff] }
 0x1a0   :  { %2945 = vmatprep.subr.bf16.mxu0 %v5896_v7  ;;  %v207_v7 = vld [vmem:[#allocation5 + $0x1d8] sm:$0xff] }
 0x1a1   :  { %v5706_v13 = vcombine.high %v207_v7, %v211_v8 }
 0x1a3   :  { %2946 = vmatpush1.bf16.msra.mxu0 %v5895_v10  ;;  %v466_v10 = vld [vmem:[#allocation5 + $0x9f0] sm:$0xff] }
 0x1a4   :  { %2956 = vmatprep.subr.bf16.mxu0 %v5904_v11  ;;  %6036 = vmatmul.mubr.msk.bf16.vlgmr.msra.gmra.mrb[4].mxu1 %vm2542_vm0, %v7320_v53  ;;  %v5697_v11 = vcombine.low %v199_v63, %v203_v0  ;;  %v5960_v14 = vcombine.high %v462_v9, %v466_v10  ;;  %v5959_v21 = vcombine.low %v462_v9, %v466_v10  ;;  %v255_v0 = vld [vmem:[#allocation5 + $0x358] sm:$0xff]  ;;  %v518_v10 = vld [vmem:[#allocation5 + $0xb90] sm:$0xff] }
 0x1a5   :  { %3039 = vmatpush1.bf16.msra.mxu1 %v5649_v16  ;;  %3070 = vmatprep.mubr.bf16.mxu1 %v7298_v58  ;;  %v219_v16 = vld [vmem:[#allocation5 + $0x238] sm:$0xff] }
 0x1a6   :  { %2948 = vmatmul.mubr.bf16.vlgmr.msra.gmra.mrb[4].mxu0 %v7306_v22  ;;  %3040 = vmatprep.subr.bf16.mxu1 %v5658_v19  ;;  %v474_v19 = vld [vmem:[#allocation5 + $0xa30] sm:$0xff]  ;;  %v5714_v23 = vcombine.high %v215_v15, %v219_v16  ;;  %v267_v9 = vld [vmem:[#allocation5 + $0x3b8] sm:$0xff] }
 0x1a7   :  { %2957 = vmatpush1.bf16.msra.mxu0 %v5903_v18  ;;  %2988 = vmatprep.mubr.bf16.mxu0 %v7308_v30  ;;  %v470_v18 = vld [vmem:[#allocation5 + $0xa10] sm:$0xff] }
 0x1a8   :  { %2958 = vmatprep.subr.bf16.mxu0 %v5912_v20  ;;  %v5705_v20 = vcombine.low %v207_v7, %v211_v8  ;;  %v5968_v24 = vcombine.high %v470_v18, %v474_v19  ;;  %v5967_v31 = vcombine.low %v470_v18, %v474_v19  ;;  %v263_v8 = vld [vmem:[#allocation5 + $0x398] sm:$0xff]  ;;  %v526_v19 = vld [vmem:[#allocation5 + $0xbd0] sm:$0xff] }
 0x1a9   :  { %3041 = vmatpush1.bf16.msra.mxu1 %v5657_v26  ;;  %v227_v26 = vld [vmem:[#allocation5 + $0x278] sm:$0xff] }
 0x1aa   :  { %3042 = vmatprep.subr.bf16.mxu1 %v5666_v28  ;;  %v482_v28 = vld [vmem:[#allocation5 + $0xa70] sm:$0xff]  ;;  %v5722_v32 = vcombine.high %v223_v25, %v227_v26  ;;  %v275_v18 = vld [vmem:[#allocation5 + $0x3f8] sm:$0xff] }
 0x1ab   :  { %2959 = vmatpush1.bf16.msra.mxu0 %v5911_v27  ;;  %v7336_v39 = vpop.f32.mrb[0].mxu1  ;;  %v478_v27 = vld [vmem:[#allocation5 + $0xa50] sm:$0xff] }
 0x1ac   :  { %2960 = vmatprep.subr.bf16.mxu0 %v5920_v29  ;;  %v7338_v43 = vpop.f32.mrb[1].mxu1  ;;  %v5713_v29 = vcombine.low %v215_v15, %v219_v16  ;;  %v5976_v33 = vcombine.high %v478_v27, %v482_v28  ;;  %v5975_v41 = vcombine.low %v478_v27, %v482_v28  ;;  %v271_v16 = vld [vmem:[#allocation5 + $0x3d8] sm:$0xff]  ;;  %v534_v28 = vld [vmem:[#allocation5 + $0xc10] sm:$0xff] }
 0x1ad   :  { %3043 = vmatpush1.bf16.msra.mxu1 %v5665_v36  ;;  %v2584_v47 = vpop.f32.mrb[2].mxu1  ;;  %v235_v36 = vld [vmem:[#allocation5 + $0x2b8] sm:$0xff] }
 0x1ae   :  { %v2585_v58 = vpop.f32.mrb[3].mxu1  ;;  %3044 = vmatprep.subr.bf16.mxu1 %v5674_v38  ;;  %v490_v38 = vld [vmem:[#allocation5 + $0xab0] sm:$0xff]  ;;  %v5730_v42 = vcombine.high %v231_v35, %v235_v36  ;;  %v243_v47 = vld [vmem:[#allocation5 + $0x2f8] sm:$0xff] }
 0x1af   :  { %2961 = vmatpush1.bf16.msra.mxu0 %v5919_v37  ;;  %v486_v37 = vld [vmem:[#allocation5 + $0xa90] sm:$0xff]  ;;  %v283_v27 = vld [vmem:[#allocation5 + $0x438] sm:$0xff] }
 0x1b0   :  { %2962 = vmatprep.subr.bf16.mxu0 %v5928_v40  ;;  %v5721_v40 = vcombine.low %v223_v25, %v227_v26  ;;  %v5984_v44 = vcombine.high %v486_v37, %v490_v38  ;;  %v498_v58 = vld [vmem:[#allocation5 + $0xaf0] sm:$0xff]  ;;  %v279_v26 = vld [vmem:[#allocation5 + $0x418] sm:$0xff] }
 0x1b1   :  { %3045 = vmatpush1.bf16.msra.mxu1 %v5673_v48  ;;  %v494_v48 = vld [vmem:[#allocation5 + $0xad0] sm:$0xff] }
 0x1b2   :  { %3046 = vmatprep.subr.bf16.mxu1 %v5682_v50  ;;  %v5983_v50 = vcombine.low %v486_v37, %v490_v38  ;;  %v5992_v52 = vcombine.high %v494_v48, %v498_v58  ;;  %v5777_v38 = vcombine.low %v279_v26, %v283_v27 }
 0x1b3   :  { %2963 = vmatpush1.bf16.msra.mxu0 %v5927_v49  ;;  %v5729_v49 = vcombine.low %v231_v35, %v235_v36  ;;  %v287_v35 = vld [vmem:[#allocation5 + $0x458] sm:$0xff] }
 0x1b4   :  { %2964 = vmatprep.subr.bf16.mxu0 %v5936_v51  ;;  %v5738_v51 = vcombine.high %v239_v46, %v243_v47  ;;  %v291_v36 = vld [vmem:[#allocation5 + $0x478] sm:$0xff] }
 0x1b5   :  { %3047 = vmatpush1.bf16.msra.mxu1 %v5681_v57  ;;  %v506_v57 = vld [vmem:[#allocation5 + $0xb30] sm:$0xff] }
 0x1b6   :  { %3048 = vmatprep.subr.bf16.mxu1 %v5690_v60  ;;  %v5991_v60 = vcombine.low %v494_v48, %v498_v58  ;;  %v6000_v63 = vcombine.high %v502_v56, %v506_v57  ;;  %v542_v58 = vlaneseq }
 0x1b7   :  { %2965 = vmatpush1.bf16.msra.mxu0 %v5935_v59  ;;  %v5737_v59 = vcombine.low %v239_v46, %v243_v47  ;;  %v6465_v46 = vld [vmem:[#allocation8 + $0x4] ss:$16 sps:$4 sm:$0xff]   ;;  %v5785_v47 = vcombine.low %v287_v35, %v291_v36 }
 0x1b8   :  { %2966 = vmatprep.subr.bf16.mxu0 %v5944_v61  ;;  %v5746_v61 = vcombine.high %v247_v54, %v251_v55 }
 0x1b9   :  { %3049 = vmatpush1.bf16.msra.mxu1 %v5689_v3  ;;  %v514_v3 = vld [vmem:[#allocation5 + $0xb70] sm:$0xff] }
 0x1ba   :  { %3050 = vmatprep.subr.bf16.mxu1 %v5698_v5  ;;  %v5999_v5 = vcombine.low %v502_v56, %v506_v57  ;;  %v6008_v7 = vcombine.high %v510_v2, %v514_v3  ;;  %v6463_v57 = vld [vmem:[#allocation8] ss:$16 sps:$4 sm:$0xff]  }
 0x1bb   :  { %2967 = vmatpush1.bf16.msra.mxu0 %v5943_v4  ;;  %v5745_v4 = vcombine.low %v247_v54, %v251_v55  ;;  %v311_v54 = vld [vmem:[#allocation5 + $0x518] sm:$0xff] }
 0x1bc   :  { %2968 = vmatprep.subr.bf16.mxu0 %v5952_v6  ;;  %v5754_v6 = vcombine.high %v255_v0, %v259_v1  ;;  %v315_v55 = vld [vmem:[#allocation5 + $0x538] sm:$0xff] }
 0x1bd   :  { %3051 = vmatpush1.bf16.msra.mxu1 %v5697_v11  ;;  %v522_v11 = vld [vmem:[#allocation5 + $0xbb0] sm:$0xff] }
 0x1be   :  { %3052 = vmatprep.subr.bf16.mxu1 %v5706_v13  ;;  %v6007_v13 = vcombine.low %v510_v2, %v514_v3  ;;  %v6016_v15 = vcombine.high %v518_v10, %v522_v11  ;;  %v5809_v2 = vcombine.low %v311_v54, %v315_v55  ;;  %v6466_v3 = vld [vmem:[#allocation8 + $0x20] ss:$16 sps:$4 sm:$0xff]  }
 0x1bf   :  { %2969 = vmatpush1.bf16.msra.mxu0 %v5951_v12  ;;  %v5753_v12 = vcombine.low %v255_v0, %v259_v1  ;;  %v323_v0 = vld [vmem:[#allocation5 + $0x578] sm:$0xff] }
 0x1c0   :  { %2970 = vmatprep.subr.bf16.mxu0 %v5960_v14  ;;  %v5762_v14 = vcombine.high %v263_v8, %v267_v9 }
 0x1c1   :  { %3053 = vmatpush1.bf16.msra.mxu1 %v5705_v20  ;;  %v530_v20 = vld [vmem:[#allocation5 + $0xbf0] sm:$0xff] }
 0x1c2   :  { %3054 = vmatprep.subr.bf16.mxu1 %v5714_v23  ;;  %v6015_v23 = vcombine.low %v518_v10, %v522_v11  ;;  %v6024_v25 = vcombine.high %v526_v19, %v530_v20  ;;  %v6469_v11 = vld [vmem:[#allocation8 + $0x40] ss:$16 sps:$4 sm:$0xff]  }
 0x1c3   :  { %2971 = vmatpush1.bf16.msra.mxu0 %v5959_v21  ;;  %v5761_v21 = vcombine.low %v263_v8, %v267_v9  ;;  %v331_v8 = vld [vmem:[#allocation5 + $0x5b8] sm:$0xff] }
 0x1c4   :  { %2972 = vmatprep.subr.bf16.mxu0 %v5968_v24  ;;  %v5770_v24 = vcombine.high %v271_v16, %v275_v18 }
 0x1c5   :  { %3055 = vmatpush1.bf16.msra.mxu1 %v5713_v29  ;;  %v538_v29 = vld [vmem:[#allocation5 + $0xc30] sm:$0xff] }
 0x1c6   :  { %3056 = vmatprep.subr.bf16.mxu1 %v5722_v32  ;;  %v6023_v32 = vcombine.low %v526_v19, %v530_v20  ;;  %v6032_v37 = vcombine.high %v534_v28, %v538_v29 }
 0x1c7   :  { %2973 = vmatpush1.bf16.msra.mxu0 %v5967_v31  ;;  %v5769_v31 = vcombine.low %v271_v16, %v275_v18  ;;  %v339_v16 = vld [vmem:[#allocation5 + $0x5f8] sm:$0xff] }
 0x1c8   :  { %2974 = vmatprep.subr.bf16.mxu0 %v5976_v33  ;;  %v5778_v33 = vcombine.high %v279_v26, %v283_v27  ;;  %v6472_v26 = vld [vmem:[#allocation8 + $0x60] ss:$16 sps:$4 sm:$0xff]  }
 0x1c9   :  { %3057 = vmatpush1.bf16.msra.mxu1 %v5721_v40  ;;  %v5786_v40 = vcombine.high %v287_v35, %v291_v36  ;;  %v6475_v35 = vld [vmem:[#allocation8 + $0x80] ss:$16 sps:$4 sm:$0xff]  }
 0x1ca   :  { %3058 = vmatprep.subr.bf16.mxu1 %v5730_v42  ;;  %v295_v42 = vld [vmem:[#allocation5 + $0x498] sm:$0xff] }
 0x1cb   :  { %2975 = vmatpush1.bf16.msra.mxu0 %v5975_v41  ;;  %v6031_v41 = vcombine.low %v534_v28, %v538_v29  ;;  %v343_v29 = vld [vmem:[#allocation5 + $0x618] sm:$0xff] }
 0x1cc   :  { %2976 = vmatprep.subr.bf16.mxu0 %v5984_v44  ;;  %v299_v44 = vld [vmem:[#allocation5 + $0x4b8] sm:$0xff] }
 0x1cd   :  { %3059 = vmatpush1.bf16.msra.mxu1 %v5729_v49  ;;  %v5794_v48 = vcombine.high %v295_v42, %v299_v44  ;;  %v303_v49 = vld [vmem:[#allocation5 + $0x4d8] sm:$0xff] }
 0x1ce   :  { %3060 = vmatprep.subr.bf16.mxu1 %v5738_v51  ;;  %v5793_v51 = vcombine.low %v295_v42, %v299_v44  ;;  %v6478_v42 = vld [vmem:[#allocation8 + $0xa0] ss:$16 sps:$4 sm:$0xff]  }
 0x1cf   :  { %2977 = vmatpush1.bf16.msra.mxu0 %v5983_v50  ;;  %v307_v50 = vld [vmem:[#allocation5 + $0x4f8] sm:$0xff] }
 0x1d0   :  { %2978 = vmatprep.subr.bf16.mxu0 %v5992_v52  ;;  %v5802_v52 = vcombine.high %v303_v49, %v307_v50  ;;  %v5801_v56 = vcombine.low %v303_v49, %v307_v50  ;;  %v6481_v49 = vld [vmem:[#allocation8 + $0xc0] ss:$16 sps:$4 sm:$0xff]  }
 0x1d1   :  { %3061 = vmatpush1.bf16.msra.mxu1 %v5737_v59  ;;  %v5810_v59 = vcombine.high %v311_v54, %v315_v55  ;;  %v371_v54 = vld [vmem:[#allocation5 + $0x6f8] sm:$0xff] }
 0x1d2   :  { %3062 = vmatprep.subr.bf16.mxu1 %v5746_v61  ;;  %v6468_v61 = vld [vmem:[#allocation8 + $0x24] ss:$16 sps:$4 sm:$0xff]  }
 0x1d3   :  { %2979 = vmatpush1.bf16.msra.mxu0 %v5991_v60 }
 0x1d4   :  { %2980 = vmatprep.subr.bf16.mxu0 %v6000_v63  ;;  %v319_v63 = vld [vmem:[#allocation5 + $0x558] sm:$0xff] }
 0x1d5   :  { %3063 = vmatpush1.bf16.msra.mxu1 %v5745_v4  ;;  %v5818_v4 = vcombine.high %v319_v63, %v323_v0  ;;  %v5817_v10 = vcombine.low %v319_v63, %v323_v0  ;;  %v379_v63 = vld [vmem:[#allocation5 + $0x738] sm:$0xff] }
 0x1d6   :  { %3064 = vmatprep.subr.bf16.mxu1 %v5754_v6  ;;  %v6471_v6 = vld [vmem:[#allocation8 + $0x44] ss:$16 sps:$4 sm:$0xff]  }
 0x1d7   :  { %2981 = vmatpush1.bf16.msra.mxu0 %v5999_v5 }
 0x1d8   :  { %2982 = vmatprep.subr.bf16.mxu0 %v6008_v7  ;;  %v327_v7 = vld [vmem:[#allocation5 + $0x598] sm:$0xff] }
 0x1d9   :  { %3065 = vmatpush1.bf16.msra.mxu1 %v5753_v12  ;;  %v5826_v12 = vcombine.high %v327_v7, %v331_v8 }
 0x1da   :  { %3066 = vmatprep.subr.bf16.mxu1 %v5762_v14  ;;  %v6474_v14 = vld [vmem:[#allocation8 + $0x64] ss:$16 sps:$4 sm:$0xff]  }
 0x1db   :  { %2983 = vmatpush1.bf16.msra.mxu0 %v6007_v13 }
 0x1dc   :  { %2984 = vmatprep.subr.bf16.mxu0 %v6016_v15  ;;  %v335_v15 = vld [vmem:[#allocation5 + $0x5d8] sm:$0xff] }
 0x1dd   :  { %3067 = vmatpush1.bf16.msra.mxu1 %v5761_v21  ;;  %v5834_v27 = vcombine.high %v335_v15, %v339_v16 }
 0x1de   :  { %3068 = vmatprep.subr.bf16.mxu1 %v5770_v24 }
 0x1df   :  { %2985 = vmatpush1.bf16.msra.mxu0 %v6015_v23  ;;  %v5825_v23 = vcombine.low %v327_v7, %v331_v8  ;;  %v6490_v8 = vld [vmem:[#allocation8 + $0x120] ss:$16 sps:$4 sm:$0xff]  }
 0x1e0   :  { %2986 = vmatprep.subr.bf16.mxu0 %v6024_v25 }
 0x1e1   :  { %3069 = vmatpush1.bf16.msra.mxu1 %v5769_v31  ;;  %v347_v31 = vld [vmem:[#allocation5 + $0x638] sm:$0xff] }
 0x1e2   :  { %3079 = vmatprep.subr.bf16.mxu1 %v5778_v33  ;;  %v5842_v36 = vcombine.high %v343_v29, %v347_v31 }
 0x1e3   :  { %2987 = vmatpush1.bf16.msra.mxu0 %v6023_v32 }
 0x1e4   :  { %2997 = vmatprep.subr.bf16.mxu0 %v6032_v37  ;;  %3071 = vmatmul.mubr.bf16.vlgmr.msra.gmra.mrb[8].mxu1 %v7304_v17  ;;  %v7344_v17 = vshrl.u32 %v542_v58, 7  ;;  %v6480_v37 = vld [vmem:[#allocation8 + $0xa4] ss:$16 sps:$4 sm:$0xff]  }
 0x1e5   :  { %3080 = vmatpush1.bf16.msra.mxu1 %v5777_v38  ;;  %3111 = vmatprep.mubr.bf16.mxu1 %v7300_v62  ;;  %v7349_v62 = vld [vmem:[#allocation7] sm:$0xff]  ;;  %v351_v38 = vld [vmem:[#allocation5 + $0x658] sm:$0xff] }
 0x1e6   :  { %2989 = vmatmul.mubr.bf16.vlgmr.msra.gmra.mrb[4].mxu0 %v7314_v34  ;;  %3081 = vmatprep.subr.bf16.mxu1 %v5786_v40  ;;  %v7347_v60 = vsub.s32 0, %v7344_v17  ;;  %v7352_v1 = vsub.s32 1, %v7344_v17  ;;  %v355_v40 = vld [vmem:[#allocation5 + $0x678] sm:$0xff] }
 0x1e7   :  { %2998 = vmatpush1.bf16.msra.mxu0 %v6031_v41  ;;  %3029 = vmatprep.mubr.bf16.mxu0 %v7148_v45  ;;  %v5841_v41 = vcombine.low %v343_v29, %v347_v31  ;;  %v5850_v44 = vcombine.high %v351_v38, %v355_v40  ;;  %v5849_v58 = vcombine.low %v351_v38, %v355_v40  ;;  %v6504_v31 = vld [vmem:[#allocation8 + $0x1a4] ss:$16 sps:$4 sm:$0xff]  }
 0x1e8   :  { %4776 = vmatprep.subr.bf16.mxu0 %v6465_v46  ;;  %v545_v5 = vrot.slane %v7349_v62, %v7347_v60  ;;  %v549_v9 = vrot.slane %v7349_v62, %v7352_v1  ;;  %v6483_v46 = vld [vmem:[#allocation8 + $0xc4] ss:$16 sps:$4 sm:$0xff]  }
 0x1e9   :  { %3082 = vmatpush1.bf16.msra.mxu1 %v5785_v47  ;;  %v359_v47 = vld [vmem:[#allocation5 + $0x698] sm:$0xff] }
 0x1ea   :  { %3083 = vmatprep.subr.bf16.mxu1 %v5794_v48  ;;  %v2581_v13 = vadd.f32 %v7336_v39, %v545_v5  ;;  %v2583_v18 = vadd.f32 %v7338_v43, %v549_v9  ;;  %v6477_v39 = vld [vmem:[#allocation8 + $0x84] ss:$16 sps:$4 sm:$0xff]   ;;  %v5833_v43 = vcombine.low %v335_v15, %v339_v16 }
 0x1eb   :  { %v363_v48 = vld [vmem:[#allocation5 + $0x6b8] sm:$0xff] }
 0x1ec   :  { %v5858_v50 = vcombine.high %v359_v47, %v363_v48  ;;  %v5857_v55 = vcombine.low %v359_v47, %v363_v48  ;;  %v383_v5 = vld [vmem:[#allocation5 + $0x758] sm:$0xff] }
 0x1ed   :  { %3084 = vmatpush1.bf16.msra.mxu1 %v5793_v51  ;;  %v6486_v51 = vld [vmem:[#allocation8 + $0xe4] ss:$16 sps:$4 sm:$0xff]  }
 0x1ee   :  { %3085 = vmatprep.subr.bf16.mxu1 %v5802_v52  ;;  %v367_v52 = vld [vmem:[#allocation5 + $0x6d8] sm:$0xff] }
 0x1ef   :  { %v5865_v0 = vcombine.low %v367_v52, %v371_v54  ;;  %v6498_v16 = vld [vmem:[#allocation8 + $0x164] ss:$16 sps:$4 sm:$0xff]  }
 0x1f0   :  { %v6507_v38 = vld [vmem:[#allocation8 + $0x1c4] ss:$16 sps:$4 sm:$0xff]  }
 0x1f1   :  { %3086 = vmatpush1.bf16.msra.mxu1 %v5801_v56  ;;  %v6484_v56 = vld [vmem:[#allocation8 + $0xe0] ss:$16 sps:$4 sm:$0xff]   ;;  %v6510_v47 = vld [vmem:[#allocation8 + $0x1e4] ss:$16 sps:$4 sm:$0xff]  }
 0x1f2   :  { %6037 = vmatmul.mubr.msk.bf16.vlgmr.msra.gmra.mrb[4].mxu0 %vm2542_vm0, %v7320_v53  ;;  %3087 = vmatprep.subr.bf16.mxu1 %v5810_v59  ;;  %v6489_v59 = vld [vmem:[#allocation8 + $0x104] ss:$16 sps:$4 sm:$0xff]  }
 0x1f3   :  { %4777 = vmatpush1.bf16.msra.mxu0 %v6463_v57  ;;  %v5866_v57 = vcombine.high %v367_v52, %v371_v54  ;;  %v423_v40 = vld [vmem:[#allocation5 + $0x898] sm:$0xff] }
 0x1f4   :  { %4778 = vmatprep.subr.bf16.mxu0 %v6468_v61  ;;  %v375_v61 = vld [vmem:[#allocation5 + $0x718] sm:$0xff] }
 0x1f5   :  { %3088 = vmatpush1.bf16.msra.mxu1 %v5809_v2  ;;  %v6487_v2 = vld [vmem:[#allocation8 + $0x100] ss:$16 sps:$4 sm:$0xff]   ;;  %v5873_v7 = vcombine.low %v375_v61, %v379_v63 }
 0x1f6   :  { %3089 = vmatprep.subr.bf16.mxu1 %v5818_v4  ;;  %v6492_v4 = vld [vmem:[#allocation8 + $0x124] ss:$16 sps:$4 sm:$0xff]  }
 0x1f7   :  { %4779 = vmatpush1.bf16.msra.mxu0 %v6466_v3  ;;  %v5874_v3 = vcombine.high %v375_v61, %v379_v63  ;;  %v431_v48 = vld [vmem:[#allocation5 + $0x8d8] sm:$0xff] }
 0x1f8   :  { %4780 = vmatprep.subr.bf16.mxu0 %v6471_v6  ;;  %v387_v6 = vld [vmem:[#allocation5 + $0x778] sm:$0xff] }
 0x1f9   :  { %v2703_v19 = vpop.f32.mrb[0].mxu0  ;;  %3090 = vmatpush1.bf16.msra.mxu1 %v5817_v10  ;;  %v5882_v9 = vcombine.high %v383_v5, %v387_v6  ;;  %v6495_v10 = vld [vmem:[#allocation8 + $0x144] ss:$16 sps:$4 sm:$0xff]  }
 0x1fa   :  { %v7362_v20 = vadd.f32 %v2703_v19, %v2581_v13  ;;  %v2705_v21 = vpop.f32.mrb[1].mxu0  ;;  %3091 = vmatprep.subr.bf16.mxu1 %v5826_v12  ;;  %v395_v12 = vld [vmem:[#allocation5 + $0x7b8] sm:$0xff]  ;;  %v5881_v13 = vcombine.low %v383_v5, %v387_v6 }
 0x1fb   :  { %4781 = vmatpush1.bf16.msra.mxu0 %v6469_v11  ;;  %v6363_v24 = vadd.f32 %v2705_v21, %v2583_v18  ;;  %v2707_v25 = vpop.f32.mrb[2].mxu0  ;;  %v391_v11 = vld [vmem:[#allocation5 + $0x798] sm:$0xff] }
 0x1fc   :  { %v2708_v28 = vpop.f32.mrb[3].mxu0  ;;  %4782 = vmatprep.subr.bf16.mxu0 %v6474_v14  ;;  %v6493_v14 = vld [vmem:[#allocation8 + $0x140] ss:$16 sps:$4 sm:$0xff]   ;;  %v5890_v15 = vcombine.high %v391_v11, %v395_v12  ;;  %v5889_v21 = vcombine.low %v391_v11, %v395_v12  ;;  %v6501_v25 = vld [vmem:[#allocation8 + $0x184] ss:$16 sps:$4 sm:$0xff]  }
 0x1fd   :  { %v3203_v32 = vmax.f32 %v6363_v24, 0.0  ;;  %3092 = vmatpush1.bf16.msra.mxu1 %v5825_v23  ;;  %v399_v18 = vld [vmem:[#allocation5 + $0x7d8] sm:$0xff] }
 0x1fe   :  { %3093 = vmatprep.subr.bf16.mxu1 %v5834_v27  ;;  %v403_v19 = vld [vmem:[#allocation5 + $0x7f8] sm:$0xff] }
 0x1ff   :  { %v7364_v33 = vpack.c.bf16 %v3203_v32, %v3203_v32  ;;  %4783 = vmatpush1.bf16.msra.mxu0 %v6472_v26  ;;  %v6496_v23 = vld [vmem:[#allocation8 + $0x160] ss:$16 sps:$4 sm:$0xff]   ;;  %v5898_v24 = vcombine.high %v399_v18, %v403_v19  ;;  %v5897_v28 = vcombine.low %v399_v18, %v403_v19  ;;  %v6519_v6 = vld [vmem:[#allocation8 + $0x244] ss:$16 sps:$4 sm:$0xff]  }
 0x200   :  { %4784 = vmatprep.subr.bf16.mxu0 %v6477_v39  ;;  %v407_v26 = vld [vmem:[#allocation5 + $0x818] sm:$0xff] }
 0x201   :  { %4808 = vmatprep.mubr.bf16.mxu0 %v7364_v33  ;;  %3094 = vmatpush1.bf16.msra.mxu1 %v5833_v43  ;;  %v411_v27 = vld [vmem:[#allocation5 + $0x838] sm:$0xff] }
 0x202   :  { %3095 = vmatprep.subr.bf16.mxu1 %v5842_v36  ;;  %v6499_v39 = vld [vmem:[#allocation8 + $0x180] ss:$16 sps:$4 sm:$0xff]   ;;  %v5906_v29 = vcombine.high %v407_v26, %v411_v27  ;;  %v6522_v12 = vld [vmem:[#allocation8 + $0x264] ss:$16 sps:$4 sm:$0xff]  }
 0x203   :  { %4785 = vmatpush1.bf16.msra.mxu0 %v6475_v35  ;;  %v415_v32 = vld [vmem:[#allocation5 + $0x858] sm:$0xff]  ;;  %v5905_v35 = vcombine.low %v407_v26, %v411_v27 }
 0x204   :  { %4786 = vmatprep.subr.bf16.mxu0 %v6480_v37  ;;  %v419_v43 = vld [vmem:[#allocation5 + $0x878] sm:$0xff] }
 0x205   :  { %3096 = vmatpush1.bf16.msra.mxu1 %v5841_v41  ;;  %v6502_v36 = vld [vmem:[#allocation8 + $0x1a0] ss:$16 sps:$4 sm:$0xff]   ;;  %v5914_v37 = vcombine.high %v415_v32, %v419_v43  ;;  %v6525_v19 = vld [vmem:[#allocation8 + $0x284] ss:$16 sps:$4 sm:$0xff]  }
 0x206   :  { %3097 = vmatprep.subr.bf16.mxu1 %v5850_v44  ;;  %v427_v41 = vld [vmem:[#allocation5 + $0x8b8] sm:$0xff] }
 0x207   :  { %4787 = vmatpush1.bf16.msra.mxu0 %v6478_v42  ;;  %v5913_v42 = vcombine.low %v415_v32, %v419_v43  ;;  %v6505_v44 = vld [vmem:[#allocation8 + $0x1c0] ss:$16 sps:$4 sm:$0xff]   ;;  %v6528_v27 = vld [vmem:[#allocation8 + $0x2a4] ss:$16 sps:$4 sm:$0xff]  }
 0x208   :  { %4788 = vmatprep.subr.bf16.mxu0 %v6483_v46  ;;  %v5922_v46 = vcombine.high %v423_v40, %v427_v41  ;;  %v439_v52 = vld [vmem:[#allocation5 + $0x918] sm:$0xff] }
 0x209   :  { %3098 = vmatpush1.bf16.msra.mxu1 %v5849_v58  ;;  %v435_v58 = vld [vmem:[#allocation5 + $0x8f8] sm:$0xff] }
 0x20a   :  { %3099 = vmatprep.subr.bf16.mxu1 %v5858_v50  ;;  %v6508_v50 = vld [vmem:[#allocation8 + $0x1e0] ss:$16 sps:$4 sm:$0xff]   ;;  %v6531_v43 = vld [vmem:[#allocation8 + $0x2c4] ss:$16 sps:$4 sm:$0xff]  }
 0x20b   :  { %4789 = vmatpush1.bf16.msra.mxu0 %v6481_v49  ;;  %v5921_v49 = vcombine.low %v423_v40, %v427_v41  ;;  %v443_v54 = vld [vmem:[#allocation5 + $0x938] sm:$0xff] }
 0x20c   :  { %4790 = vmatprep.subr.bf16.mxu0 %v6486_v51  ;;  %v5930_v51 = vcombine.high %v431_v48, %v435_v58  ;;  %v447_v61 = vld [vmem:[#allocation5 + $0x958] sm:$0xff] }
 0x20d   :  { %3100 = vmatpush1.bf16.msra.mxu1 %v5857_v55  ;;  %v5929_v55 = vcombine.low %v431_v48, %v435_v58  ;;  %v451_v63 = vld [vmem:[#allocation5 + $0x978] sm:$0xff] }
 0x20e   :  { %3101 = vmatprep.subr.bf16.mxu1 %v5866_v57  ;;  %v6511_v57 = vld [vmem:[#allocation8 + $0x200] ss:$16 sps:$4 sm:$0xff]   ;;  %v6534_v41 = vld [vmem:[#allocation8 + $0x2e4] ss:$16 sps:$4 sm:$0xff]  }
 0x20f   :  { %4791 = vmatpush1.bf16.msra.mxu0 %v6484_v56  ;;  %v5938_v56 = vcombine.high %v439_v52, %v443_v54  ;;  %v459_v5 = vld [vmem:[#allocation5 + $0x9b8] sm:$0xff] }
 0x210   :  { %4792 = vmatprep.subr.bf16.mxu0 %v6489_v59  ;;  %v467_v11 = vld [vmem:[#allocation5 + $0x9f8] sm:$0xff] }
 0x211   :  { %3102 = vmatpush1.bf16.msra.mxu1 %v5865_v0  ;;  %v6516_v0 = vld [vmem:[#allocation8 + $0x224] ss:$16 sps:$4 sm:$0xff]  }
 0x212   :  { %3103 = vmatprep.subr.bf16.mxu1 %v5874_v3  ;;  %v6514_v3 = vld [vmem:[#allocation8 + $0x220] ss:$16 sps:$4 sm:$0xff]   ;;  %v6537_v58 = vld [vmem:[#allocation8 + $0x304] ss:$16 sps:$4 sm:$0xff]  }
 0x213   :  { %4793 = vmatpush1.bf16.msra.mxu0 %v6487_v2  ;;  %v5946_v2 = vcombine.high %v447_v61, %v451_v63  ;;  %v475_v18 = vld [vmem:[#allocation5 + $0xa38] sm:$0xff] }
 0x214   :  { %4794 = vmatprep.subr.bf16.mxu0 %v6492_v4  ;;  %v455_v4 = vld [vmem:[#allocation5 + $0x998] sm:$0xff] }
 0x215   :  { %3104 = vmatpush1.bf16.msra.mxu1 %v5873_v7  ;;  %v5945_v7 = vcombine.low %v447_v61, %v451_v63  ;;  %v483_v26 = vld [vmem:[#allocation5 + $0xa78] sm:$0xff] }
 0x216   :  { %3105 = vmatprep.subr.bf16.mxu1 %v5882_v9  ;;  %v6517_v9 = vld [vmem:[#allocation8 + $0x240] ss:$16 sps:$4 sm:$0xff]   ;;  %v6543_v63 = vld [vmem:[#allocation8 + $0x344] ss:$16 sps:$4 sm:$0xff]  }
 0x217   :  { %4795 = vmatpush1.bf16.msra.mxu0 %v6490_v8  ;;  %v5954_v8 = vcombine.high %v455_v4, %v459_v5  ;;  %v491_v32 = vld [vmem:[#allocation5 + $0xab8] sm:$0xff] }
 0x218   :  { %4796 = vmatprep.subr.bf16.mxu0 %v6495_v10  ;;  %v463_v10 = vld [vmem:[#allocation5 + $0x9d8] sm:$0xff] }
 0x219   :  { %3106 = vmatpush1.bf16.msra.mxu1 %v5881_v13  ;;  %v5953_v13 = vcombine.low %v455_v4, %v459_v5  ;;  %v499_v40 = vld [vmem:[#allocation5 + $0xaf8] sm:$0xff] }
 0x21a   :  { %3107 = vmatprep.subr.bf16.mxu1 %v5890_v15  ;;  %v6520_v15 = vld [vmem:[#allocation8 + $0x260] ss:$16 sps:$4 sm:$0xff]   ;;  %v6546_v5 = vld [vmem:[#allocation8 + $0x364] ss:$16 sps:$4 sm:$0xff]  }
 0x21b   :  { %4797 = vmatpush1.bf16.msra.mxu0 %v6493_v14  ;;  %v5962_v14 = vcombine.high %v463_v10, %v467_v11  ;;  %v507_v48 = vld [vmem:[#allocation5 + $0xb38] sm:$0xff] }
 0x21c   :  { %4798 = vmatprep.subr.bf16.mxu0 %v6498_v16  ;;  %v471_v16 = vld [vmem:[#allocation5 + $0xa18] sm:$0xff] }
 0x21d   :  { %3108 = vmatpush1.bf16.msra.mxu1 %v5889_v21  ;;  %v5961_v21 = vcombine.low %v463_v10, %v467_v11  ;;  %v523_v61 = vld [vmem:[#allocation5 + $0xbb8] sm:$0xff] }
 0x21e   :  { %3109 = vmatprep.subr.bf16.mxu1 %v5898_v24  ;;  %v6523_v24 = vld [vmem:[#allocation8 + $0x280] ss:$16 sps:$4 sm:$0xff]   ;;  %v6552_v11 = vld [vmem:[#allocation8 + $0x384] ss:$16 sps:$4 sm:$0xff]  }
 0x21f   :  { %4799 = vmatpush1.bf16.msra.mxu0 %v6496_v23  ;;  %v5970_v23 = vcombine.high %v471_v16, %v475_v18  ;;  %v531_v4 = vld [vmem:[#allocation5 + $0xbf8] sm:$0xff] }
 0x220   :  { %4800 = vmatprep.subr.bf16.mxu0 %v6501_v25  ;;  %v479_v25 = vld [vmem:[#allocation5 + $0xa58] sm:$0xff] }
 0x221   :  { %3110 = vmatpush1.bf16.msra.mxu1 %v5897_v28  ;;  %v5969_v28 = vcombine.low %v471_v16, %v475_v18  ;;  %v539_v10 = vld [vmem:[#allocation5 + $0xc38] sm:$0xff]  ;;  %v6549_v18 = vld [vmem:[#allocation8 + $0xc] ss:$16 sps:$4 sm:$0xff]  }
 0x222   :  { %3120 = vmatprep.subr.bf16.mxu1 %v5906_v29  ;;  %v6526_v29 = vld [vmem:[#allocation8 + $0x2a0] ss:$16 sps:$4 sm:$0xff]  }
 0x223   :  { %4801 = vmatpush1.bf16.msra.mxu0 %v6499_v39  ;;  %v5978_v39 = vcombine.high %v479_v25, %v483_v26 }
 0x224   :  { %4802 = vmatprep.subr.bf16.mxu0 %v6504_v31  ;;  %3112 = vmatmul.mubr.bf16.vlgmr.msra.gmra.mrb[8].mxu1 %v7306_v22  ;;  %v3202_v22 = vmax.f32 %v7362_v20, 0.0  ;;  %v5937_v20 = vcombine.low %v439_v52, %v443_v54  ;;  %v487_v31 = vld [vmem:[#allocation5 + $0xa98] sm:$0xff] }
 0x225   :  { %3121 = vmatpush1.bf16.msra.mxu1 %v5905_v35  ;;  %3152 = vmatprep.mubr.bf16.mxu1 %v7308_v30  ;;  %v6513_v30 = vld [vmem:[#allocation8 + $0x204] ss:$16 sps:$4 sm:$0xff]   ;;  %v5977_v35 = vcombine.low %v479_v25, %v483_v26  ;;  %v6568_v25 = vld [vmem:[#allocation8 + $0x3e0] ss:$16 sps:$4 sm:$0xff]  }
 0x226   :  { %3122 = vmatprep.subr.bf16.mxu1 %v5914_v37  ;;  %v7370_v59 = vpack.c.bf16 %v3202_v22, %v3202_v22  ;;  %v6529_v37 = vld [vmem:[#allocation8 + $0x2c0] ss:$16 sps:$4 sm:$0xff]   ;;  %v6540_v54 = vld [vmem:[#allocation8 + $0x324] ss:$16 sps:$4 sm:$0xff]  }
 0x227   :  { %4803 = vmatpush1.bf16.msra.mxu0 %v6502_v36  ;;  %v5986_v36 = vcombine.high %v487_v31, %v491_v32  ;;  %v511_v22 = vld [vmem:[#allocation5 + $0xb58] sm:$0xff] }
 0x228   :  { %4804 = vmatprep.subr.bf16.mxu0 %v6507_v38  ;;  %v495_v38 = vld [vmem:[#allocation5 + $0xad8] sm:$0xff] }
 0x229   :  { %3123 = vmatpush1.bf16.msra.mxu1 %v5913_v42  ;;  %v5985_v42 = vcombine.low %v487_v31, %v491_v32  ;;  %v515_v52 = vld [vmem:[#allocation5 + $0xb78] sm:$0xff]  ;;  %v6559_v32 = vld [vmem:[#allocation8 + $0x48] ss:$16 sps:$4 sm:$0xff]  }
 0x22a   :  { %3124 = vmatprep.subr.bf16.mxu1 %v5922_v46  ;;  %v6532_v46 = vld [vmem:[#allocation8 + $0x2e0] ss:$16 sps:$4 sm:$0xff]   ;;  %v6585_v26 = vld [vmem:[#allocation8 + $0x404] ss:$16 sps:$4 sm:$0xff]  }
 0x22b   :  { %4805 = vmatpush1.bf16.msra.mxu0 %v6505_v44  ;;  %v5994_v44 = vcombine.high %v495_v38, %v499_v40 }
 0x22c   :  { %4806 = vmatprep.subr.bf16.mxu0 %v6510_v47  ;;  %v503_v47 = vld [vmem:[#allocation5 + $0xb18] sm:$0xff] }
 0x22d   :  { %3125 = vmatpush1.bf16.msra.mxu1 %v5921_v49  ;;  %v5993_v49 = vcombine.low %v495_v38, %v499_v40  ;;  %v6565_v40 = vld [vmem:[#allocation8 + $0x68] ss:$16 sps:$4 sm:$0xff]  }
 0x22e   :  { %3126 = vmatprep.subr.bf16.mxu1 %v5930_v51  ;;  %v6535_v51 = vld [vmem:[#allocation8 + $0x300] ss:$16 sps:$4 sm:$0xff]  }
 0x22f   :  { %4807 = vmatpush1.bf16.msra.mxu0 %v6508_v50  ;;  %v6002_v50 = vcombine.high %v503_v47, %v507_v48 }
 0x230   :  { %4817 = vmatprep.subr.bf16.mxu0 %v6513_v30  ;;  %v6001_v30 = vcombine.low %v503_v47, %v507_v48  ;;  %v6571_v48 = vld [vmem:[#allocation8 + $0x88] ss:$16 sps:$4 sm:$0xff]  }
 0x231   :  { %3127 = vmatpush1.bf16.msra.mxu1 %v5929_v55  ;;  %v6010_v55 = vcombine.high %v511_v22, %v515_v52 }
 0x232   :  { %4809 = vmatmul.mubr.bf16.vlgmr.msra.gmra.mrb[8].mxu0 %v7370_v59  ;;  %3128 = vmatprep.subr.bf16.mxu1 %v5938_v56  ;;  %v6538_v56 = vld [vmem:[#allocation8 + $0x320] ss:$16 sps:$4 sm:$0xff]  }
 0x233   :  { %4818 = vmatpush1.bf16.msra.mxu0 %v6511_v57  ;;  %v519_v57 = vld [vmem:[#allocation5 + $0xb98] sm:$0xff] }
 0x234   :  { %4819 = vmatprep.subr.bf16.mxu0 %v6516_v0  ;;  %v6009_v0 = vcombine.low %v511_v22, %v515_v52  ;;  %v6574_v22 = vld [vmem:[#allocation8 + $0xa8] ss:$16 sps:$4 sm:$0xff]   ;;  %v6589_v52 = vld [vmem:[#allocation8 + $0x420] ss:$16 sps:$4 sm:$0xff]  }
 0x235   :  { %3129 = vmatpush1.bf16.msra.mxu1 %v5937_v20  ;;  %v6018_v20 = vcombine.high %v519_v57, %v523_v61 }
 0x236   :  { %3130 = vmatprep.subr.bf16.mxu1 %v5946_v2  ;;  %v6541_v2 = vld [vmem:[#allocation8 + $0x340] ss:$16 sps:$4 sm:$0xff]  }
 0x237   :  { %4820 = vmatpush1.bf16.msra.mxu0 %v6514_v3  ;;  %v527_v3 = vld [vmem:[#allocation5 + $0xbd8] sm:$0xff] }
 0x238   :  { %4821 = vmatprep.subr.bf16.mxu0 %v6519_v6  ;;  %v6017_v6 = vcombine.low %v519_v57, %v523_v61  ;;  %v6582_v57 = vld [vmem:[#allocation8 + $0xec] ss:$16 sps:$4 sm:$0xff]   ;;  %v6603_v61 = vld [vmem:[#allocation8 + $0x464] ss:$16 sps:$4 sm:$0xff]  }
 0x239   :  { %3131 = vmatpush1.bf16.msra.mxu1 %v5945_v7  ;;  %v6026_v7 = vcombine.high %v527_v3, %v531_v4 }
 0x23a   :  { %3132 = vmatprep.subr.bf16.mxu1 %v5954_v8  ;;  %v6544_v8 = vld [vmem:[#allocation8 + $0x360] ss:$16 sps:$4 sm:$0xff]  }
 0x23b   :  { %4822 = vmatpush1.bf16.msra.mxu0 %v6517_v9  ;;  %v535_v9 = vld [vmem:[#allocation5 + $0xc18] sm:$0xff] }
 0x23c   :  { %4823 = vmatprep.subr.bf16.mxu0 %v6522_v12  ;;  %v6025_v12 = vcombine.low %v527_v3, %v531_v4  ;;  %v6033_v16 = vcombine.low %v535_v9, %v539_v10  ;;  %v6586_v3 = vld [vmem:[#allocation8 + $0x108] ss:$16 sps:$4 sm:$0xff]   ;;  %v6607_v4 = vld [vmem:[#allocation8 + $0x480] ss:$16 sps:$4 sm:$0xff]  }
 0x23d   :  { %3133 = vmatpush1.bf16.msra.mxu1 %v5953_v13  ;;  %v6034_v13 = vcombine.high %v535_v9, %v539_v10  ;;  %v6600_v9 = vld [vmem:[#allocation8 + $0x14c] ss:$16 sps:$4 sm:$0xff]   ;;  %v6621_v10 = vld [vmem:[#allocation8 + $0x4c4] ss:$16 sps:$4 sm:$0xff]  }
 0x23e   :  { %3134 = vmatprep.subr.bf16.mxu1 %v5962_v14  ;;  %v6550_v14 = vld [vmem:[#allocation8 + $0x380] ss:$16 sps:$4 sm:$0xff]  }
 0x23f   :  { %4824 = vmatpush1.bf16.msra.mxu0 %v6520_v15  ;;  %v6558_v15 = vld [vmem:[#allocation8 + $0x3a4] ss:$16 sps:$4 sm:$0xff]  }
 0x240   :  { %4825 = vmatprep.subr.bf16.mxu0 %v6525_v19  ;;  %v6556_v19 = vld [vmem:[#allocation8 + $0x3a0] ss:$16 sps:$4 sm:$0xff]  }
 0x241   :  { %3135 = vmatpush1.bf16.msra.mxu1 %v5961_v21  ;;  %v6564_v21 = vld [vmem:[#allocation8 + $0x3c4] ss:$16 sps:$4 sm:$0xff]  }
 0x242   :  { %3136 = vmatprep.subr.bf16.mxu1 %v5970_v23  ;;  %v6562_v23 = vld [vmem:[#allocation8 + $0x3c0] ss:$16 sps:$4 sm:$0xff]  }
 0x243   :  { %4826 = vmatpush1.bf16.msra.mxu0 %v6523_v24  ;;  %v6570_v24 = vld [vmem:[#allocation8 + $0x3e4] ss:$16 sps:$4 sm:$0xff]  }
 0x244   :  { %4827 = vmatprep.subr.bf16.mxu0 %v6528_v27  ;;  %v6547_v27 = vld [vmem:[#allocation8 + $0x8] ss:$16 sps:$4 sm:$0xff]  }
 0x245   :  { %3137 = vmatpush1.bf16.msra.mxu1 %v5969_v28  ;;  %v6555_v28 = vld [vmem:[#allocation8 + $0x2c] ss:$16 sps:$4 sm:$0xff]  }
 0x246   :  { %3138 = vmatprep.subr.bf16.mxu1 %v5978_v39  ;;  %v556_v39 = vsub.s32 3, %v7344_v17 }
 0x247   :  { %4828 = vmatpush1.bf16.msra.mxu0 %v6526_v29  ;;  %v6561_v29 = vld [vmem:[#allocation8 + $0x4c] ss:$16 sps:$4 sm:$0xff]  }
 0x248   :  { %4829 = vmatprep.subr.bf16.mxu0 %v6531_v43  ;;  %v6567_v43 = vld [vmem:[#allocation8 + $0x6c] ss:$16 sps:$4 sm:$0xff]  }
 0x249   :  { %3139 = vmatpush1.bf16.msra.mxu1 %v5977_v35 }
 0x24a   :  { %3140 = vmatprep.subr.bf16.mxu1 %v5986_v36 }
 0x24b   :  { %4830 = vmatpush1.bf16.msra.mxu0 %v6529_v37 }
 0x24c   :  { %4831 = vmatprep.subr.bf16.mxu0 %v6534_v41 }
 0x24d   :  { %3141 = vmatpush1.bf16.msra.mxu1 %v5985_v42 }
 0x24e   :  { %3142 = vmatprep.subr.bf16.mxu1 %v5994_v44  ;;  %v6573_v44 = vld [vmem:[#allocation8 + $0x8c] ss:$16 sps:$4 sm:$0xff]  }
 0x24f   :  { %4832 = vmatpush1.bf16.msra.mxu0 %v6532_v46 }
 0x250   :  { %4833 = vmatprep.subr.bf16.mxu0 %v6537_v58  ;;  %v6583_v58 = vld [vmem:[#allocation8 + $0x400] ss:$16 sps:$4 sm:$0xff]  }
 0x251   :  { %3143 = vmatpush1.bf16.msra.mxu1 %v5993_v49 }
 0x252   :  { %3144 = vmatprep.subr.bf16.mxu1 %v6002_v50  ;;  %v6576_v50 = vld [vmem:[#allocation8 + $0xac] ss:$16 sps:$4 sm:$0xff]  }
 0x253   :  { %4834 = vmatpush1.bf16.msra.mxu0 %v6535_v51  ;;  %v6591_v51 = vld [vmem:[#allocation8 + $0x424] ss:$16 sps:$4 sm:$0xff]  }
 0x254   :  { %4835 = vmatprep.subr.bf16.mxu0 %v6540_v54  ;;  %v6579_v54 = vld [vmem:[#allocation8 + $0xcc] ss:$16 sps:$4 sm:$0xff]  }
 0x255   :  { %3145 = vmatpush1.bf16.msra.mxu1 %v6001_v30  ;;  %v6597_v30 = vld [vmem:[#allocation8 + $0x444] ss:$16 sps:$4 sm:$0xff]  }
 0x256   :  { %3146 = vmatprep.subr.bf16.mxu1 %v6010_v55  ;;  %v6577_v55 = vld [vmem:[#allocation8 + $0xc8] ss:$16 sps:$4 sm:$0xff]  }
 0x257   :  { %4836 = vmatpush1.bf16.msra.mxu0 %v6538_v56  ;;  %v6595_v56 = vld [vmem:[#allocation8 + $0x440] ss:$16 sps:$4 sm:$0xff]  }
 0x258   :  { %4837 = vmatprep.subr.bf16.mxu0 %v6543_v63  ;;  %v6580_v63 = vld [vmem:[#allocation8 + $0xe8] ss:$16 sps:$4 sm:$0xff]  }
 0x259   :  { %3147 = vmatpush1.bf16.msra.mxu1 %v6009_v0  ;;  %v6601_v0 = vld [vmem:[#allocation8 + $0x460] ss:$16 sps:$4 sm:$0xff]  }
 0x25a   :  { %3148 = vmatprep.subr.bf16.mxu1 %v6018_v20  ;;  %v6588_v20 = vld [vmem:[#allocation8 + $0x10c] ss:$16 sps:$4 sm:$0xff]  }
 0x25b   :  { %4838 = vmatpush1.bf16.msra.mxu0 %v6541_v2  ;;  %v6609_v2 = vld [vmem:[#allocation8 + $0x484] ss:$16 sps:$4 sm:$0xff]  }
 0x25c   :  { %4839 = vmatprep.subr.bf16.mxu0 %v6546_v5  ;;  %v6594_v5 = vld [vmem:[#allocation8 + $0x12c] ss:$16 sps:$4 sm:$0xff]  }
 0x25d   :  { %3149 = vmatpush1.bf16.msra.mxu1 %v6017_v6  ;;  %v6615_v6 = vld [vmem:[#allocation8 + $0x4a4] ss:$16 sps:$4 sm:$0xff]  }
 0x25e   :  { %3150 = vmatprep.subr.bf16.mxu1 %v6026_v7  ;;  %v6592_v7 = vld [vmem:[#allocation8 + $0x128] ss:$16 sps:$4 sm:$0xff]  }
 0x25f   :  { %4840 = vmatpush1.bf16.msra.mxu0 %v6544_v8  ;;  %v6613_v8 = vld [vmem:[#allocation8 + $0x4a0] ss:$16 sps:$4 sm:$0xff]  }
 0x260   :  { %4841 = vmatprep.subr.bf16.mxu0 %v6552_v11  ;;  %v6598_v11 = vld [vmem:[#allocation8 + $0x148] ss:$16 sps:$4 sm:$0xff]  }
 0x261   :  { %3151 = vmatpush1.bf16.msra.mxu1 %v6025_v12  ;;  %v6619_v12 = vld [vmem:[#allocation8 + $0x4c0] ss:$16 sps:$4 sm:$0xff]  }
 0x262   :  { %3161 = vmatprep.subr.bf16.mxu1 %v6034_v13  ;;  %v6606_v13 = vld [vmem:[#allocation8 + $0x16c] ss:$16 sps:$4 sm:$0xff]  }
 0x263   :  { %4842 = vmatpush1.bf16.msra.mxu0 %v6550_v14  ;;  %v6627_v14 = vld [vmem:[#allocation8 + $0x4e4] ss:$16 sps:$4 sm:$0xff]  }
 0x264   :  { %4843 = vmatprep.subr.bf16.mxu0 %v6558_v15  ;;  %3153 = vmatmul.mubr.bf16.vlgmr.msra.gmra.mrb[8].mxu1 %v7314_v34  ;;  %v7378_v34 = vsub.s32 2, %v7344_v17  ;;  %v6604_v15 = vld [vmem:[#allocation8 + $0x168] ss:$16 sps:$4 sm:$0xff]  }
 0x265   :  { %3162 = vmatpush1.bf16.msra.mxu1 %v6033_v16  ;;  %3193 = vmatprep.mubr.bf16.mxu1 %v7148_v45  ;;  %v6553_v45 = vld [vmem:[#allocation8 + $0x28] ss:$16 sps:$4 sm:$0xff]   ;;  %v6625_v16 = vld [vmem:[#allocation8 + $0x4e0] ss:$16 sps:$4 sm:$0xff]  }
 0x266   :  { %4940 = vmatprep.subr.bf16.mxu1 %v6549_v18  ;;  %v553_v31 = vrot.slane %v7349_v62, %v7378_v34  ;;  %v6612_v18 = vld [vmem:[#allocation8 + $0x18c] ss:$16 sps:$4 sm:$0xff]  }
 0x267   :  { %4844 = vmatpush1.bf16.msra.mxu0 %v6556_v19  ;;  %v6633_v19 = vld [vmem:[#allocation8 + $0x504] ss:$16 sps:$4 sm:$0xff]  }
 0x268   :  { %4845 = vmatprep.subr.bf16.mxu0 %v6564_v21  ;;  %v6610_v21 = vld [vmem:[#allocation8 + $0x188] ss:$16 sps:$4 sm:$0xff]  }
 0x26b   :  { %4846 = vmatpush1.bf16.msra.mxu0 %v6562_v23  ;;  %v6631_v23 = vld [vmem:[#allocation8 + $0x500] ss:$16 sps:$4 sm:$0xff]  }
 0x26c   :  { %4847 = vmatprep.subr.bf16.mxu0 %v6570_v24  ;;  %v6618_v24 = vld [vmem:[#allocation8 + $0x1ac] ss:$16 sps:$4 sm:$0xff]  }
 0x26f   :  { %4848 = vmatpush1.bf16.msra.mxu0 %v6568_v25  ;;  %v6639_v25 = vld [vmem:[#allocation8 + $0x524] ss:$16 sps:$4 sm:$0xff]  }
 0x270   :  { %4858 = vmatprep.subr.bf16.mxu0 %v6585_v26  ;;  %6038 = vmatmul.mubr.msk.bf16.vlgmr.msra.gmra.mrb[8].mxu1 %vm2542_vm0, %v7320_v53  ;;  %v557_v53 = vrot.slane %v7349_v62, %v556_v39  ;;  %v6616_v26 = vld [vmem:[#allocation8 + $0x1a8] ss:$16 sps:$4 sm:$0xff]  }
 0x271   :  { %4941 = vmatpush1.bf16.msra.mxu1 %v6547_v27  ;;  %4972 = vmatprep.mubr.bf16.mxu1 %v7364_v33  ;;  %v6637_v27 = vld [vmem:[#allocation8 + $0x520] ss:$16 sps:$4 sm:$0xff]  }
 0x272   :  { %4942 = vmatprep.subr.bf16.mxu1 %v6555_v28  ;;  %v6624_v28 = vld [vmem:[#allocation8 + $0x1cc] ss:$16 sps:$4 sm:$0xff]  }
 0x275   :  { %4943 = vmatpush1.bf16.msra.mxu1 %v6553_v45  ;;  %v6645_v45 = vld [vmem:[#allocation8 + $0x544] ss:$16 sps:$4 sm:$0xff]  }
 0x276   :  { %4944 = vmatprep.subr.bf16.mxu1 %v6561_v29  ;;  %v6622_v29 = vld [vmem:[#allocation8 + $0x1c8] ss:$16 sps:$4 sm:$0xff]  }
 0x277   :  { %v2867_v35 = vpop.f32.mrb[4].mxu1 }
 0x278   :  { %v6364_v36 = vadd.f32 %v2867_v35, %v553_v31  ;;  %v2869_v37 = vpop.f32.mrb[5].mxu1  ;;  %v6643_v31 = vld [vmem:[#allocation8 + $0x540] ss:$16 sps:$4 sm:$0xff]  }
 0x279   :  { %4945 = vmatpush1.bf16.msra.mxu1 %v6559_v32  ;;  %v6365_v33 = vadd.f32 %v2869_v37, %v557_v53  ;;  %v2871_v38 = vpop.f32.mrb[6].mxu1  ;;  %v6630_v32 = vld [vmem:[#allocation8 + $0x1ec] ss:$16 sps:$4 sm:$0xff]   ;;  %v6651_v53 = vld [vmem:[#allocation8 + $0x564] ss:$16 sps:$4 sm:$0xff]  }
 0x27a   :  { %v3204_v41 = vmax.f32 %v6364_v36, 0.0  ;;  %v2872_v42 = vpop.f32.mrb[7].mxu1  ;;  %4946 = vmatprep.subr.bf16.mxu1 %v6567_v43  ;;  %v6628_v43 = vld [vmem:[#allocation8 + $0x1e8] ss:$16 sps:$4 sm:$0xff]   ;;  %v6649_v35 = vld [vmem:[#allocation8 + $0x560] ss:$16 sps:$4 sm:$0xff]  }
 0x27b   :  { %v3205_v46 = vmax.f32 %v6365_v33, 0.0  ;;  %v6636_v36 = vld [vmem:[#allocation8 + $0x20c] ss:$16 sps:$4 sm:$0xff]   ;;  %v6657_v37 = vld [vmem:[#allocation8 + $0x584] ss:$16 sps:$4 sm:$0xff]  }
 0x27c   :  { %v7389_v49 = vpack.c.bf16 %v3204_v41, %v3204_v41  ;;  %v6634_v33 = vld [vmem:[#allocation8 + $0x208] ss:$16 sps:$4 sm:$0xff]   ;;  %v6642_v38 = vld [vmem:[#allocation8 + $0x22c] ss:$16 sps:$4 sm:$0xff]   ;;  %v6663_v41 = vld [vmem:[#allocation8 + $0x5a4] ss:$16 sps:$4 sm:$0xff]  }
 0x27d   :  { %v7387_v47 = vpack.c.bf16 %v3205_v46, %v3205_v46  ;;  %4947 = vmatpush1.bf16.msra.mxu1 %v6565_v40  ;;  %v6655_v40 = vld [vmem:[#allocation8 + $0x580] ss:$16 sps:$4 sm:$0xff]   ;;  %v6640_v42 = vld [vmem:[#allocation8 + $0x228] ss:$16 sps:$4 sm:$0xff]  }
 0x27e   :  { %4948 = vmatprep.subr.bf16.mxu1 %v6573_v44  ;;  %v6648_v44 = vld [vmem:[#allocation8 + $0x24c] ss:$16 sps:$4 sm:$0xff]   ;;  %v6661_v46 = vld [vmem:[#allocation8 + $0x5a0] ss:$16 sps:$4 sm:$0xff]  }
 0x27f   :  { %4849 = vmatprep.mubr.bf16.mxu0 %v7387_v47 }
 0x280   :  { %4850 = vmatmul.mubr.bf16.vlgmr.msra.gmra.mrb[8].mxu0 %v7389_v49 }
 0x281   :  { %4949 = vmatpush1.bf16.msra.mxu1 %v6571_v48  ;;  %4859 = vmatpush1.bf16.msra.mxu0 %v6583_v58  ;;  %v6669_v48 = vld [vmem:[#allocation8 + $0x5c4] ss:$16 sps:$4 sm:$0xff]   ;;  %v6646_v58 = vld [vmem:[#allocation8 + $0x248] ss:$16 sps:$4 sm:$0xff]  }
 0x282   :  { %4950 = vmatprep.subr.bf16.mxu1 %v6576_v50  ;;  %4860 = vmatprep.subr.bf16.mxu0 %v6591_v51  ;;  %v6654_v50 = vld [vmem:[#allocation8 + $0x26c] ss:$16 sps:$4 sm:$0xff]   ;;  %v6667_v51 = vld [vmem:[#allocation8 + $0x5c0] ss:$16 sps:$4 sm:$0xff]  }
 0x285   :  { %4951 = vmatpush1.bf16.msra.mxu1 %v6574_v22  ;;  %4861 = vmatpush1.bf16.msra.mxu0 %v6589_v52  ;;  %v6675_v22 = vld [vmem:[#allocation8 + $0x5e4] ss:$16 sps:$4 sm:$0xff]   ;;  %v6660_v52 = vld [vmem:[#allocation8 + $0x28c] ss:$16 sps:$4 sm:$0xff]  }
 0x286   :  { %4952 = vmatprep.subr.bf16.mxu1 %v6579_v54  ;;  %4862 = vmatprep.subr.bf16.mxu0 %v6597_v30  ;;  %v6729_v54 = vld [vmem:[#allocation8 + $0x604] ss:$16 sps:$4 sm:$0xff]   ;;  %v6658_v30 = vld [vmem:[#allocation8 + $0x288] ss:$16 sps:$4 sm:$0xff]  }
 0x289   :  { %4953 = vmatpush1.bf16.msra.mxu1 %v6577_v55  ;;  %4863 = vmatpush1.bf16.msra.mxu0 %v6595_v56  ;;  %v560_v55 = vsub.s32 4, %v7344_v17  ;;  %v6666_v56 = vld [vmem:[#allocation8 + $0x2ac] ss:$16 sps:$4 sm:$0xff]  }
 0x28a   :  { %4954 = vmatprep.subr.bf16.mxu1 %v6582_v57  ;;  %4864 = vmatprep.subr.bf16.mxu0 %v6603_v61  ;;  %v564_v57 = vsub.s32 5, %v7344_v17 }
 0x28b   :  { %v561_v61 = vrot.slane %v7349_v62, %v560_v55  ;;  %v6789_v55 = vld [vmem:[#allocation8 + $0x744] ss:$16 sps:$4 sm:$0xff]  }
 0x28d   :  { %4955 = vmatpush1.bf16.msra.mxu1 %v6580_v63  ;;  %4865 = vmatpush1.bf16.msra.mxu0 %v6601_v0  ;;  %v6664_v63 = vld [vmem:[#allocation8 + $0x2a8] ss:$16 sps:$4 sm:$0xff]   ;;  %v565_v0 = vrot.slane %v7349_v62, %v564_v57  ;;  %v6727_v62 = vld [vmem:[#allocation8 + $0x600] ss:$16 sps:$4 sm:$0xff]   ;;  %v6711_v57 = vld [vmem:[#allocation8 + $0x44c] ss:$16 sps:$4 sm:$0xff]  }
 0x28e   :  { %4956 = vmatprep.subr.bf16.mxu1 %v6588_v20  ;;  %4866 = vmatprep.subr.bf16.mxu0 %v6609_v2  ;;  %v6672_v20 = vld [vmem:[#allocation8 + $0x2cc] ss:$16 sps:$4 sm:$0xff]  }
 0x291   :  { %4957 = vmatpush1.bf16.msra.mxu1 %v6586_v3  ;;  %4867 = vmatpush1.bf16.msra.mxu0 %v6607_v4 }
 0x292   :  { %4958 = vmatprep.subr.bf16.mxu1 %v6594_v5  ;;  %4868 = vmatprep.subr.bf16.mxu0 %v6615_v6  ;;  %v6670_v5 = vld [vmem:[#allocation8 + $0x2c8] ss:$16 sps:$4 sm:$0xff]  }
 0x295   :  { %4959 = vmatpush1.bf16.msra.mxu1 %v6592_v7  ;;  %4869 = vmatpush1.bf16.msra.mxu0 %v6613_v8  ;;  %v6678_v8 = vld [vmem:[#allocation8 + $0x2ec] ss:$16 sps:$4 sm:$0xff]  }
 0x296   :  { %4960 = vmatprep.subr.bf16.mxu1 %v6600_v9  ;;  %4870 = vmatprep.subr.bf16.mxu0 %v6621_v10 }
 0x299   :  { %4961 = vmatpush1.bf16.msra.mxu1 %v6598_v11  ;;  %4871 = vmatpush1.bf16.msra.mxu0 %v6619_v12  ;;  %v6676_v12 = vld [vmem:[#allocation8 + $0x2e8] ss:$16 sps:$4 sm:$0xff]  }
 0x29a   :  { %4962 = vmatprep.subr.bf16.mxu1 %v6606_v13  ;;  %4872 = vmatprep.subr.bf16.mxu0 %v6627_v14  ;;  %v6681_v14 = vld [vmem:[#allocation8 + $0x30c] ss:$16 sps:$4 sm:$0xff]  }
 0x29d   :  { %4963 = vmatpush1.bf16.msra.mxu1 %v6604_v15  ;;  %4873 = vmatpush1.bf16.msra.mxu0 %v6625_v16  ;;  %v6735_v16 = vld [vmem:[#allocation8 + $0x624] ss:$16 sps:$4 sm:$0xff]  }
 0x29e   :  { %4964 = vmatprep.subr.bf16.mxu1 %v6612_v18  ;;  %4874 = vmatprep.subr.bf16.mxu0 %v6633_v19  ;;  %v6679_v18 = vld [vmem:[#allocation8 + $0x308] ss:$16 sps:$4 sm:$0xff]   ;;  %v6684_v19 = vld [vmem:[#allocation8 + $0x32c] ss:$16 sps:$4 sm:$0xff]  }
 0x2a1   :  { %4965 = vmatpush1.bf16.msra.mxu1 %v6610_v21  ;;  %4875 = vmatpush1.bf16.msra.mxu0 %v6631_v23  ;;  %v6733_v21 = vld [vmem:[#allocation8 + $0x620] ss:$16 sps:$4 sm:$0xff]   ;;  %v6741_v23 = vld [vmem:[#allocation8 + $0x644] ss:$16 sps:$4 sm:$0xff]  }
 0x2a2   :  { %4966 = vmatprep.subr.bf16.mxu1 %v6618_v24  ;;  %4876 = vmatprep.subr.bf16.mxu0 %v6639_v25  ;;  %v6682_v24 = vld [vmem:[#allocation8 + $0x328] ss:$16 sps:$4 sm:$0xff]   ;;  %v6687_v25 = vld [vmem:[#allocation8 + $0x34c] ss:$16 sps:$4 sm:$0xff]  }
 0x2a5   :  { %4967 = vmatpush1.bf16.msra.mxu1 %v6616_v26  ;;  %4877 = vmatpush1.bf16.msra.mxu0 %v6637_v27  ;;  %v6739_v26 = vld [vmem:[#allocation8 + $0x640] ss:$16 sps:$4 sm:$0xff]   ;;  %v6747_v27 = vld [vmem:[#allocation8 + $0x664] ss:$16 sps:$4 sm:$0xff]  }
 0x2a6   :  { %4968 = vmatprep.subr.bf16.mxu1 %v6624_v28  ;;  %4878 = vmatprep.subr.bf16.mxu0 %v6645_v45  ;;  %v6685_v28 = vld [vmem:[#allocation8 + $0x348] ss:$16 sps:$4 sm:$0xff]   ;;  %v6690_v45 = vld [vmem:[#allocation8 + $0x36c] ss:$16 sps:$4 sm:$0xff]  }
 0x2a9   :  { %4969 = vmatpush1.bf16.msra.mxu1 %v6622_v29  ;;  %4879 = vmatpush1.bf16.msra.mxu0 %v6643_v31  ;;  %v6745_v29 = vld [vmem:[#allocation8 + $0x660] ss:$16 sps:$4 sm:$0xff]   ;;  %v6753_v31 = vld [vmem:[#allocation8 + $0x684] ss:$16 sps:$4 sm:$0xff]  }
 0x2aa   :  { %4970 = vmatprep.subr.bf16.mxu1 %v6630_v32  ;;  %4880 = vmatprep.subr.bf16.mxu0 %v6651_v53  ;;  %v6688_v32 = vld [vmem:[#allocation8 + $0x368] ss:$16 sps:$4 sm:$0xff]   ;;  %v6693_v53 = vld [vmem:[#allocation8 + $0x38c] ss:$16 sps:$4 sm:$0xff]  }
 0x2ad   :  { %4971 = vmatpush1.bf16.msra.mxu1 %v6628_v43  ;;  %4881 = vmatpush1.bf16.msra.mxu0 %v6649_v35  ;;  %v6751_v43 = vld [vmem:[#allocation8 + $0x680] ss:$16 sps:$4 sm:$0xff]   ;;  %v6759_v35 = vld [vmem:[#allocation8 + $0x6a4] ss:$16 sps:$4 sm:$0xff]  }
 0x2ae   :  { %4981 = vmatprep.subr.bf16.mxu1 %v6636_v36  ;;  %4882 = vmatprep.subr.bf16.mxu0 %v6657_v37  ;;  %v6691_v36 = vld [vmem:[#allocation8 + $0x388] ss:$16 sps:$4 sm:$0xff]   ;;  %v6696_v37 = vld [vmem:[#allocation8 + $0x3ac] ss:$16 sps:$4 sm:$0xff]  }
 0x2b0   :  { %4973 = vmatmul.mubr.bf16.vlgmr.msra.gmra.mrb[12].mxu1 %v7370_v59  ;;  %v6652_v59 = vld [vmem:[#allocation8 + $0x268] ss:$16 sps:$4 sm:$0xff]  }
 0x2b1   :  { %4982 = vmatpush1.bf16.msra.mxu1 %v6634_v33  ;;  %5013 = vmatprep.mubr.bf16.mxu1 %v7387_v47  ;;  %v6673_v47 = vld [vmem:[#allocation8 + $0x5e0] ss:$16 sps:$4 sm:$0xff]  }
 0x2b2   :  { %4983 = vmatprep.subr.bf16.mxu1 %v6642_v38  ;;  %4883 = vmatpush1.bf16.msra.mxu0 %v6655_v40  ;;  %v6757_v33 = vld [vmem:[#allocation8 + $0x6a0] ss:$16 sps:$4 sm:$0xff]   ;;  %v6765_v38 = vld [vmem:[#allocation8 + $0x6c4] ss:$16 sps:$4 sm:$0xff]   ;;  %v6694_v40 = vld [vmem:[#allocation8 + $0x3a8] ss:$16 sps:$4 sm:$0xff]  }
 0x2b3   :  { %4884 = vmatprep.subr.bf16.mxu0 %v6663_v41  ;;  %v6699_v41 = vld [vmem:[#allocation8 + $0x3cc] ss:$16 sps:$4 sm:$0xff]  }
 0x2b5   :  { %4984 = vmatpush1.bf16.msra.mxu1 %v6640_v42  ;;  %v6763_v42 = vld [vmem:[#allocation8 + $0x6c0] ss:$16 sps:$4 sm:$0xff]  }
 0x2b6   :  { %4985 = vmatprep.subr.bf16.mxu1 %v6648_v44  ;;  %4885 = vmatpush1.bf16.msra.mxu0 %v6661_v46  ;;  %v6771_v44 = vld [vmem:[#allocation8 + $0x6e4] ss:$16 sps:$4 sm:$0xff]   ;;  %v6697_v46 = vld [vmem:[#allocation8 + $0x3c8] ss:$16 sps:$4 sm:$0xff]  }
 0x2b7   :  { %4886 = vmatprep.subr.bf16.mxu0 %v6669_v48  ;;  %v6702_v48 = vld [vmem:[#allocation8 + $0x3ec] ss:$16 sps:$4 sm:$0xff]  }
 0x2b9   :  { %4986 = vmatpush1.bf16.msra.mxu1 %v6646_v58  ;;  %v6769_v58 = vld [vmem:[#allocation8 + $0x6e0] ss:$16 sps:$4 sm:$0xff]  }
 0x2ba   :  { %4987 = vmatprep.subr.bf16.mxu1 %v6654_v50  ;;  %4887 = vmatpush1.bf16.msra.mxu0 %v6667_v51  ;;  %v6777_v50 = vld [vmem:[#allocation8 + $0x704] ss:$16 sps:$4 sm:$0xff]   ;;  %v6700_v51 = vld [vmem:[#allocation8 + $0x3e8] ss:$16 sps:$4 sm:$0xff]  }
 0x2bb   :  { %4888 = vmatprep.subr.bf16.mxu0 %v6675_v22  ;;  %v6705_v22 = vld [vmem:[#allocation8 + $0x40c] ss:$16 sps:$4 sm:$0xff]  }
 0x2bd   :  { %4988 = vmatpush1.bf16.msra.mxu1 %v6652_v59  ;;  %v6775_v59 = vld [vmem:[#allocation8 + $0x700] ss:$16 sps:$4 sm:$0xff]  }
 0x2be   :  { %4989 = vmatprep.subr.bf16.mxu1 %v6660_v52  ;;  %4889 = vmatpush1.bf16.msra.mxu0 %v6673_v47  ;;  %v6783_v52 = vld [vmem:[#allocation8 + $0x724] ss:$16 sps:$4 sm:$0xff]   ;;  %v6703_v47 = vld [vmem:[#allocation8 + $0x408] ss:$16 sps:$4 sm:$0xff]  }
 0x2bf   :  { %4899 = vmatprep.subr.bf16.mxu0 %v6729_v54  ;;  %v6708_v54 = vld [vmem:[#allocation8 + $0x42c] ss:$16 sps:$4 sm:$0xff]  }
 0x2c1   :  { %4990 = vmatpush1.bf16.msra.mxu1 %v6658_v30  ;;  %v6781_v30 = vld [vmem:[#allocation8 + $0x720] ss:$16 sps:$4 sm:$0xff]  }
 0x2c2   :  { %4991 = vmatprep.subr.bf16.mxu1 %v6666_v56  ;;  %v6706_v56 = vld [vmem:[#allocation8 + $0x428] ss:$16 sps:$4 sm:$0xff]  }
 0x2c5   :  { %v3031_v2 = vpop.f32.mrb[4].mxu0  ;;  %4992 = vmatpush1.bf16.msra.mxu1 %v6664_v63  ;;  %v6795_v63 = vld [vmem:[#allocation8 + $0x764] ss:$16 sps:$4 sm:$0xff]  }
 0x2c6   :  { %v6366_v3 = vadd.f32 %v3031_v2, %v561_v61  ;;  %v3033_v4 = vpop.f32.mrb[5].mxu0  ;;  %4993 = vmatprep.subr.bf16.mxu1 %v6672_v20  ;;  %v6787_v61 = vld [vmem:[#allocation8 + $0x740] ss:$16 sps:$4 sm:$0xff]   ;;  %v6714_v20 = vld [vmem:[#allocation8 + $0x46c] ss:$16 sps:$4 sm:$0xff]  }
 0x2c7   :  { %v6367_v6 = vadd.f32 %v3033_v4, %v565_v0  ;;  %v3035_v7 = vpop.f32.mrb[6].mxu0  ;;  %v6709_v0 = vld [vmem:[#allocation8 + $0x448] ss:$16 sps:$4 sm:$0xff]   ;;  %v6793_v2 = vld [vmem:[#allocation8 + $0x760] ss:$16 sps:$4 sm:$0xff]  }
 0x2c8   :  { %v3206_v9 = vmax.f32 %v6366_v3, 0.0  ;;  %v3036_v10 = vpop.f32.mrb[7].mxu0  ;;  %v6801_v3 = vld [vmem:[#allocation8 + $0x784] ss:$16 sps:$4 sm:$0xff]   ;;  %v6717_v4 = vld [vmem:[#allocation8 + $0x48c] ss:$16 sps:$4 sm:$0xff]  }
 0x2c9   :  { %v3207_v11 = vmax.f32 %v6367_v6, 0.0  ;;  %4994 = vmatpush1.bf16.msra.mxu1 %v6670_v5  ;;  %v6799_v5 = vld [vmem:[#allocation8 + $0x780] ss:$16 sps:$4 sm:$0xff]   ;;  %v6807_v6 = vld [vmem:[#allocation8 + $0x7a4] ss:$16 sps:$4 sm:$0xff]  }
 0x2ca   :  { %4995 = vmatprep.subr.bf16.mxu1 %v6678_v8  ;;  %v7401_v15 = vpack.c.bf16 %v3206_v9, %v3206_v9  ;;  %v6715_v7 = vld [vmem:[#allocation8 + $0x488] ss:$16 sps:$4 sm:$0xff]   ;;  %v6720_v8 = vld [vmem:[#allocation8 + $0x4ac] ss:$16 sps:$4 sm:$0xff]   ;;  %v6805_v9 = vld [vmem:[#allocation8 + $0x7a0] ss:$16 sps:$4 sm:$0xff]  }
 0x2cb   :  { %v7399_v13 = vpack.c.bf16 %v3207_v11, %v3207_v11  ;;  %v6813_v10 = vld [vmem:[#allocation8 + $0x7c4] ss:$16 sps:$4 sm:$0xff]   ;;  %v6718_v11 = vld [vmem:[#allocation8 + $0x4a8] ss:$16 sps:$4 sm:$0xff]  }
 0x2cd   :  { %4890 = vmatprep.mubr.bf16.mxu0 %v7399_v13  ;;  %4996 = vmatpush1.bf16.msra.mxu1 %v6676_v12  ;;  %v6723_v12 = vld [vmem:[#allocation8 + $0x4cc] ss:$16 sps:$4 sm:$0xff]  }
 0x2ce   :  { %4891 = vmatmul.mubr.bf16.vlgmr.msra.gmra.mrb[8].mxu0 %v7401_v15  ;;  %4997 = vmatprep.subr.bf16.mxu1 %v6681_v14  ;;  %v6819_v14 = vld [vmem:[#allocation8 + $0x7e4] ss:$16 sps:$4 sm:$0xff]  }
 0x2cf   :  { %4900 = vmatpush1.bf16.msra.mxu0 %v6727_v62  ;;  %v6721_v62 = vld [vmem:[#allocation8 + $0x4c8] ss:$16 sps:$4 sm:$0xff]  }
 0x2d0   :  { %4901 = vmatprep.subr.bf16.mxu0 %v6735_v16  ;;  %v6726_v16 = vld [vmem:[#allocation8 + $0x4ec] ss:$16 sps:$4 sm:$0xff]  }
 0x2d1   :  { %4998 = vmatpush1.bf16.msra.mxu1 %v6679_v18  ;;  %v6817_v18 = vld [vmem:[#allocation8 + $0x7e0] ss:$16 sps:$4 sm:$0xff]  }
 0x2d2   :  { %4999 = vmatprep.subr.bf16.mxu1 %v6684_v19  ;;  %v6849_v19 = vld [vmem:[#allocation11 + $0x4] ss:$8 sps:$4 sm:$0xff]  }
 0x2d3   :  { %4902 = vmatpush1.bf16.msra.mxu0 %v6733_v21  ;;  %v6724_v21 = vld [vmem:[#allocation8 + $0x4e8] ss:$16 sps:$4 sm:$0xff]  }
 0x2d4   :  { %4903 = vmatprep.subr.bf16.mxu0 %v6741_v23  ;;  %v6732_v23 = vld [vmem:[#allocation8 + $0x50c] ss:$16 sps:$4 sm:$0xff]  }
 0x2d5   :  { %5000 = vmatpush1.bf16.msra.mxu1 %v6682_v24  ;;  %v6730_v24 = vld [vmem:[#allocation8 + $0x508] ss:$16 sps:$4 sm:$0xff]  }
 0x2d6   :  { %5001 = vmatprep.subr.bf16.mxu1 %v6687_v25  ;;  %v6738_v25 = vld [vmem:[#allocation8 + $0x52c] ss:$16 sps:$4 sm:$0xff]  }
 0x2d7   :  { %4904 = vmatpush1.bf16.msra.mxu0 %v6739_v26  ;;  %v6736_v26 = vld [vmem:[#allocation8 + $0x528] ss:$16 sps:$4 sm:$0xff]  }
 0x2d8   :  { %4905 = vmatprep.subr.bf16.mxu0 %v6747_v27  ;;  %v6744_v27 = vld [vmem:[#allocation8 + $0x54c] ss:$16 sps:$4 sm:$0xff]  }
 0x2d9   :  { %5002 = vmatpush1.bf16.msra.mxu1 %v6685_v28  ;;  %v6742_v28 = vld [vmem:[#allocation8 + $0x548] ss:$16 sps:$4 sm:$0xff]  }
 0x2da   :  { %5003 = vmatprep.subr.bf16.mxu1 %v6690_v45  ;;  %v6750_v45 = vld [vmem:[#allocation8 + $0x56c] ss:$16 sps:$4 sm:$0xff]  }
 0x2db   :  { %4906 = vmatpush1.bf16.msra.mxu0 %v6745_v29  ;;  %v6748_v29 = vld [vmem:[#allocation8 + $0x568] ss:$16 sps:$4 sm:$0xff]  }
 0x2dc   :  { %4907 = vmatprep.subr.bf16.mxu0 %v6753_v31  ;;  %v6756_v31 = vld [vmem:[#allocation8 + $0x58c] ss:$16 sps:$4 sm:$0xff]  }
 0x2dd   :  { %5004 = vmatpush1.bf16.msra.mxu1 %v6688_v32  ;;  %v6754_v32 = vld [vmem:[#allocation8 + $0x588] ss:$16 sps:$4 sm:$0xff]  }
 0x2de   :  { %5005 = vmatprep.subr.bf16.mxu1 %v6693_v53  ;;  %v6762_v53 = vld [vmem:[#allocation8 + $0x5ac] ss:$16 sps:$4 sm:$0xff]  }
 0x2df   :  { %4908 = vmatpush1.bf16.msra.mxu0 %v6751_v43  ;;  %v6760_v43 = vld [vmem:[#allocation8 + $0x5a8] ss:$16 sps:$4 sm:$0xff]  }
 0x2e0   :  { %4909 = vmatprep.subr.bf16.mxu0 %v6759_v35  ;;  %v6768_v35 = vld [vmem:[#allocation8 + $0x5cc] ss:$16 sps:$4 sm:$0xff]  }
 0x2e1   :  { %5006 = vmatpush1.bf16.msra.mxu1 %v6691_v36  ;;  %v6766_v36 = vld [vmem:[#allocation8 + $0x5c8] ss:$16 sps:$4 sm:$0xff]  }
 0x2e2   :  { %5007 = vmatprep.subr.bf16.mxu1 %v6696_v37  ;;  %v6774_v37 = vld [vmem:[#allocation8 + $0x5ec] ss:$16 sps:$4 sm:$0xff]  }
 0x2e3   :  { %4910 = vmatpush1.bf16.msra.mxu0 %v6757_v33  ;;  %v6772_v33 = vld [vmem:[#allocation8 + $0x5e8] ss:$16 sps:$4 sm:$0xff]  }
 0x2e4   :  { %4911 = vmatprep.subr.bf16.mxu0 %v6765_v38  ;;  %v6780_v38 = vld [vmem:[#allocation8 + $0x60c] ss:$16 sps:$4 sm:$0xff]  }
 0x2e5   :  { %5008 = vmatpush1.bf16.msra.mxu1 %v6694_v40  ;;  %v6778_v40 = vld [vmem:[#allocation8 + $0x608] ss:$16 sps:$4 sm:$0xff]  }
 0x2e6   :  { %5009 = vmatprep.subr.bf16.mxu1 %v6699_v41  ;;  %v6786_v41 = vld [vmem:[#allocation8 + $0x62c] ss:$16 sps:$4 sm:$0xff]  }
 0x2e7   :  { %4912 = vmatpush1.bf16.msra.mxu0 %v6763_v42  ;;  %v6784_v42 = vld [vmem:[#allocation8 + $0x628] ss:$16 sps:$4 sm:$0xff]  }
 0x2e8   :  { %4913 = vmatprep.subr.bf16.mxu0 %v6771_v44  ;;  %v6792_v44 = vld [vmem:[#allocation8 + $0x64c] ss:$16 sps:$4 sm:$0xff]  }
 0x2e9   :  { %5010 = vmatpush1.bf16.msra.mxu1 %v6697_v46  ;;  %v6790_v46 = vld [vmem:[#allocation8 + $0x648] ss:$16 sps:$4 sm:$0xff]  }
 0x2ea   :  { %5011 = vmatprep.subr.bf16.mxu1 %v6702_v48  ;;  %v6798_v48 = vld [vmem:[#allocation8 + $0x66c] ss:$16 sps:$4 sm:$0xff]  }
 0x2eb   :  { %4914 = vmatpush1.bf16.msra.mxu0 %v6769_v58  ;;  %v6796_v58 = vld [vmem:[#allocation8 + $0x668] ss:$16 sps:$4 sm:$0xff]  }
 0x2ec   :  { %4915 = vmatprep.subr.bf16.mxu0 %v6777_v50  ;;  %v6804_v50 = vld [vmem:[#allocation8 + $0x68c] ss:$16 sps:$4 sm:$0xff]  }
 0x2ed   :  { %5012 = vmatpush1.bf16.msra.mxu1 %v6700_v51  ;;  %v568_v51 = vsub.s32 6, %v7344_v17 }
 0x2ee   :  { %5022 = vmatprep.subr.bf16.mxu1 %v6705_v22  ;;  %v6802_v22 = vld [vmem:[#allocation8 + $0x688] ss:$16 sps:$4 sm:$0xff]  }
 0x2ef   :  { %4916 = vmatpush1.bf16.msra.mxu0 %v6775_v59  ;;  %v572_v59 = vsub.s32 7, %v7344_v17  ;;  %v6927_v17 = vld [vmem:[#allocation11 + $0x1a4] ss:$8 sps:$4 sm:$0xff]  }
 0x2f0   :  { %4917 = vmatprep.subr.bf16.mxu0 %v6783_v52  ;;  %5014 = vmatmul.mubr.bf16.vlgmr.msra.gmra.mrb[12].mxu1 %v7389_v49  ;;  %v6712_v49 = vld [vmem:[#allocation8 + $0x468] ss:$16 sps:$4 sm:$0xff]  }
 0x2f1   :  { %5023 = vmatpush1.bf16.msra.mxu1 %v6703_v47  ;;  %5054 = vmatprep.mubr.bf16.mxu1 %v7399_v13  ;;  %v6811_v13 = vld [vmem:[#allocation8 + $0x7c0] ss:$16 sps:$4 sm:$0xff]   ;;  %v6947_v52 = vld [vmem:[#allocation7] sm:$0xff] }
 0x2f2   :  { %5024 = vmatprep.subr.bf16.mxu1 %v6708_v54  ;;  %v569_v47 = vrot.slane %v6947_v52, %v568_v51  ;;  %v6808_v54 = vld [vmem:[#allocation8 + $0x6a8] ss:$16 sps:$4 sm:$0xff]  }
 0x2f3   :  { %4918 = vmatpush1.bf16.msra.mxu0 %v6781_v30  ;;  %v573_v30 = vrot.slane %v6947_v52, %v572_v59  ;;  %v6882_v51 = vld [vmem:[#allocation11 + $0xb4] ss:$8 sps:$4 sm:$0xff]   ;;  %v6885_v59 = vld [vmem:[#allocation11 + $0xc4] ss:$8 sps:$4 sm:$0xff]  }
 0x2f4   :  { %4919 = vmatprep.subr.bf16.mxu0 %v6789_v55  ;;  %v6816_v55 = vld [vmem:[#allocation8 + $0x6cc] ss:$16 sps:$4 sm:$0xff]   ;;  %v6888_v52 = vld [vmem:[#allocation11 + $0xd4] ss:$8 sps:$4 sm:$0xff]  }
 0x2f5   :  { %5025 = vmatpush1.bf16.msra.mxu1 %v6706_v56 }
 0x2f6   :  { %5026 = vmatprep.subr.bf16.mxu1 %v6711_v57 }
 0x2f7   :  { %4920 = vmatpush1.bf16.msra.mxu0 %v6787_v61 }
 0x2f8   :  { %4921 = vmatprep.subr.bf16.mxu0 %v6795_v63 }
 0x2f9   :  { %5027 = vmatpush1.bf16.msra.mxu1 %v6709_v0 }
 0x2fa   :  { %5028 = vmatprep.subr.bf16.mxu1 %v6714_v20  ;;  %v6814_v20 = vld [vmem:[#allocation8 + $0x6c8] ss:$16 sps:$4 sm:$0xff]  }
 0x2fb   :  { %4922 = vmatpush1.bf16.msra.mxu0 %v6793_v2 }
 0x2fc   :  { %4923 = vmatprep.subr.bf16.mxu0 %v6801_v3 }
 0x2fd   :  { %5029 = vmatpush1.bf16.msra.mxu1 %v6712_v49  ;;  %v6822_v49 = vld [vmem:[#allocation8 + $0x6ec] ss:$16 sps:$4 sm:$0xff]  }
 0x2fe   :  { %5030 = vmatprep.subr.bf16.mxu1 %v6717_v4 }
 0x2ff   :  { %4924 = vmatpush1.bf16.msra.mxu0 %v6799_v5 }
 0x300   :  { %4925 = vmatprep.subr.bf16.mxu0 %v6807_v6  ;;  %v6820_v6 = vld [vmem:[#allocation8 + $0x6e8] ss:$16 sps:$4 sm:$0xff]  }
 0x301   :  { %5031 = vmatpush1.bf16.msra.mxu1 %v6715_v7  ;;  %v6847_v7 = vld [vmem:[#allocation11] ss:$8 sps:$4 sm:$0xff]  }
 0x302   :  { %5032 = vmatprep.subr.bf16.mxu1 %v6720_v8 }
 0x303   :  { %4926 = vmatpush1.bf16.msra.mxu0 %v6805_v9  ;;  %v6825_v9 = vld [vmem:[#allocation8 + $0x70c] ss:$16 sps:$4 sm:$0xff]  }
 0x304   :  { %4927 = vmatprep.subr.bf16.mxu0 %v6813_v10  ;;  %v6852_v10 = vld [vmem:[#allocation11 + $0x14] ss:$8 sps:$4 sm:$0xff]  }
 0x305   :  { %5033 = vmatpush1.bf16.msra.mxu1 %v6718_v11  ;;  %v6823_v11 = vld [vmem:[#allocation8 + $0x708] ss:$16 sps:$4 sm:$0xff]  }
 0x306   :  { %5034 = vmatprep.subr.bf16.mxu1 %v6723_v12  ;;  %v6850_v12 = vld [vmem:[#allocation11 + $0x10] ss:$8 sps:$4 sm:$0xff]  }
 0x307   :  { %4928 = vmatpush1.bf16.msra.mxu0 %v6811_v13  ;;  %v6828_v13 = vld [vmem:[#allocation8 + $0x72c] ss:$16 sps:$4 sm:$0xff]  }
 0x308   :  { %4929 = vmatprep.subr.bf16.mxu0 %v6819_v14  ;;  %v6855_v14 = vld [vmem:[#allocation11 + $0x24] ss:$8 sps:$4 sm:$0xff]  }
 0x309   :  { %5035 = vmatpush1.bf16.msra.mxu1 %v6721_v62  ;;  %v6826_v62 = vld [vmem:[#allocation8 + $0x728] ss:$16 sps:$4 sm:$0xff]  }
 0x30a   :  { %5036 = vmatprep.subr.bf16.mxu1 %v6726_v16  ;;  %v6853_v16 = vld [vmem:[#allocation11 + $0x20] ss:$8 sps:$4 sm:$0xff]  }
 0x30b   :  { %4930 = vmatpush1.bf16.msra.mxu0 %v6817_v18  ;;  %v6831_v18 = vld [vmem:[#allocation8 + $0x74c] ss:$16 sps:$4 sm:$0xff]  }
 0x30c   :  { %5508 = vmatprep.subr.bf16.mxu0 %v6849_v19  ;;  %v6858_v19 = vld [vmem:[#allocation11 + $0x34] ss:$8 sps:$4 sm:$0xff]  }
 0x30d   :  { %5037 = vmatpush1.bf16.msra.mxu1 %v6724_v21  ;;  %v6829_v21 = vld [vmem:[#allocation8 + $0x748] ss:$16 sps:$4 sm:$0xff]  }
 0x30e   :  { %5038 = vmatprep.subr.bf16.mxu1 %v6732_v23  ;;  %v6856_v23 = vld [vmem:[#allocation11 + $0x30] ss:$8 sps:$4 sm:$0xff]  }
 0x311   :  { %5039 = vmatpush1.bf16.msra.mxu1 %v6730_v24  ;;  %v6834_v24 = vld [vmem:[#allocation8 + $0x76c] ss:$16 sps:$4 sm:$0xff]  }
 0x312   :  { %5040 = vmatprep.subr.bf16.mxu1 %v6738_v25  ;;  %v6861_v25 = vld [vmem:[#allocation11 + $0x44] ss:$8 sps:$4 sm:$0xff]  }
 0x315   :  { %5041 = vmatpush1.bf16.msra.mxu1 %v6736_v26  ;;  %v6832_v26 = vld [vmem:[#allocation8 + $0x768] ss:$16 sps:$4 sm:$0xff]  }
 0x316   :  { %5042 = vmatprep.subr.bf16.mxu1 %v6744_v27  ;;  %v6859_v27 = vld [vmem:[#allocation11 + $0x40] ss:$8 sps:$4 sm:$0xff]  }
 0x319   :  { %5043 = vmatpush1.bf16.msra.mxu1 %v6742_v28  ;;  %v6837_v28 = vld [vmem:[#allocation8 + $0x78c] ss:$16 sps:$4 sm:$0xff]  }
 0x31a   :  { %5044 = vmatprep.subr.bf16.mxu1 %v6750_v45  ;;  %v6864_v45 = vld [vmem:[#allocation11 + $0x54] ss:$8 sps:$4 sm:$0xff]  }
 0x31d   :  { %5045 = vmatpush1.bf16.msra.mxu1 %v6748_v29  ;;  %v6835_v29 = vld [vmem:[#allocation8 + $0x788] ss:$16 sps:$4 sm:$0xff]  }
 0x31e   :  { %5046 = vmatprep.subr.bf16.mxu1 %v6756_v31  ;;  %v6862_v31 = vld [vmem:[#allocation11 + $0x50] ss:$8 sps:$4 sm:$0xff]  }
 0x321   :  { %5047 = vmatpush1.bf16.msra.mxu1 %v6754_v32  ;;  %v6840_v32 = vld [vmem:[#allocation8 + $0x7ac] ss:$16 sps:$4 sm:$0xff]  }
 0x322   :  { %5048 = vmatprep.subr.bf16.mxu1 %v6762_v53  ;;  %v6867_v53 = vld [vmem:[#allocation11 + $0x64] ss:$8 sps:$4 sm:$0xff]  }
 0x325   :  { %5049 = vmatpush1.bf16.msra.mxu1 %v6760_v43  ;;  %v6838_v43 = vld [vmem:[#allocation8 + $0x7a8] ss:$16 sps:$4 sm:$0xff]  }
 0x326   :  { %5050 = vmatprep.subr.bf16.mxu1 %v6768_v35  ;;  %v6865_v35 = vld [vmem:[#allocation11 + $0x60] ss:$8 sps:$4 sm:$0xff]  }
 0x329   :  { %5051 = vmatpush1.bf16.msra.mxu1 %v6766_v36  ;;  %v6843_v36 = vld [vmem:[#allocation8 + $0x7cc] ss:$16 sps:$4 sm:$0xff]  }
 0x32a   :  { %5052 = vmatprep.subr.bf16.mxu1 %v6774_v37  ;;  %v6870_v37 = vld [vmem:[#allocation11 + $0x74] ss:$8 sps:$4 sm:$0xff]  }
 0x32d   :  { %5053 = vmatpush1.bf16.msra.mxu1 %v6772_v33  ;;  %v6841_v33 = vld [vmem:[#allocation8 + $0x7c8] ss:$16 sps:$4 sm:$0xff]  }
 0x32e   :  { %5063 = vmatprep.subr.bf16.mxu1 %v6780_v38  ;;  %v6868_v38 = vld [vmem:[#allocation11 + $0x70] ss:$8 sps:$4 sm:$0xff]  }
 0x330   :  { %5055 = vmatmul.mubr.bf16.vlgmr.msra.gmra.mrb[12].mxu1 %v7401_v15  ;;  %v6810_v15 = vld [vmem:[#allocation8 + $0x6ac] ss:$16 sps:$4 sm:$0xff]  }
 0x331   :  { %5064 = vmatpush1.bf16.msra.mxu1 %v6778_v40  ;;  %v6846_v40 = vld [vmem:[#allocation8 + $0x7ec] ss:$16 sps:$4 sm:$0xff]  }
 0x332   :  { %5065 = vmatprep.subr.bf16.mxu1 %v6786_v41  ;;  %v6873_v41 = vld [vmem:[#allocation11 + $0x84] ss:$8 sps:$4 sm:$0xff]  }
 0x335   :  { %5066 = vmatpush1.bf16.msra.mxu1 %v6784_v42  ;;  %v6844_v42 = vld [vmem:[#allocation8 + $0x7e8] ss:$16 sps:$4 sm:$0xff]  }
 0x336   :  { %5067 = vmatprep.subr.bf16.mxu1 %v6792_v44  ;;  %v6871_v44 = vld [vmem:[#allocation11 + $0x80] ss:$8 sps:$4 sm:$0xff]  }
 0x339   :  { %5068 = vmatpush1.bf16.msra.mxu1 %v6790_v46  ;;  %v6876_v46 = vld [vmem:[#allocation11 + $0x94] ss:$8 sps:$4 sm:$0xff]  }
 0x33a   :  { %5069 = vmatprep.subr.bf16.mxu1 %v6798_v48  ;;  %v6874_v48 = vld [vmem:[#allocation11 + $0x90] ss:$8 sps:$4 sm:$0xff]  }
 0x33d   :  { %5070 = vmatpush1.bf16.msra.mxu1 %v6796_v58  ;;  %v6879_v58 = vld [vmem:[#allocation11 + $0xa4] ss:$8 sps:$4 sm:$0xff]  }
 0x33e   :  { %5071 = vmatprep.subr.bf16.mxu1 %v6804_v50  ;;  %v6877_v50 = vld [vmem:[#allocation11 + $0xa0] ss:$8 sps:$4 sm:$0xff]  }
 0x341   :  { %5072 = vmatpush1.bf16.msra.mxu1 %v6802_v22  ;;  %v6880_v22 = vld [vmem:[#allocation11 + $0xb0] ss:$8 sps:$4 sm:$0xff]  }
 0x342   :  { %5073 = vmatprep.subr.bf16.mxu1 %v6810_v15  ;;  %v6883_v15 = vld [vmem:[#allocation11 + $0xc0] ss:$8 sps:$4 sm:$0xff]  }
 0x343   :  { %v3195_v56 = vpop.f32.mrb[8].mxu1 }
 0x344   :  { %v6368_v57 = vadd.f32 %v3195_v56, %v569_v47  ;;  %v3197_v61 = vpop.f32.mrb[9].mxu1  ;;  %v6886_v47 = vld [vmem:[#allocation11 + $0xd0] ss:$8 sps:$4 sm:$0xff]  }
 0x345   :  { %v6369_v63 = vadd.f32 %v3197_v61, %v573_v30  ;;  %5074 = vmatpush1.bf16.msra.mxu1 %v6808_v54  ;;  %v3199_v0 = vpop.f32.mrb[10].mxu1  ;;  %v6891_v54 = vld [vmem:[#allocation11 + $0xe4] ss:$8 sps:$4 sm:$0xff]   ;;  %v6889_v30 = vld [vmem:[#allocation11 + $0xe0] ss:$8 sps:$4 sm:$0xff]  }
 0x346   :  { %v3208_v2 = vmax.f32 %v6368_v57, 0.0  ;;  %v3200_v3 = vpop.f32.mrb[11].mxu1  ;;  %5075 = vmatprep.subr.bf16.mxu1 %v6816_v55  ;;  %v6894_v55 = vld [vmem:[#allocation11 + $0xf4] ss:$8 sps:$4 sm:$0xff]   ;;  %v6892_v56 = vld [vmem:[#allocation11 + $0xf0] ss:$8 sps:$4 sm:$0xff]  }
 0x347   :  { %v3209_v4 = vmax.f32 %v6369_v63, 0.0  ;;  %v6897_v57 = vld [vmem:[#allocation11 + $0x104] ss:$8 sps:$4 sm:$0xff]   ;;  %v7414_v61 = vld [vmem:[#allocation10] sm:$0xf] }
 0x348   :  { %v7410_v8 = vpack.c.bf16 %v3208_v2, %v3208_v2  ;;  %v3479_v63 = vrot.slane %v7414_v61, %v7347_v60  ;;  %v3483_v0 = vrot.slane %v7414_v61, %v7352_v1 }
 0x349   :  { %v3217_v5 = vpack.c.bf16 %v3209_v4, %v3209_v4  ;;  %5076 = vmatpush1.bf16.msra.mxu1 %v6814_v20 }
 0x34a   :  { %5077 = vmatprep.subr.bf16.mxu1 %v6822_v49 }
 0x34b   :  { %4931 = vmatprep.mubr.bf16.mxu0 %v3217_v5  ;;  %5095 = vmatprep.mubr.bf16.mxu1 %v3217_v5 }
 0x34c   :  { %4932 = vmatmul.mubr.bf16.vlgmr.msra.gmra.mrb[8].mxu0 %v7410_v8 }
 0x34d   :  { %5078 = vmatpush1.bf16.msra.mxu1 %v6820_v6  ;;  %5509 = vmatpush1.bf16.msra.mxu0 %v6847_v7 }
 0x34e   :  { %5079 = vmatprep.subr.bf16.mxu1 %v6825_v9  ;;  %5510 = vmatprep.subr.bf16.mxu0 %v6852_v10  ;;  %v6895_v9 = vld [vmem:[#allocation11 + $0x100] ss:$8 sps:$4 sm:$0xff]  }
 0x351   :  { %5080 = vmatpush1.bf16.msra.mxu1 %v6823_v11  ;;  %5511 = vmatpush1.bf16.msra.mxu0 %v6850_v12  ;;  %v6900_v11 = vld [vmem:[#allocation11 + $0x114] ss:$8 sps:$4 sm:$0xff]   ;;  %v6898_v12 = vld [vmem:[#allocation11 + $0x110] ss:$8 sps:$4 sm:$0xff]  }
 0x352   :  { %5081 = vmatprep.subr.bf16.mxu1 %v6828_v13  ;;  %5512 = vmatprep.subr.bf16.mxu0 %v6855_v14  ;;  %v6903_v13 = vld [vmem:[#allocation11 + $0x124] ss:$8 sps:$4 sm:$0xff]   ;;  %v6901_v14 = vld [vmem:[#allocation11 + $0x120] ss:$8 sps:$4 sm:$0xff]  }
 0x355   :  { %5082 = vmatpush1.bf16.msra.mxu1 %v6826_v62  ;;  %5513 = vmatpush1.bf16.msra.mxu0 %v6853_v16  ;;  %v6906_v62 = vld [vmem:[#allocation11 + $0x134] ss:$8 sps:$4 sm:$0xff]   ;;  %v6904_v16 = vld [vmem:[#allocation11 + $0x130] ss:$8 sps:$4 sm:$0xff]  }
 0x356   :  { %5083 = vmatprep.subr.bf16.mxu1 %v6831_v18  ;;  %5514 = vmatprep.subr.bf16.mxu0 %v6858_v19  ;;  %v6909_v18 = vld [vmem:[#allocation11 + $0x144] ss:$8 sps:$4 sm:$0xff]   ;;  %v6907_v19 = vld [vmem:[#allocation11 + $0x140] ss:$8 sps:$4 sm:$0xff]  }
 0x359   :  { %5084 = vmatpush1.bf16.msra.mxu1 %v6829_v21  ;;  %5515 = vmatpush1.bf16.msra.mxu0 %v6856_v23  ;;  %v6912_v21 = vld [vmem:[#allocation11 + $0x154] ss:$8 sps:$4 sm:$0xff]   ;;  %v6910_v23 = vld [vmem:[#allocation11 + $0x150] ss:$8 sps:$4 sm:$0xff]  }
 0x35a   :  { %5085 = vmatprep.subr.bf16.mxu1 %v6834_v24  ;;  %5516 = vmatprep.subr.bf16.mxu0 %v6861_v25  ;;  %v6915_v24 = vld [vmem:[#allocation11 + $0x164] ss:$8 sps:$4 sm:$0xff]   ;;  %v6913_v25 = vld [vmem:[#allocation11 + $0x160] ss:$8 sps:$4 sm:$0xff]  }
 0x35d   :  { %5086 = vmatpush1.bf16.msra.mxu1 %v6832_v26  ;;  %5517 = vmatpush1.bf16.msra.mxu0 %v6859_v27  ;;  %v6918_v26 = vld [vmem:[#allocation11 + $0x174] ss:$8 sps:$4 sm:$0xff]   ;;  %v3491_v27 = vrot.slane %v7414_v61, %v556_v39  ;;  %v6925_v39 = vld [vmem:[#allocation11 + $0x1a0] ss:$8 sps:$4 sm:$0xff]  }
 0x35e   :  { %5087 = vmatprep.subr.bf16.mxu1 %v6837_v28  ;;  %5518 = vmatprep.subr.bf16.mxu0 %v6864_v45  ;;  %v6916_v28 = vld [vmem:[#allocation11 + $0x170] ss:$8 sps:$4 sm:$0xff]   ;;  %v6921_v45 = vld [vmem:[#allocation11 + $0x184] ss:$8 sps:$4 sm:$0xff]  }
 0x361   :  { %5088 = vmatpush1.bf16.msra.mxu1 %v6835_v29  ;;  %5519 = vmatpush1.bf16.msra.mxu0 %v6862_v31 }
 0x362   :  { %5089 = vmatprep.subr.bf16.mxu1 %v6840_v32  ;;  %5520 = vmatprep.subr.bf16.mxu0 %v6867_v53 }
 0x365   :  { %5090 = vmatpush1.bf16.msra.mxu1 %v6838_v43  ;;  %5521 = vmatpush1.bf16.msra.mxu0 %v6865_v35  ;;  %v6919_v43 = vld [vmem:[#allocation11 + $0x180] ss:$8 sps:$4 sm:$0xff]  }
 0x366   :  { %5091 = vmatprep.subr.bf16.mxu1 %v6843_v36  ;;  %5522 = vmatprep.subr.bf16.mxu0 %v6870_v37  ;;  %v6924_v36 = vld [vmem:[#allocation11 + $0x194] ss:$8 sps:$4 sm:$0xff]  }
 0x369   :  { %5092 = vmatpush1.bf16.msra.mxu1 %v6841_v33  ;;  %5523 = vmatpush1.bf16.msra.mxu0 %v6868_v38  ;;  %v6922_v38 = vld [vmem:[#allocation11 + $0x190] ss:$8 sps:$4 sm:$0xff]  }
 0x36a   :  { %5093 = vmatprep.subr.bf16.mxu1 %v6846_v40  ;;  %5524 = vmatprep.subr.bf16.mxu0 %v6873_v41  ;;  %v6930_v40 = vld [vmem:[#allocation11 + $0x1b4] ss:$8 sps:$4 sm:$0xff]   ;;  %v6928_v41 = vld [vmem:[#allocation11 + $0x1b0] ss:$8 sps:$4 sm:$0xff]  }
 0x36d   :  { %5094 = vmatpush1.bf16.msra.mxu1 %v6844_v42  ;;  %5525 = vmatpush1.bf16.msra.mxu0 %v6871_v44  ;;  %v6933_v42 = vld [vmem:[#allocation11 + $0x1c4] ss:$8 sps:$4 sm:$0xff]   ;;  %v6931_v44 = vld [vmem:[#allocation11 + $0x1c0] ss:$8 sps:$4 sm:$0xff]  }
 0x36e   :  { %5526 = vmatprep.subr.bf16.mxu0 %v6876_v46  ;;  %v6936_v46 = vld [vmem:[#allocation11 + $0x1d4] ss:$8 sps:$4 sm:$0xff]  }
 0x370   :  { %5096 = vmatmul.mubr.bf16.vlgmr.msra.gmra.mrb[12].mxu1 %v7410_v8 }
 0x371   :  { %5527 = vmatpush1.bf16.msra.mxu0 %v6874_v48  ;;  %v6934_v48 = vld [vmem:[#allocation11 + $0x1d0] ss:$8 sps:$4 sm:$0xff]  }
 0x372   :  { %5528 = vmatprep.subr.bf16.mxu0 %v6879_v58  ;;  %v3487_v58 = vrot.slane %v7414_v61, %v7378_v34 }
 0x375   :  { %5529 = vmatpush1.bf16.msra.mxu0 %v6877_v50  ;;  %v6939_v50 = vld [vmem:[#allocation11 + $0x1e4] ss:$8 sps:$4 sm:$0xff]  }
 0x376   :  { %5530 = vmatprep.subr.bf16.mxu0 %v6882_v51  ;;  %v6937_v51 = vld [vmem:[#allocation11 + $0x1e0] ss:$8 sps:$4 sm:$0xff]  }
 0x379   :  { %5531 = vmatpush1.bf16.msra.mxu0 %v6880_v22 }
 0x37a   :  { %5532 = vmatprep.subr.bf16.mxu0 %v6885_v59  ;;  %v6942_v59 = vld [vmem:[#allocation11 + $0x1f4] ss:$8 sps:$4 sm:$0xff]  }
 0x37d   :  { %5533 = vmatpush1.bf16.msra.mxu0 %v6883_v15  ;;  %v6940_v15 = vld [vmem:[#allocation11 + $0x1f0] ss:$8 sps:$4 sm:$0xff]  }
 0x37e   :  { %5534 = vmatprep.subr.bf16.mxu0 %v6888_v52 }
 0x381   :  { %5535 = vmatpush1.bf16.msra.mxu0 %v6886_v47 }
 0x382   :  { %5536 = vmatprep.subr.bf16.mxu0 %v6891_v54  ;;  %v5592_v54 = vld [vmem:[#allocation14] sm:$0x3] }
 0x385   :  { %5537 = vmatpush1.bf16.msra.mxu0 %v6889_v30  ;;  %v5593_v30 = vunpack.c.l.bf16 %v5592_v54 }
 0x386   :  { %5538 = vmatprep.subr.bf16.mxu0 %v6894_v55  ;;  %v5176_v55 = vld [vmem:[#allocation13] sm:$0x3] }
 0x387   :  { %v5185_v61 = vrot.slane %v5176_v55, %v7352_v1 }
 0x389   :  { %5539 = vmatpush1.bf16.msra.mxu0 %v6892_v56  ;;  %v5181_v56 = vrot.slane %v5176_v55, %v7347_v60 }
 0x38a   :  { %5549 = vmatprep.subr.bf16.mxu0 %v6897_v57  ;;  %v5598_v57 = vrot.slane %v5593_v30, %v7347_v60 }
 0x41f   :  { %v4933_v20 = vpop.f32.mrb[8].mxu0 }
 0x420   :  { %v6370_v2 = vadd.f32 %v4933_v20, %v3479_v63  ;;  %v4935_v3 = vpop.f32.mrb[9].mxu0  ;;  %v5602_v63 = vrot.slane %v5593_v30, %v7378_v34 }
 0x421   :  { %v6371_v49 = vadd.f32 %v4935_v3, %v3483_v0  ;;  %v4937_v4 = vpop.f32.mrb[10].mxu0  ;;  %v5608_v3 = vrot.slane %v5598_v57, %v7347_v60 }
 0x422   :  { %v5104_v5 = vmax.f32 %v6370_v2, 0.0  ;;  %v4938_v6 = vpop.f32.mrb[11].mxu0 }
 0x423   :  { %v5105_v7 = vmax.f32 %v6371_v49, 0.0 }
 0x424   :  { %v5108_v10 = vpack.c.bf16 %v5104_v5, %v5104_v5  ;;  %v5612_v5 = vrot.slane %v5602_v63, %v7347_v60 }
 0x425   :  { %v5109_v8 = vpack.c.bf16 %v5105_v7, %v5105_v7 }
 0x427   :  { %5540 = vmatprep.mubr.bf16.mxu0 %v5109_v8 }
 0x428   :  { %5541 = vmatmul.mubr.bf16.vlgmr.msra.gmra.mrb[12].mxu0 %v5108_v10 }
 0x429   :  { %5550 = vmatpush1.bf16.msra.mxu0 %v6895_v9 }
 0x42a   :  { %5551 = vmatprep.subr.bf16.mxu0 %v6900_v11 }
 0x42d   :  { %5552 = vmatpush1.bf16.msra.mxu0 %v6898_v12  ;;  %v6359_v12 = vld [vmem:[#allocation2] ss:$0 sm:$0xff] }
 0x42e   :  { %5553 = vmatprep.subr.bf16.mxu0 %v6903_v13 }
 0x431   :  { %5554 = vmatpush1.bf16.msra.mxu0 %v6901_v14 }
 0x432   :  { %5555 = vmatprep.subr.bf16.mxu0 %v6906_v62 }
 0x435   :  { %5556 = vmatpush1.bf16.msra.mxu0 %v6904_v16 }
 0x436   :  { %5557 = vmatprep.subr.bf16.mxu0 %v6909_v18 }
 0x439   :  { %5558 = vmatpush1.bf16.msra.mxu0 %v6907_v19 }
 0x43a   :  { %5559 = vmatprep.subr.bf16.mxu0 %v6912_v21 }
 0x43d   :  { %5560 = vmatpush1.bf16.msra.mxu0 %v6910_v23 }
 0x43e   :  { %5561 = vmatprep.subr.bf16.mxu0 %v6915_v24 }
 0x441   :  { %5562 = vmatpush1.bf16.msra.mxu0 %v6913_v25 }
 0x442   :  { %5563 = vmatprep.subr.bf16.mxu0 %v6918_v26 }
 0x443   :  { %v5097_v29 = vpop.f32.mrb[12].mxu1 }
 0x444   :  { %v5099_v31 = vpop.f32.mrb[13].mxu1  ;;  %v6372_v22 = vadd.f32 %v5097_v29, %v3487_v58 }
 0x445   :  { %v6373_v32 = vadd.f32 %v5099_v31, %v3491_v27  ;;  %v5101_v53 = vpop.f32.mrb[14].mxu1  ;;  %5564 = vmatpush1.bf16.msra.mxu0 %v6916_v28 }
 0x446   :  { %v5102_v35 = vpop.f32.mrb[15].mxu1  ;;  %5565 = vmatprep.subr.bf16.mxu0 %v6921_v45  ;;  %v5106_v52 = vmax.f32 %v6372_v22, 0.0 }
 0x447   :  { %v5107_v37 = vmax.f32 %v6373_v32, 0.0 }
 0x448   :  { %v5110_v47 = vpack.c.bf16 %v5106_v52, %v5106_v52 }
 0x449   :  { %v5111_v33 = vpack.c.bf16 %v5107_v37, %v5107_v37  ;;  %5566 = vmatpush1.bf16.msra.mxu0 %v6919_v43 }
 0x44a   :  { %5567 = vmatprep.subr.bf16.mxu0 %v6924_v36 }
 0x44b   :  { %5581 = vmatprep.mubr.bf16.mxu0 %v5111_v33 }
 0x44d   :  { %5568 = vmatpush1.bf16.msra.mxu0 %v6922_v38 }
 0x44e   :  { %5569 = vmatprep.subr.bf16.mxu0 %v6927_v17 }
 0x451   :  { %5570 = vmatpush1.bf16.msra.mxu0 %v6925_v39 }
 0x452   :  { %5571 = vmatprep.subr.bf16.mxu0 %v6930_v40 }
 0x455   :  { %5572 = vmatpush1.bf16.msra.mxu0 %v6928_v41 }
 0x456   :  { %5573 = vmatprep.subr.bf16.mxu0 %v6933_v42 }
 0x459   :  { %5574 = vmatpush1.bf16.msra.mxu0 %v6931_v44 }
 0x45a   :  { %5575 = vmatprep.subr.bf16.mxu0 %v6936_v46 }
 0x45d   :  { %5576 = vmatpush1.bf16.msra.mxu0 %v6934_v48 }
 0x45e   :  { %5577 = vmatprep.subr.bf16.mxu0 %v6939_v50 }
 0x461   :  { %5578 = vmatpush1.bf16.msra.mxu0 %v6937_v51 }
 0x462   :  { %5579 = vmatprep.subr.bf16.mxu0 %v6942_v59 }
 0x465   :  { %5580 = vmatpush1.bf16.msra.mxu0 %v6940_v15 }
 0x468   :  { %5582 = vmatmul.mubr.bf16.vlgmr.msra.gmra.mrb[12].mxu0 %v5110_v47 }
 0x53b   :  { %v5583_v0 = vpop.f32.mrb[12].mxu0 }
 0x53c   :  { %v6374_v20 = vadd.f32 %v5583_v0, %v5181_v56  ;;  %v5585_v2 = vpop.f32.mrb[13].mxu0 }
 0x53d   :  { %v6375_v49 = vadd.f32 %v5585_v2, %v5185_v61  ;;  %v5587_v4 = vpop.f32.mrb[14].mxu0 }
 0x53e   :  { %v5590_v6 = vmax.f32 %v6374_v20, 0.0  ;;  %v5588_v7 = vpop.f32.mrb[15].mxu0 }
 0x53f   :  { %v5591_v8 = vmax.f32 %v6375_v49, 0.0 }
 0x540   :  { %v5613_v9 = vmul.f32 %v5608_v3, %v5590_v6 }
 0x541   :  { %v5614_v10 = vmul.f32 %v5612_v5, %v5591_v8 }
 0x543   :  { %v5615_v11 = vadd.f32 %v5614_v10, %v5613_v9 }
 0x545   :  { %5616 = vadd.xlane.f32.xlu0 %v5615_v11 }
 0x5d2   :  { %v5617_v1 = vpop.xlane.xlu0 %5616 }
 0x5d3   :  { %v5625_v13 = vadd.f32 %v6359_v12, %v5617_v1 }
 0x5d5   :  { %v5626_v34 = vsub.f32 0.0, %v5625_v13 }
 0x5d7   :  { %v5627_v14 = vmul.f32 1.442695, %v5626_v34 }
 0x5d9   :  { %6943 = vpow2.f32 %v5627_v14 }
 0x5e3   :  { %v6944_v62 = vpop.eup %6943 }
 0x5e4   :  { %v5629_v16 = vadd.f32 1.0, %v6944_v62 }
 0x5e6   :  { %6945 = vrcp.f32 %v5629_v16 }
 0x5f0   :  { %v6946_v18 = vpop.eup %6945 }
 0x5f1   :  { %5633 = vst.msk [vmem:[%s7443_s9] sm:$0xff] %vm5632_vm1, %v6946_v18 }
 0x5f2   :  { %5638 = vsyncpa [#allocation4], 1 }
 0x5f3   :  { %5639 = vsyncpa [#allocation6], 1 }
 0x5f4   :  { %5640 = vsyncpa [#allocation9], 1 }
 0x5f5   :  { %5641 = vsyncpa [#allocation12], 1 }
 0x5f6   :  { %5642 = vsyncpa [#allocation15], 1 }

</bundles_post_ra>
